<compile_context>
chip_gen: v7x
topology: tpu7x:2x2x1
jax: 0.10.0
libtpu: 0.0.40
codegen_flags: <defaults>
</compile_context>

<pallas_src>
import math
import functools

import jax
import jax.numpy as jnp
import numpy as np
from jax.experimental import pallas as pl
from jax.experimental.pallas import tpu as pltpu

# ----------------------------- model config ---------------------------------
BATCH = 2
SEQ_LEN = 10          # module default seq_len=10
INPUT_DIM = 8
OUTPUT_DIM = 4
OUT_PAD = 128         # lane-dense padded output width (sliced back outside)
D_MODEL = 64
N_HEAD = 4
D_FF = 128
NUM_LAYERS = 2
HEAD_DIM = D_MODEL // N_HEAD
LN_EPS = 1e-5


# ------------------------------- kernel -------------------------------------
def transformer_kernel(x_ref,        # (S*B, INPUT_DIM)        seq-major rows
                       peb_ref,      # (S*B, D_MODEL)          pos-enc + emb bias
                       emb_w_ref,    # (INPUT_DIM, D_MODEL)
                       wqkv_ref,     # (L, D_MODEL, 3*D_MODEL) q-part pre-scaled
                       wo_ref,       # (L, D_MODEL, D_MODEL)
                       w1_ref,       # (L, D_MODEL, D_FF)
                       w2_ref,       # (L, D_FF, D_MODEL)
                       lvec_ref,     # (L, 8, 3*D_MODEL) packed per-layer vectors
                       bias_ref,     # (S*B, S*B) additive block-diag attn mask
                       out_w_ref,    # (S*D_MODEL, OUT_PAD)
                       out_b_ref,    # (1, OUT_PAD)
                       o_ref,        # (B, OUT_PAD)
                       *, batch):
    def layer_norm(v, g, b):
        mu = jnp.mean(v, axis=-1, keepdims=True)
        var = jnp.mean((v - mu) ** 2, axis=-1, keepdims=True)
        return (v - mu) * jax.lax.rsqrt(var + LN_EPS) * g + b

    bias = bias_ref[...]

    # embedding + (positional encoding fused with embedding bias)
    h = jnp.dot(x_ref[...], emb_w_ref[...],
                preferred_element_type=jnp.float32) + peb_ref[...]

    # encoder layers (static unroll: NUM_LAYERS is small)
    for l in range(NUM_LAYERS):
        vec = lvec_ref[l]                     # (8, 3*D_MODEL)
        bqkv = vec[0:1, :]
        bo = vec[1:2, :D_MODEL]
        b1 = vec[2:3, :D_FF]
        b2 = vec[3:4, :D_MODEL]
        g1 = vec[4:5, :D_MODEL]
        be1 = vec[5:6, :D_MODEL]
        g2 = vec[6:7, :D_MODEL]
        be2 = vec[7:8, :D_MODEL]

        # fused QKV projection (softmax scale folded into the Q weights/bias)
        qkv = jnp.dot(h, wqkv_ref[l],
                      preferred_element_type=jnp.float32) + bqkv   # (R, 3D)

        heads = []
        for hh in range(N_HEAD):
            lo = hh * HEAD_DIM
            hi = lo + HEAD_DIM
            qh = qkv[:, lo:hi]
            kh = qkv[:, D_MODEL + lo:D_MODEL + hi]
            vh = qkv[:, 2 * D_MODEL + lo:2 * D_MODEL + hi]
            s = jax.lax.dot_general(qh, kh, (((1,), (1,)), ((), ())),
                                    preferred_element_type=jnp.float32)
            s = s + bias                       # mask cross-sequence positions
            s = s - jnp.max(s, axis=-1, keepdims=True)
            p = jnp.exp(s)
            p = p / jnp.sum(p, axis=-1, keepdims=True)
            heads.append(jnp.dot(p, vh, preferred_element_type=jnp.float32))

        # concatenate heads, single full-width output projection
        attn = jnp.concatenate(heads, axis=-1)                     # (R, D)
        attn = jnp.dot(attn, wo_ref[l],
                       preferred_element_type=jnp.float32) + bo

        h = layer_norm(h + attn, g1, be1)

        ff = jnp.dot(h, w1_ref[l], preferred_element_type=jnp.float32) + b1
        ff = jnp.maximum(ff, 0.0)
        ff = jnp.dot(ff, w2_ref[l], preferred_element_type=jnp.float32) + b2

        h = layer_norm(h + ff, g2, be2)

    # Flatten: rows are seq-major (row = s*B + b), so chunk s is the
    # (batch, D_MODEL) block of sequence position s; lane-concat reproduces
    # PyTorch's x.reshape(B, -1).  Then ONE matmul for the output projection.
    hflat = jnp.concatenate(
        [h[s * batch:(s + 1) * batch, :] for s in range(SEQ_LEN)], axis=-1)
    out = jnp.dot(hflat, out_w_ref[...],
                  preferred_element_type=jnp.float32) + out_b_ref[...]
    o_ref[...] = out


# --------------------------- parameter packing --------------------------------
def pack_params(params):
    """Fuse / pack the logical parameters into the kernel input layout."""
    scale = 1.0 / math.sqrt(HEAD_DIM)
    # fold the attention scale into the Q projection (weight AND bias)
    wqkv = jnp.concatenate(
        [params["wq"] * scale, params["wk"], params["wv"]], axis=-1)   # (L,D,3D)
    bqkv = jnp.concatenate(
        [params["bq"] * scale, params["bk"], params["bv"]], axis=-1)   # (L,1,3D)

    w3 = 3 * D_MODEL

    def pad_row(a):  # (L,1,n) -> (L,1,3D)
        return jnp.pad(a, ((0, 0), (0, 0), (0, w3 - a.shape[-1])))

    lvec = jnp.concatenate(
        [bqkv,
         pad_row(params["bo"]), pad_row(params["b1"]), pad_row(params["b2"]),
         pad_row(params["g1"]), pad_row(params["be1"]),
         pad_row(params["g2"]), pad_row(params["be2"])], axis=1)       # (L,8,3D)

    out_w = params["out_w"].reshape(SEQ_LEN * D_MODEL, OUTPUT_DIM)
    out_w = jnp.pad(out_w, ((0, 0), (0, OUT_PAD - OUTPUT_DIM)))
    out_b = jnp.pad(params["out_b"], ((0, 0), (0, OUT_PAD - OUTPUT_DIM)))

    return dict(emb_w=params["emb_w"], emb_b=params["emb_b"], pe=params["pe"],
                wqkv=wqkv, wo=params["wo"], w1=params["w1"], w2=params["w2"],
                lvec=lvec, out_w=out_w, out_b=out_b)


# ------------------------------- wrapper -------------------------------------
@jax.jit
def transformer_forward(x, params):
    B, S, _ = x.shape
    p = pack_params(params)

    # seq-major / batch-minor row layout: row = s*B + b
    x_sm = x.transpose(1, 0, 2).reshape(S * B, INPUT_DIM)
    peb = jnp.repeat(p["pe"], B, axis=0) + p["emb_b"]            # (S*B, D)

    # additive block-diagonal attention mask (same sequence iff row%B == col%B)
    ridx = jnp.arange(S * B) % B
    attn_bias = jnp.where(ridx[:, None] == ridx[None, :],
                          0.0, -1e30).astype(jnp.float32)

    ordered = [x_sm, peb, p["emb_w"], p["wqkv"], p["wo"], p["w1"], p["w2"],
               p["lvec"], attn_bias, p["out_w"], p["out_b"]]

    def full(a):
        nd = a.ndim
        return pl.BlockSpec(a.shape, lambda i, nd=nd: (0,) * nd)

    out = pl.pallas_call(
        functools.partial(transformer_kernel, batch=B),
        out_shape=jax.ShapeDtypeStruct((B, OUT_PAD), jnp.float32),
        grid_spec=pltpu.PrefetchScalarGridSpec(
            num_scalar_prefetch=0,
            grid=(1,),                       # whole batch in one kernel step
            in_specs=[full(a) for a in ordered],
            out_specs=pl.BlockSpec((B, OUT_PAD), lambda i: (0, 0)),
        ),
        compiler_params=pltpu.CompilerParams(
            dimension_semantics=("arbitrary",)),
    )(*ordered)
    return out[:, :OUTPUT_DIM]


# --------------------------- parameter creation ------------------------------
def make_params(key):
    def lin(k, fan_in, fan_out):
        # deterministic init; weight stored as (in, out) so kernel does x @ W + b
        kw, kb = jax.random.split(k)
        bound = 1.0 / math.sqrt(fan_in)
        w = jax.random.uniform(kw, (fan_in, fan_out), jnp.float32, -bound, bound)
        b = jax.random.uniform(kb, (1, fan_out), jnp.float32, -bound, bound)
        return w, b

    keys = jax.random.split(key, 4 + NUM_LAYERS)
    emb_w, emb_b = lin(keys[0], INPUT_DIM, D_MODEL)
    out_w_flat, out_b = lin(keys[1], D_MODEL * SEQ_LEN, OUTPUT_DIM)
    out_w = out_w_flat.reshape(SEQ_LEN, D_MODEL, OUTPUT_DIM)

    # sinusoidal positional encoding table
    pos = np.arange(SEQ_LEN, dtype=np.float32)[:, None]
    div = np.exp(np.arange(0, D_MODEL, 2, dtype=np.float32)
                 * (-math.log(10000.0) / D_MODEL))
    pe = np.zeros((SEQ_LEN, D_MODEL), np.float32)
    pe[:, 0::2] = np.sin(pos * div)
    pe[:, 1::2] = np.cos(pos * div)
    pe = jnp.asarray(pe)

    per_layer = {k: [] for k in
                 ["wq", "bq", "wk", "bk", "wv", "bv", "wo", "bo",
                  "w1", "b1", "w2", "b2", "g1", "be1", "g2", "be2"]}
    for l in range(NUM_LAYERS):
        lk = jax.random.split(keys[4 + l], 6)
        wq, bq = lin(lk[0], D_MODEL, D_MODEL)
        wk, bk = lin(lk[1], D_MODEL, D_MODEL)
        wv, bv = lin(lk[2], D_MODEL, D_MODEL)
        wo, bo = lin(lk[3], D_MODEL, D_MODEL)
        w1, b1 = lin(lk[4], D_MODEL, D_FF)
        w2, b2 = lin(lk[5], D_FF, D_MODEL)
        vals = dict(wq=wq, bq=bq, wk=wk, bk=bk, wv=wv, bv=bv, wo=wo, bo=bo,
                    w1=w1, b1=b1, w2=w2, b2=b2,
                    g1=jnp.ones((1, D_MODEL), jnp.float32),
                    be1=jnp.zeros((1, D_MODEL), jnp.float32),
                    g2=jnp.ones((1, D_MODEL), jnp.float32),
                    be2=jnp.zeros((1, D_MODEL), jnp.float32))
        for k, v in vals.items():
            per_layer[k].append(v)

    params = {k: jnp.stack(v, axis=0) for k, v in per_layer.items()}
    params.update(dict(emb_w=emb_w, emb_b=emb_b, out_w=out_w, out_b=out_b, pe=pe))
    return params


# ------------------------------ pure-JAX reference ---------------------------
def reference(x, p):
    B = x.shape[0]
    h = x @ p["emb_w"] + p["emb_b"]
    h = h + p["pe"][None]
    for l in range(NUM_LAYERS):
        q = h @ p["wq"][l] + p["bq"][l]
        k = h @ p["wk"][l] + p["bk"][l]
        v = h @ p["wv"][l] + p["bv"][l]
        qh = q.reshape(B, SEQ_LEN, N_HEAD, HEAD_DIM).transpose(0, 2, 1, 3)
        kh = k.reshape(B, SEQ_LEN, N_HEAD, HEAD_DIM).transpose(0, 2, 1, 3)
        vh = v.reshape(B, SEQ_LEN, N_HEAD, HEAD_DIM).transpose(0, 2, 1, 3)
        s = jnp.einsum("bhqd,bhkd->bhqk", qh, kh) / math.sqrt(HEAD_DIM)
        pmat = jax.nn.softmax(s, axis=-1)
        head = jnp.einsum("bhqk,bhkd->bhqd", pmat, vh)
        attn = head.transpose(0, 2, 1, 3).reshape(B, SEQ_LEN, D_MODEL)
        attn = attn @ p["wo"][l] + p["bo"][l]

        def ln(v, g, b):
            mu = jnp.mean(v, -1, keepdims=True)
            var = jnp.mean((v - mu) ** 2, -1, keepdims=True)
            return (v - mu) * jax.lax.rsqrt(var + LN_EPS) * g + b

        h = ln(h + attn, p["g1"][l], p["be1"][l])
        ff = jnp.maximum(h @ p["w1"][l] + p["b1"][l], 0.0)
        ff = ff @ p["w2"][l] + p["b2"][l]
        h = ln(h + ff, p["g2"][l], p["be2"][l])
    flat = h.reshape(B, SEQ_LEN * D_MODEL)
    return flat @ p["out_w"].reshape(SEQ_LEN * D_MODEL, OUTPUT_DIM) + p["out_b"]


# ---------------------------------- main --------------------------------------
if __name__ == "__main__":
    key = jax.random.PRNGKey(0)
    kx, kp = jax.random.split(key)
    x = jax.random.normal(kx, (BATCH, SEQ_LEN, INPUT_DIM), jnp.float32)
    params = make_params(kp)

    out = jax.block_until_ready(transformer_forward(x, params))

    ref = reference(x, params)
    np.testing.assert_allclose(np.asarray(out), np.asarray(ref),
                               rtol=1e-4, atol=1e-4)
    print("KERNEL_OK")
</pallas_src>

<mosaic_0001>
module attributes {stable_mosaic.version = 11 : i64} {
  func.func @transformer_kernel(%arg0: i32, %arg1: memref<20x8xf32, #tpu.memory_space<vmem>>, %arg2: memref<20x64xf32, #tpu.memory_space<vmem>>, %arg3: memref<8x64xf32, #tpu.memory_space<vmem>>, %arg4: memref<2x64x192xf32, #tpu.memory_space<vmem>>, %arg5: memref<2x64x64xf32, #tpu.memory_space<vmem>>, %arg6: memref<2x64x128xf32, #tpu.memory_space<vmem>>, %arg7: memref<2x128x64xf32, #tpu.memory_space<vmem>>, %arg8: memref<2x8x192xf32, #tpu.memory_space<vmem>>, %arg9: memref<20x20xf32, #tpu.memory_space<vmem>>, %arg10: memref<640x128xf32, #tpu.memory_space<vmem>>, %arg11: memref<1x128xf32, #tpu.memory_space<vmem>>, %arg12: memref<2x128xf32, #tpu.memory_space<vmem>>) attributes {dimension_semantics = [#tpu.dimension_semantics<arbitrary>], iteration_bounds = array<i64: 1>, scalar_prefetch = 0 : i64, scratch_operands = 0 : i64, tpu.core_type = #tpu.core_type<tc>, window_params = [{pipeline_mode = #tpu.pipeline_mode<synchronous>, transform_indices = @transform_0, window_bounds = array<i64: 20, 8>}, {pipeline_mode = #tpu.pipeline_mode<synchronous>, transform_indices = @transform_1, window_bounds = array<i64: 20, 64>}, {pipeline_mode = #tpu.pipeline_mode<synchronous>, transform_indices = @transform_2, window_bounds = array<i64: 8, 64>}, {pipeline_mode = #tpu.pipeline_mode<synchronous>, transform_indices = @transform_3, window_bounds = array<i64: 2, 64, 192>}, {pipeline_mode = #tpu.pipeline_mode<synchronous>, transform_indices = @transform_4, window_bounds = array<i64: 2, 64, 64>}, {pipeline_mode = #tpu.pipeline_mode<synchronous>, transform_indices = @transform_5, window_bounds = array<i64: 2, 64, 128>}, {pipeline_mode = #tpu.pipeline_mode<synchronous>, transform_indices = @transform_6, window_bounds = array<i64: 2, 128, 64>}, {pipeline_mode = #tpu.pipeline_mode<synchronous>, transform_indices = @transform_7, window_bounds = array<i64: 2, 8, 192>}, {pipeline_mode = #tpu.pipeline_mode<synchronous>, transform_indices = @transform_8, window_bounds = array<i64: 20, 20>}, {pipeline_mode = #tpu.pipeline_mode<synchronous>, transform_indices = @transform_9, window_bounds = array<i64: 640, 128>}, {pipeline_mode = #tpu.pipeline_mode<synchronous>, transform_indices = @transform_10, window_bounds = array<i64: 1, 128>}, {pipeline_mode = #tpu.pipeline_mode<synchronous>, transform_indices = @transform_11, window_bounds = array<i64: 2, 128>}]} {
    %c0 = arith.constant 0 : index
    %c0_0 = arith.constant 0 : index
    %0 = vector.load %arg9[%c0, %c0_0] : memref<20x20xf32, #tpu.memory_space<vmem>>, vector<20x20xf32>
    %c0_1 = arith.constant 0 : index
    %c0_2 = arith.constant 0 : index
    %1 = vector.load %arg1[%c0_1, %c0_2] : memref<20x8xf32, #tpu.memory_space<vmem>>, vector<20x8xf32>
    %c0_3 = arith.constant 0 : index
    %c0_4 = arith.constant 0 : index
    %2 = vector.load %arg3[%c0_3, %c0_4] : memref<8x64xf32, #tpu.memory_space<vmem>>, vector<8x64xf32>
    %cst = arith.constant dense<0.000000e+00> : vector<20x64xf32>
    %3 = tpu.matmul %1, %2, %cst {dimension_numbers = #tpu.dot_dimension_numbers<[1], [0], [0], [1], [0, 0, 1, 1], [], []>} : vector<20x8xf32>, vector<8x64xf32>, vector<20x64xf32> -> vector<20x64xf32>
    %c0_5 = arith.constant 0 : index
    %c0_6 = arith.constant 0 : index
    %4 = vector.load %arg2[%c0_5, %c0_6] : memref<20x64xf32, #tpu.memory_space<vmem>>, vector<20x64xf32>
    %5 = arith.addf %3, %4 : vector<20x64xf32>
    %c0_7 = arith.constant 0 : index
    %c0_8 = arith.constant 0 : index
    %c0_9 = arith.constant 0 : index
    %6 = vector.load %arg8[%c0_7, %c0_8, %c0_9] : memref<2x8x192xf32, #tpu.memory_space<vmem>>, vector<1x8x192xf32>
    %7 = vector.shape_cast %6 : vector<1x8x192xf32> to vector<8x192xf32>
    %8 = vector.extract_strided_slice %7 {offsets = [0, 0], sizes = [1, 192], strides = [1, 1]} : vector<8x192xf32> to vector<1x192xf32>
    %9 = vector.extract_strided_slice %7 {offsets = [1, 0], sizes = [1, 64], strides = [1, 1]} : vector<8x192xf32> to vector<1x64xf32>
    %10 = vector.extract_strided_slice %7 {offsets = [2, 0], sizes = [1, 128], strides = [1, 1]} : vector<8x192xf32> to vector<1x128xf32>
    %11 = vector.extract_strided_slice %7 {offsets = [3, 0], sizes = [1, 64], strides = [1, 1]} : vector<8x192xf32> to vector<1x64xf32>
    %12 = vector.extract_strided_slice %7 {offsets = [4, 0], sizes = [1, 64], strides = [1, 1]} : vector<8x192xf32> to vector<1x64xf32>
    %13 = vector.extract_strided_slice %7 {offsets = [5, 0], sizes = [1, 64], strides = [1, 1]} : vector<8x192xf32> to vector<1x64xf32>
    %14 = vector.extract_strided_slice %7 {offsets = [6, 0], sizes = [1, 64], strides = [1, 1]} : vector<8x192xf32> to vector<1x64xf32>
    %15 = vector.extract_strided_slice %7 {offsets = [7, 0], sizes = [1, 64], strides = [1, 1]} : vector<8x192xf32> to vector<1x64xf32>
    %c0_10 = arith.constant 0 : index
    %c0_11 = arith.constant 0 : index
    %c0_12 = arith.constant 0 : index
    %16 = vector.load %arg4[%c0_10, %c0_11, %c0_12] : memref<2x64x192xf32, #tpu.memory_space<vmem>>, vector<1x64x192xf32>
    %17 = vector.shape_cast %16 : vector<1x64x192xf32> to vector<64x192xf32>
    %cst_13 = arith.constant dense<0.000000e+00> : vector<20x192xf32>
    %18 = tpu.matmul %5, %17, %cst_13 {dimension_numbers = #tpu.dot_dimension_numbers<[1], [0], [0], [1], [0, 0, 1, 1], [], []>} : vector<20x64xf32>, vector<64x192xf32>, vector<20x192xf32> -> vector<20x192xf32>
    %19 = vector.broadcast %8 : vector<1x192xf32> to vector<20x192xf32>
    %20 = arith.addf %18, %19 : vector<20x192xf32>
    %21 = vector.extract_strided_slice %20 {offsets = [0, 0], sizes = [20, 16], strides = [1, 1]} : vector<20x192xf32> to vector<20x16xf32>
    %22 = vector.extract_strided_slice %20 {offsets = [0, 64], sizes = [20, 16], strides = [1, 1]} : vector<20x192xf32> to vector<20x16xf32>
    %23 = vector.extract_strided_slice %20 {offsets = [0, 128], sizes = [20, 16], strides = [1, 1]} : vector<20x192xf32> to vector<20x16xf32>
    %cst_14 = arith.constant dense<0.000000e+00> : vector<20x20xf32>
    %24 = tpu.matmul %21, %22, %cst_14 {dimension_numbers = #tpu.dot_dimension_numbers<[1], [1], [0], [0], [0, 0, 1, 0], [], []>} : vector<20x16xf32>, vector<20x16xf32>, vector<20x20xf32> -> vector<20x20xf32>
    %25 = arith.addf %24, %0 : vector<20x20xf32>
    %cst_15 = arith.constant dense<0xFF800000> : vector<20xf32>
    %26 = vector.multi_reduction <maximumf>, %25, %cst_15 [1] : vector<20x20xf32> to vector<20xf32>
    %27 = vector.shape_cast %26 : vector<20xf32> to vector<20x1xf32>
    %28 = vector.broadcast %27 : vector<20x1xf32> to vector<20x20xf32>
    %29 = arith.subf %25, %28 : vector<20x20xf32>
    %30 = math.exp %29 : vector<20x20xf32>
    %cst_16 = arith.constant dense<0.000000e+00> : vector<20xf32>
    %31 = vector.multi_reduction <add>, %30, %cst_16 [1] : vector<20x20xf32> to vector<20xf32>
    %32 = vector.shape_cast %31 : vector<20xf32> to vector<20x1xf32>
    %33 = vector.broadcast %32 : vector<20x1xf32> to vector<20x20xf32>
    %34 = arith.divf %30, %33 : vector<20x20xf32>
    %cst_17 = arith.constant dense<0.000000e+00> : vector<20x16xf32>
    %35 = tpu.matmul %34, %23, %cst_17 {dimension_numbers = #tpu.dot_dimension_numbers<[1], [0], [0], [1], [0, 0, 1, 1], [], []>} : vector<20x20xf32>, vector<20x16xf32>, vector<20x16xf32> -> vector<20x16xf32>
    %36 = vector.extract_strided_slice %20 {offsets = [0, 16], sizes = [20, 16], strides = [1, 1]} : vector<20x192xf32> to vector<20x16xf32>
    %37 = vector.extract_strided_slice %20 {offsets = [0, 80], sizes = [20, 16], strides = [1, 1]} : vector<20x192xf32> to vector<20x16xf32>
    %38 = vector.extract_strided_slice %20 {offsets = [0, 144], sizes = [20, 16], strides = [1, 1]} : vector<20x192xf32> to vector<20x16xf32>
    %cst_18 = arith.constant dense<0.000000e+00> : vector<20x20xf32>
    %39 = tpu.matmul %36, %37, %cst_18 {dimension_numbers = #tpu.dot_dimension_numbers<[1], [1], [0], [0], [0, 0, 1, 0], [], []>} : vector<20x16xf32>, vector<20x16xf32>, vector<20x20xf32> -> vector<20x20xf32>
    %40 = arith.addf %39, %0 : vector<20x20xf32>
    %cst_19 = arith.constant dense<0xFF800000> : vector<20xf32>
    %41 = vector.multi_reduction <maximumf>, %40, %cst_19 [1] : vector<20x20xf32> to vector<20xf32>
    %42 = vector.shape_cast %41 : vector<20xf32> to vector<20x1xf32>
    %43 = vector.broadcast %42 : vector<20x1xf32> to vector<20x20xf32>
    %44 = arith.subf %40, %43 : vector<20x20xf32>
    %45 = math.exp %44 : vector<20x20xf32>
    %cst_20 = arith.constant dense<0.000000e+00> : vector<20xf32>
    %46 = vector.multi_reduction <add>, %45, %cst_20 [1] : vector<20x20xf32> to vector<20xf32>
    %47 = vector.shape_cast %46 : vector<20xf32> to vector<20x1xf32>
    %48 = vector.broadcast %47 : vector<20x1xf32> to vector<20x20xf32>
    %49 = arith.divf %45, %48 : vector<20x20xf32>
    %cst_21 = arith.constant dense<0.000000e+00> : vector<20x16xf32>
    %50 = tpu.matmul %49, %38, %cst_21 {dimension_numbers = #tpu.dot_dimension_numbers<[1], [0], [0], [1], [0, 0, 1, 1], [], []>} : vector<20x20xf32>, vector<20x16xf32>, vector<20x16xf32> -> vector<20x16xf32>
    %51 = vector.extract_strided_slice %20 {offsets = [0, 32], sizes = [20, 16], strides = [1, 1]} : vector<20x192xf32> to vector<20x16xf32>
    %52 = vector.extract_strided_slice %20 {offsets = [0, 96], sizes = [20, 16], strides = [1, 1]} : vector<20x192xf32> to vector<20x16xf32>
    %53 = vector.extract_strided_slice %20 {offsets = [0, 160], sizes = [20, 16], strides = [1, 1]} : vector<20x192xf32> to vector<20x16xf32>
    %cst_22 = arith.constant dense<0.000000e+00> : vector<20x20xf32>
    %54 = tpu.matmul %51, %52, %cst_22 {dimension_numbers = #tpu.dot_dimension_numbers<[1], [1], [0], [0], [0, 0, 1, 0], [], []>} : vector<20x16xf32>, vector<20x16xf32>, vector<20x20xf32> -> vector<20x20xf32>
    %55 = arith.addf %54, %0 : vector<20x20xf32>
    %cst_23 = arith.constant dense<0xFF800000> : vector<20xf32>
    %56 = vector.multi_reduction <maximumf>, %55, %cst_23 [1] : vector<20x20xf32> to vector<20xf32>
    %57 = vector.shape_cast %56 : vector<20xf32> to vector<20x1xf32>
    %58 = vector.broadcast %57 : vector<20x1xf32> to vector<20x20xf32>
    %59 = arith.subf %55, %58 : vector<20x20xf32>
    %60 = math.exp %59 : vector<20x20xf32>
    %cst_24 = arith.constant dense<0.000000e+00> : vector<20xf32>
    %61 = vector.multi_reduction <add>, %60, %cst_24 [1] : vector<20x20xf32> to vector<20xf32>
    %62 = vector.shape_cast %61 : vector<20xf32> to vector<20x1xf32>
    %63 = vector.broadcast %62 : vector<20x1xf32> to vector<20x20xf32>
    %64 = arith.divf %60, %63 : vector<20x20xf32>
    %cst_25 = arith.constant dense<0.000000e+00> : vector<20x16xf32>
    %65 = tpu.matmul %64, %53, %cst_25 {dimension_numbers = #tpu.dot_dimension_numbers<[1], [0], [0], [1], [0, 0, 1, 1], [], []>} : vector<20x20xf32>, vector<20x16xf32>, vector<20x16xf32> -> vector<20x16xf32>
    %66 = vector.extract_strided_slice %20 {offsets = [0, 48], sizes = [20, 16], strides = [1, 1]} : vector<20x192xf32> to vector<20x16xf32>
    %67 = vector.extract_strided_slice %20 {offsets = [0, 112], sizes = [20, 16], strides = [1, 1]} : vector<20x192xf32> to vector<20x16xf32>
    %68 = vector.extract_strided_slice %20 {offsets = [0, 176], sizes = [20, 16], strides = [1, 1]} : vector<20x192xf32> to vector<20x16xf32>
    %cst_26 = arith.constant dense<0.000000e+00> : vector<20x20xf32>
    %69 = tpu.matmul %66, %67, %cst_26 {dimension_numbers = #tpu.dot_dimension_numbers<[1], [1], [0], [0], [0, 0, 1, 0], [], []>} : vector<20x16xf32>, vector<20x16xf32>, vector<20x20xf32> -> vector<20x20xf32>
    %70 = arith.addf %69, %0 : vector<20x20xf32>
    %cst_27 = arith.constant dense<0xFF800000> : vector<20xf32>
    %71 = vector.multi_reduction <maximumf>, %70, %cst_27 [1] : vector<20x20xf32> to vector<20xf32>
    %72 = vector.shape_cast %71 : vector<20xf32> to vector<20x1xf32>
    %73 = vector.broadcast %72 : vector<20x1xf32> to vector<20x20xf32>
    %74 = arith.subf %70, %73 : vector<20x20xf32>
    %75 = math.exp %74 : vector<20x20xf32>
    %cst_28 = arith.constant dense<0.000000e+00> : vector<20xf32>
    %76 = vector.multi_reduction <add>, %75, %cst_28 [1] : vector<20x20xf32> to vector<20xf32>
    %77 = vector.shape_cast %76 : vector<20xf32> to vector<20x1xf32>
    %78 = vector.broadcast %77 : vector<20x1xf32> to vector<20x20xf32>
    %79 = arith.divf %75, %78 : vector<20x20xf32>
    %cst_29 = arith.constant dense<0.000000e+00> : vector<20x16xf32>
    %80 = tpu.matmul %79, %68, %cst_29 {dimension_numbers = #tpu.dot_dimension_numbers<[1], [0], [0], [1], [0, 0, 1, 1], [], []>} : vector<20x20xf32>, vector<20x16xf32>, vector<20x16xf32> -> vector<20x16xf32>
    %81 = tpu.concatenate %35, %50, %65, %80 in 1 : vector<20x16xf32>, vector<20x16xf32>, vector<20x16xf32>, vector<20x16xf32> -> vector<20x64xf32>
    %c0_30 = arith.constant 0 : index
    %c0_31 = arith.constant 0 : index
    %c0_32 = arith.constant 0 : index
    %82 = vector.load %arg5[%c0_30, %c0_31, %c0_32] : memref<2x64x64xf32, #tpu.memory_space<vmem>>, vector<1x64x64xf32>
    %83 = vector.shape_cast %82 : vector<1x64x64xf32> to vector<64x64xf32>
    %cst_33 = arith.constant dense<0.000000e+00> : vector<20x64xf32>
    %84 = tpu.matmul %81, %83, %cst_33 {dimension_numbers = #tpu.dot_dimension_numbers<[1], [0], [0], [1], [0, 0, 1, 1], [], []>} : vector<20x64xf32>, vector<64x64xf32>, vector<20x64xf32> -> vector<20x64xf32>
    %85 = vector.broadcast %9 : vector<1x64xf32> to vector<20x64xf32>
    %86 = arith.addf %84, %85 : vector<20x64xf32>
    %87 = arith.addf %5, %86 : vector<20x64xf32>
    %cst_34 = arith.constant dense<0.000000e+00> : vector<20xf32>
    %88 = vector.multi_reduction <add>, %87, %cst_34 [1] : vector<20x64xf32> to vector<20xf32>
    %89 = vector.shape_cast %88 : vector<20xf32> to vector<20x1xf32>
    %cst_35 = arith.constant 6.400000e+01 : f32
    %90 = vector.broadcast %cst_35 : f32 to vector<20x1xf32>
    %91 = arith.divf %89, %90 : vector<20x1xf32>
    %92 = vector.broadcast %91 : vector<20x1xf32> to vector<20x64xf32>
    %93 = arith.subf %87, %92 : vector<20x64xf32>
    %94 = arith.mulf %93, %93 : vector<20x64xf32>
    %cst_36 = arith.constant dense<0.000000e+00> : vector<20xf32>
    %95 = vector.multi_reduction <add>, %94, %cst_36 [1] : vector<20x64xf32> to vector<20xf32>
    %96 = vector.shape_cast %95 : vector<20xf32> to vector<20x1xf32>
    %cst_37 = arith.constant 6.400000e+01 : f32
    %97 = vector.broadcast %cst_37 : f32 to vector<20x1xf32>
    %98 = arith.divf %96, %97 : vector<20x1xf32>
    %99 = vector.broadcast %91 : vector<20x1xf32> to vector<20x64xf32>
    %100 = arith.subf %87, %99 : vector<20x64xf32>
    %cst_38 = arith.constant 9.99999974E-6 : f32
    %101 = vector.broadcast %cst_38 : f32 to vector<20x1xf32>
    %102 = arith.addf %98, %101 : vector<20x1xf32>
    %103 = math.rsqrt %102 : vector<20x1xf32>
    %104 = vector.broadcast %103 : vector<20x1xf32> to vector<20x64xf32>
    %105 = arith.mulf %100, %104 : vector<20x64xf32>
    %106 = vector.broadcast %12 : vector<1x64xf32> to vector<20x64xf32>
    %107 = arith.mulf %105, %106 : vector<20x64xf32>
    %108 = vector.broadcast %13 : vector<1x64xf32> to vector<20x64xf32>
    %109 = arith.addf %107, %108 : vector<20x64xf32>
    %c0_39 = arith.constant 0 : index
    %c0_40 = arith.constant 0 : index
    %c0_41 = arith.constant 0 : index
    %110 = vector.load %arg6[%c0_39, %c0_40, %c0_41] : memref<2x64x128xf32, #tpu.memory_space<vmem>>, vector<1x64x128xf32>
    %111 = vector.shape_cast %110 : vector<1x64x128xf32> to vector<64x128xf32>
    %cst_42 = arith.constant dense<0.000000e+00> : vector<20x128xf32>
    %112 = tpu.matmul %109, %111, %cst_42 {dimension_numbers = #tpu.dot_dimension_numbers<[1], [0], [0], [1], [0, 0, 1, 1], [], []>} : vector<20x64xf32>, vector<64x128xf32>, vector<20x128xf32> -> vector<20x128xf32>
    %113 = vector.broadcast %10 : vector<1x128xf32> to vector<20x128xf32>
    %114 = arith.addf %112, %113 : vector<20x128xf32>
    %cst_43 = arith.constant 0.000000e+00 : f32
    %115 = vector.broadcast %cst_43 : f32 to vector<20x128xf32>
    %116 = arith.maximumf %114, %115 : vector<20x128xf32>
    %c0_44 = arith.constant 0 : index
    %c0_45 = arith.constant 0 : index
    %c0_46 = arith.constant 0 : index
    %117 = vector.load %arg7[%c0_44, %c0_45, %c0_46] : memref<2x128x64xf32, #tpu.memory_space<vmem>>, vector<1x128x64xf32>
    %118 = vector.shape_cast %117 : vector<1x128x64xf32> to vector<128x64xf32>
    %cst_47 = arith.constant dense<0.000000e+00> : vector<20x64xf32>
    %119 = tpu.matmul %116, %118, %cst_47 {dimension_numbers = #tpu.dot_dimension_numbers<[1], [0], [0], [1], [0, 0, 1, 1], [], []>} : vector<20x128xf32>, vector<128x64xf32>, vector<20x64xf32> -> vector<20x64xf32>
    %120 = vector.broadcast %11 : vector<1x64xf32> to vector<20x64xf32>
    %121 = arith.addf %119, %120 : vector<20x64xf32>
    %122 = arith.addf %109, %121 : vector<20x64xf32>
    %cst_48 = arith.constant dense<0.000000e+00> : vector<20xf32>
    %123 = vector.multi_reduction <add>, %122, %cst_48 [1] : vector<20x64xf32> to vector<20xf32>
    %124 = vector.shape_cast %123 : vector<20xf32> to vector<20x1xf32>
    %cst_49 = arith.constant 6.400000e+01 : f32
    %125 = vector.broadcast %cst_49 : f32 to vector<20x1xf32>
    %126 = arith.divf %124, %125 : vector<20x1xf32>
    %127 = vector.broadcast %126 : vector<20x1xf32> to vector<20x64xf32>
    %128 = arith.subf %122, %127 : vector<20x64xf32>
    %129 = arith.mulf %128, %128 : vector<20x64xf32>
    %cst_50 = arith.constant dense<0.000000e+00> : vector<20xf32>
    %130 = vector.multi_reduction <add>, %129, %cst_50 [1] : vector<20x64xf32> to vector<20xf32>
    %131 = vector.shape_cast %130 : vector<20xf32> to vector<20x1xf32>
    %cst_51 = arith.constant 6.400000e+01 : f32
    %132 = vector.broadcast %cst_51 : f32 to vector<20x1xf32>
    %133 = arith.divf %131, %132 : vector<20x1xf32>
    %134 = vector.broadcast %126 : vector<20x1xf32> to vector<20x64xf32>
    %135 = arith.subf %122, %134 : vector<20x64xf32>
    %cst_52 = arith.constant 9.99999974E-6 : f32
    %136 = vector.broadcast %cst_52 : f32 to vector<20x1xf32>
    %137 = arith.addf %133, %136 : vector<20x1xf32>
    %138 = math.rsqrt %137 : vector<20x1xf32>
    %139 = vector.broadcast %138 : vector<20x1xf32> to vector<20x64xf32>
    %140 = arith.mulf %135, %139 : vector<20x64xf32>
    %141 = vector.broadcast %14 : vector<1x64xf32> to vector<20x64xf32>
    %142 = arith.mulf %140, %141 : vector<20x64xf32>
    %143 = vector.broadcast %15 : vector<1x64xf32> to vector<20x64xf32>
    %144 = arith.addf %142, %143 : vector<20x64xf32>
    %c1 = arith.constant 1 : index
    %c0_53 = arith.constant 0 : index
    %c0_54 = arith.constant 0 : index
    %145 = vector.load %arg8[%c1, %c0_53, %c0_54] : memref<2x8x192xf32, #tpu.memory_space<vmem>>, vector<1x8x192xf32>
    %146 = vector.shape_cast %145 : vector<1x8x192xf32> to vector<8x192xf32>
    %147 = vector.extract_strided_slice %146 {offsets = [0, 0], sizes = [1, 192], strides = [1, 1]} : vector<8x192xf32> to vector<1x192xf32>
    %148 = vector.extract_strided_slice %146 {offsets = [1, 0], sizes = [1, 64], strides = [1, 1]} : vector<8x192xf32> to vector<1x64xf32>
    %149 = vector.extract_strided_slice %146 {offsets = [2, 0], sizes = [1, 128], strides = [1, 1]} : vector<8x192xf32> to vector<1x128xf32>
    %150 = vector.extract_strided_slice %146 {offsets = [3, 0], sizes = [1, 64], strides = [1, 1]} : vector<8x192xf32> to vector<1x64xf32>
    %151 = vector.extract_strided_slice %146 {offsets = [4, 0], sizes = [1, 64], strides = [1, 1]} : vector<8x192xf32> to vector<1x64xf32>
    %152 = vector.extract_strided_slice %146 {offsets = [5, 0], sizes = [1, 64], strides = [1, 1]} : vector<8x192xf32> to vector<1x64xf32>
    %153 = vector.extract_strided_slice %146 {offsets = [6, 0], sizes = [1, 64], strides = [1, 1]} : vector<8x192xf32> to vector<1x64xf32>
    %154 = vector.extract_strided_slice %146 {offsets = [7, 0], sizes = [1, 64], strides = [1, 1]} : vector<8x192xf32> to vector<1x64xf32>
    %c1_55 = arith.constant 1 : index
    %c0_56 = arith.constant 0 : index
    %c0_57 = arith.constant 0 : index
    %155 = vector.load %arg4[%c1_55, %c0_56, %c0_57] : memref<2x64x192xf32, #tpu.memory_space<vmem>>, vector<1x64x192xf32>
    %156 = vector.shape_cast %155 : vector<1x64x192xf32> to vector<64x192xf32>
    %cst_58 = arith.constant dense<0.000000e+00> : vector<20x192xf32>
    %157 = tpu.matmul %144, %156, %cst_58 {dimension_numbers = #tpu.dot_dimension_numbers<[1], [0], [0], [1], [0, 0, 1, 1], [], []>} : vector<20x64xf32>, vector<64x192xf32>, vector<20x192xf32> -> vector<20x192xf32>
    %158 = vector.broadcast %147 : vector<1x192xf32> to vector<20x192xf32>
    %159 = arith.addf %157, %158 : vector<20x192xf32>
    %160 = vector.extract_strided_slice %159 {offsets = [0, 0], sizes = [20, 16], strides = [1, 1]} : vector<20x192xf32> to vector<20x16xf32>
    %161 = vector.extract_strided_slice %159 {offsets = [0, 64], sizes = [20, 16], strides = [1, 1]} : vector<20x192xf32> to vector<20x16xf32>
    %162 = vector.extract_strided_slice %159 {offsets = [0, 128], sizes = [20, 16], strides = [1, 1]} : vector<20x192xf32> to vector<20x16xf32>
    %cst_59 = arith.constant dense<0.000000e+00> : vector<20x20xf32>
    %163 = tpu.matmul %160, %161, %cst_59 {dimension_numbers = #tpu.dot_dimension_numbers<[1], [1], [0], [0], [0, 0, 1, 0], [], []>} : vector<20x16xf32>, vector<20x16xf32>, vector<20x20xf32> -> vector<20x20xf32>
    %164 = arith.addf %163, %0 : vector<20x20xf32>
    %cst_60 = arith.constant dense<0xFF800000> : vector<20xf32>
    %165 = vector.multi_reduction <maximumf>, %164, %cst_60 [1] : vector<20x20xf32> to vector<20xf32>
    %166 = vector.shape_cast %165 : vector<20xf32> to vector<20x1xf32>
    %167 = vector.broadcast %166 : vector<20x1xf32> to vector<20x20xf32>
    %168 = arith.subf %164, %167 : vector<20x20xf32>
    %169 = math.exp %168 : vector<20x20xf32>
    %cst_61 = arith.constant dense<0.000000e+00> : vector<20xf32>
    %170 = vector.multi_reduction <add>, %169, %cst_61 [1] : vector<20x20xf32> to vector<20xf32>
    %171 = vector.shape_cast %170 : vector<20xf32> to vector<20x1xf32>
    %172 = vector.broadcast %171 : vector<20x1xf32> to vector<20x20xf32>
    %173 = arith.divf %169, %172 : vector<20x20xf32>
    %cst_62 = arith.constant dense<0.000000e+00> : vector<20x16xf32>
    %174 = tpu.matmul %173, %162, %cst_62 {dimension_numbers = #tpu.dot_dimension_numbers<[1], [0], [0], [1], [0, 0, 1, 1], [], []>} : vector<20x20xf32>, vector<20x16xf32>, vector<20x16xf32> -> vector<20x16xf32>
    %175 = vector.extract_strided_slice %159 {offsets = [0, 16], sizes = [20, 16], strides = [1, 1]} : vector<20x192xf32> to vector<20x16xf32>
    %176 = vector.extract_strided_slice %159 {offsets = [0, 80], sizes = [20, 16], strides = [1, 1]} : vector<20x192xf32> to vector<20x16xf32>
    %177 = vector.extract_strided_slice %159 {offsets = [0, 144], sizes = [20, 16], strides = [1, 1]} : vector<20x192xf32> to vector<20x16xf32>
    %cst_63 = arith.constant dense<0.000000e+00> : vector<20x20xf32>
    %178 = tpu.matmul %175, %176, %cst_63 {dimension_numbers = #tpu.dot_dimension_numbers<[1], [1], [0], [0], [0, 0, 1, 0], [], []>} : vector<20x16xf32>, vector<20x16xf32>, vector<20x20xf32> -> vector<20x20xf32>
    %179 = arith.addf %178, %0 : vector<20x20xf32>
    %cst_64 = arith.constant dense<0xFF800000> : vector<20xf32>
    %180 = vector.multi_reduction <maximumf>, %179, %cst_64 [1] : vector<20x20xf32> to vector<20xf32>
    %181 = vector.shape_cast %180 : vector<20xf32> to vector<20x1xf32>
    %182 = vector.broadcast %181 : vector<20x1xf32> to vector<20x20xf32>
    %183 = arith.subf %179, %182 : vector<20x20xf32>
    %184 = math.exp %183 : vector<20x20xf32>
    %cst_65 = arith.constant dense<0.000000e+00> : vector<20xf32>
    %185 = vector.multi_reduction <add>, %184, %cst_65 [1] : vector<20x20xf32> to vector<20xf32>
    %186 = vector.shape_cast %185 : vector<20xf32> to vector<20x1xf32>
    %187 = vector.broadcast %186 : vector<20x1xf32> to vector<20x20xf32>
    %188 = arith.divf %184, %187 : vector<20x20xf32>
    %cst_66 = arith.constant dense<0.000000e+00> : vector<20x16xf32>
    %189 = tpu.matmul %188, %177, %cst_66 {dimension_numbers = #tpu.dot_dimension_numbers<[1], [0], [0], [1], [0, 0, 1, 1], [], []>} : vector<20x20xf32>, vector<20x16xf32>, vector<20x16xf32> -> vector<20x16xf32>
    %190 = vector.extract_strided_slice %159 {offsets = [0, 32], sizes = [20, 16], strides = [1, 1]} : vector<20x192xf32> to vector<20x16xf32>
    %191 = vector.extract_strided_slice %159 {offsets = [0, 96], sizes = [20, 16], strides = [1, 1]} : vector<20x192xf32> to vector<20x16xf32>
    %192 = vector.extract_strided_slice %159 {offsets = [0, 160], sizes = [20, 16], strides = [1, 1]} : vector<20x192xf32> to vector<20x16xf32>
    %cst_67 = arith.constant dense<0.000000e+00> : vector<20x20xf32>
    %193 = tpu.matmul %190, %191, %cst_67 {dimension_numbers = #tpu.dot_dimension_numbers<[1], [1], [0], [0], [0, 0, 1, 0], [], []>} : vector<20x16xf32>, vector<20x16xf32>, vector<20x20xf32> -> vector<20x20xf32>
    %194 = arith.addf %193, %0 : vector<20x20xf32>
    %cst_68 = arith.constant dense<0xFF800000> : vector<20xf32>
    %195 = vector.multi_reduction <maximumf>, %194, %cst_68 [1] : vector<20x20xf32> to vector<20xf32>
    %196 = vector.shape_cast %195 : vector<20xf32> to vector<20x1xf32>
    %197 = vector.broadcast %196 : vector<20x1xf32> to vector<20x20xf32>
    %198 = arith.subf %194, %197 : vector<20x20xf32>
    %199 = math.exp %198 : vector<20x20xf32>
    %cst_69 = arith.constant dense<0.000000e+00> : vector<20xf32>
    %200 = vector.multi_reduction <add>, %199, %cst_69 [1] : vector<20x20xf32> to vector<20xf32>
    %201 = vector.shape_cast %200 : vector<20xf32> to vector<20x1xf32>
    %202 = vector.broadcast %201 : vector<20x1xf32> to vector<20x20xf32>
    %203 = arith.divf %199, %202 : vector<20x20xf32>
    %cst_70 = arith.constant dense<0.000000e+00> : vector<20x16xf32>
    %204 = tpu.matmul %203, %192, %cst_70 {dimension_numbers = #tpu.dot_dimension_numbers<[1], [0], [0], [1], [0, 0, 1, 1], [], []>} : vector<20x20xf32>, vector<20x16xf32>, vector<20x16xf32> -> vector<20x16xf32>
    %205 = vector.extract_strided_slice %159 {offsets = [0, 48], sizes = [20, 16], strides = [1, 1]} : vector<20x192xf32> to vector<20x16xf32>
    %206 = vector.extract_strided_slice %159 {offsets = [0, 112], sizes = [20, 16], strides = [1, 1]} : vector<20x192xf32> to vector<20x16xf32>
    %207 = vector.extract_strided_slice %159 {offsets = [0, 176], sizes = [20, 16], strides = [1, 1]} : vector<20x192xf32> to vector<20x16xf32>
    %cst_71 = arith.constant dense<0.000000e+00> : vector<20x20xf32>
    %208 = tpu.matmul %205, %206, %cst_71 {dimension_numbers = #tpu.dot_dimension_numbers<[1], [1], [0], [0], [0, 0, 1, 0], [], []>} : vector<20x16xf32>, vector<20x16xf32>, vector<20x20xf32> -> vector<20x20xf32>
    %209 = arith.addf %208, %0 : vector<20x20xf32>
    %cst_72 = arith.constant dense<0xFF800000> : vector<20xf32>
    %210 = vector.multi_reduction <maximumf>, %209, %cst_72 [1] : vector<20x20xf32> to vector<20xf32>
    %211 = vector.shape_cast %210 : vector<20xf32> to vector<20x1xf32>
    %212 = vector.broadcast %211 : vector<20x1xf32> to vector<20x20xf32>
    %213 = arith.subf %209, %212 : vector<20x20xf32>
    %214 = math.exp %213 : vector<20x20xf32>
    %cst_73 = arith.constant dense<0.000000e+00> : vector<20xf32>
    %215 = vector.multi_reduction <add>, %214, %cst_73 [1] : vector<20x20xf32> to vector<20xf32>
    %216 = vector.shape_cast %215 : vector<20xf32> to vector<20x1xf32>
    %217 = vector.broadcast %216 : vector<20x1xf32> to vector<20x20xf32>
    %218 = arith.divf %214, %217 : vector<20x20xf32>
    %cst_74 = arith.constant dense<0.000000e+00> : vector<20x16xf32>
    %219 = tpu.matmul %218, %207, %cst_74 {dimension_numbers = #tpu.dot_dimension_numbers<[1], [0], [0], [1], [0, 0, 1, 1], [], []>} : vector<20x20xf32>, vector<20x16xf32>, vector<20x16xf32> -> vector<20x16xf32>
    %220 = tpu.concatenate %174, %189, %204, %219 in 1 : vector<20x16xf32>, vector<20x16xf32>, vector<20x16xf32>, vector<20x16xf32> -> vector<20x64xf32>
    %c1_75 = arith.constant 1 : index
    %c0_76 = arith.constant 0 : index
    %c0_77 = arith.constant 0 : index
    %221 = vector.load %arg5[%c1_75, %c0_76, %c0_77] : memref<2x64x64xf32, #tpu.memory_space<vmem>>, vector<1x64x64xf32>
    %222 = vector.shape_cast %221 : vector<1x64x64xf32> to vector<64x64xf32>
    %cst_78 = arith.constant dense<0.000000e+00> : vector<20x64xf32>
    %223 = tpu.matmul %220, %222, %cst_78 {dimension_numbers = #tpu.dot_dimension_numbers<[1], [0], [0], [1], [0, 0, 1, 1], [], []>} : vector<20x64xf32>, vector<64x64xf32>, vector<20x64xf32> -> vector<20x64xf32>
    %224 = vector.broadcast %148 : vector<1x64xf32> to vector<20x64xf32>
    %225 = arith.addf %223, %224 : vector<20x64xf32>
    %226 = arith.addf %144, %225 : vector<20x64xf32>
    %cst_79 = arith.constant dense<0.000000e+00> : vector<20xf32>
    %227 = vector.multi_reduction <add>, %226, %cst_79 [1] : vector<20x64xf32> to vector<20xf32>
    %228 = vector.shape_cast %227 : vector<20xf32> to vector<20x1xf32>
    %cst_80 = arith.constant 6.400000e+01 : f32
    %229 = vector.broadcast %cst_80 : f32 to vector<20x1xf32>
    %230 = arith.divf %228, %229 : vector<20x1xf32>
    %231 = vector.broadcast %230 : vector<20x1xf32> to vector<20x64xf32>
    %232 = arith.subf %226, %231 : vector<20x64xf32>
    %233 = arith.mulf %232, %232 : vector<20x64xf32>
    %cst_81 = arith.constant dense<0.000000e+00> : vector<20xf32>
    %234 = vector.multi_reduction <add>, %233, %cst_81 [1] : vector<20x64xf32> to vector<20xf32>
    %235 = vector.shape_cast %234 : vector<20xf32> to vector<20x1xf32>
    %cst_82 = arith.constant 6.400000e+01 : f32
    %236 = vector.broadcast %cst_82 : f32 to vector<20x1xf32>
    %237 = arith.divf %235, %236 : vector<20x1xf32>
    %238 = vector.broadcast %230 : vector<20x1xf32> to vector<20x64xf32>
    %239 = arith.subf %226, %238 : vector<20x64xf32>
    %cst_83 = arith.constant 9.99999974E-6 : f32
    %240 = vector.broadcast %cst_83 : f32 to vector<20x1xf32>
    %241 = arith.addf %237, %240 : vector<20x1xf32>
    %242 = math.rsqrt %241 : vector<20x1xf32>
    %243 = vector.broadcast %242 : vector<20x1xf32> to vector<20x64xf32>
    %244 = arith.mulf %239, %243 : vector<20x64xf32>
    %245 = vector.broadcast %151 : vector<1x64xf32> to vector<20x64xf32>
    %246 = arith.mulf %244, %245 : vector<20x64xf32>
    %247 = vector.broadcast %152 : vector<1x64xf32> to vector<20x64xf32>
    %248 = arith.addf %246, %247 : vector<20x64xf32>
    %c1_84 = arith.constant 1 : index
    %c0_85 = arith.constant 0 : index
    %c0_86 = arith.constant 0 : index
    %249 = vector.load %arg6[%c1_84, %c0_85, %c0_86] : memref<2x64x128xf32, #tpu.memory_space<vmem>>, vector<1x64x128xf32>
    %250 = vector.shape_cast %249 : vector<1x64x128xf32> to vector<64x128xf32>
    %cst_87 = arith.constant dense<0.000000e+00> : vector<20x128xf32>
    %251 = tpu.matmul %248, %250, %cst_87 {dimension_numbers = #tpu.dot_dimension_numbers<[1], [0], [0], [1], [0, 0, 1, 1], [], []>} : vector<20x64xf32>, vector<64x128xf32>, vector<20x128xf32> -> vector<20x128xf32>
    %252 = vector.broadcast %149 : vector<1x128xf32> to vector<20x128xf32>
    %253 = arith.addf %251, %252 : vector<20x128xf32>
    %cst_88 = arith.constant 0.000000e+00 : f32
    %254 = vector.broadcast %cst_88 : f32 to vector<20x128xf32>
    %255 = arith.maximumf %253, %254 : vector<20x128xf32>
    %c1_89 = arith.constant 1 : index
    %c0_90 = arith.constant 0 : index
    %c0_91 = arith.constant 0 : index
    %256 = vector.load %arg7[%c1_89, %c0_90, %c0_91] : memref<2x128x64xf32, #tpu.memory_space<vmem>>, vector<1x128x64xf32>
    %257 = vector.shape_cast %256 : vector<1x128x64xf32> to vector<128x64xf32>
    %cst_92 = arith.constant dense<0.000000e+00> : vector<20x64xf32>
    %258 = tpu.matmul %255, %257, %cst_92 {dimension_numbers = #tpu.dot_dimension_numbers<[1], [0], [0], [1], [0, 0, 1, 1], [], []>} : vector<20x128xf32>, vector<128x64xf32>, vector<20x64xf32> -> vector<20x64xf32>
    %259 = vector.broadcast %150 : vector<1x64xf32> to vector<20x64xf32>
    %260 = arith.addf %258, %259 : vector<20x64xf32>
    %261 = arith.addf %248, %260 : vector<20x64xf32>
    %cst_93 = arith.constant dense<0.000000e+00> : vector<20xf32>
    %262 = vector.multi_reduction <add>, %261, %cst_93 [1] : vector<20x64xf32> to vector<20xf32>
    %263 = vector.shape_cast %262 : vector<20xf32> to vector<20x1xf32>
    %cst_94 = arith.constant 6.400000e+01 : f32
    %264 = vector.broadcast %cst_94 : f32 to vector<20x1xf32>
    %265 = arith.divf %263, %264 : vector<20x1xf32>
    %266 = vector.broadcast %265 : vector<20x1xf32> to vector<20x64xf32>
    %267 = arith.subf %261, %266 : vector<20x64xf32>
    %268 = arith.mulf %267, %267 : vector<20x64xf32>
    %cst_95 = arith.constant dense<0.000000e+00> : vector<20xf32>
    %269 = vector.multi_reduction <add>, %268, %cst_95 [1] : vector<20x64xf32> to vector<20xf32>
    %270 = vector.shape_cast %269 : vector<20xf32> to vector<20x1xf32>
    %cst_96 = arith.constant 6.400000e+01 : f32
    %271 = vector.broadcast %cst_96 : f32 to vector<20x1xf32>
    %272 = arith.divf %270, %271 : vector<20x1xf32>
    %273 = vector.broadcast %265 : vector<20x1xf32> to vector<20x64xf32>
    %274 = arith.subf %261, %273 : vector<20x64xf32>
    %cst_97 = arith.constant 9.99999974E-6 : f32
    %275 = vector.broadcast %cst_97 : f32 to vector<20x1xf32>
    %276 = arith.addf %272, %275 : vector<20x1xf32>
    %277 = math.rsqrt %276 : vector<20x1xf32>
    %278 = vector.broadcast %277 : vector<20x1xf32> to vector<20x64xf32>
    %279 = arith.mulf %274, %278 : vector<20x64xf32>
    %280 = vector.broadcast %153 : vector<1x64xf32> to vector<20x64xf32>
    %281 = arith.mulf %279, %280 : vector<20x64xf32>
    %282 = vector.broadcast %154 : vector<1x64xf32> to vector<20x64xf32>
    %283 = arith.addf %281, %282 : vector<20x64xf32>
    %284 = vector.extract_strided_slice %283 {offsets = [0, 0], sizes = [2, 64], strides = [1, 1]} : vector<20x64xf32> to vector<2x64xf32>
    %285 = vector.extract_strided_slice %283 {offsets = [2, 0], sizes = [2, 64], strides = [1, 1]} : vector<20x64xf32> to vector<2x64xf32>
    %286 = vector.extract_strided_slice %283 {offsets = [4, 0], sizes = [2, 64], strides = [1, 1]} : vector<20x64xf32> to vector<2x64xf32>
    %287 = vector.extract_strided_slice %283 {offsets = [6, 0], sizes = [2, 64], strides = [1, 1]} : vector<20x64xf32> to vector<2x64xf32>
    %288 = vector.extract_strided_slice %283 {offsets = [8, 0], sizes = [2, 64], strides = [1, 1]} : vector<20x64xf32> to vector<2x64xf32>
    %289 = vector.extract_strided_slice %283 {offsets = [10, 0], sizes = [2, 64], strides = [1, 1]} : vector<20x64xf32> to vector<2x64xf32>
    %290 = vector.extract_strided_slice %283 {offsets = [12, 0], sizes = [2, 64], strides = [1, 1]} : vector<20x64xf32> to vector<2x64xf32>
    %291 = vector.extract_strided_slice %283 {offsets = [14, 0], sizes = [2, 64], strides = [1, 1]} : vector<20x64xf32> to vector<2x64xf32>
    %292 = vector.extract_strided_slice %283 {offsets = [16, 0], sizes = [2, 64], strides = [1, 1]} : vector<20x64xf32> to vector<2x64xf32>
    %293 = vector.extract_strided_slice %283 {offsets = [18, 0], sizes = [2, 64], strides = [1, 1]} : vector<20x64xf32> to vector<2x64xf32>
    %294 = tpu.concatenate %284, %285, %286, %287, %288, %289, %290, %291, %292, %293 in 1 : vector<2x64xf32>, vector<2x64xf32>, vector<2x64xf32>, vector<2x64xf32>, vector<2x64xf32>, vector<2x64xf32>, vector<2x64xf32>, vector<2x64xf32>, vector<2x64xf32>, vector<2x64xf32> -> vector<2x640xf32>
    %c0_98 = arith.constant 0 : index
    %c0_99 = arith.constant 0 : index
    %295 = vector.load %arg10[%c0_98, %c0_99] : memref<640x128xf32, #tpu.memory_space<vmem>>, vector<640x128xf32>
    %cst_100 = arith.constant dense<0.000000e+00> : vector<2x128xf32>
    %296 = tpu.matmul %294, %295, %cst_100 {dimension_numbers = #tpu.dot_dimension_numbers<[1], [0], [0], [1], [0, 0, 1, 1], [], []>} : vector<2x640xf32>, vector<640x128xf32>, vector<2x128xf32> -> vector<2x128xf32>
    %c0_101 = arith.constant 0 : index
    %c0_102 = arith.constant 0 : index
    %297 = vector.load %arg11[%c0_101, %c0_102] : memref<1x128xf32, #tpu.memory_space<vmem>>, vector<1x128xf32>
    %298 = vector.broadcast %297 : vector<1x128xf32> to vector<2x128xf32>
    %299 = arith.addf %296, %298 : vector<2x128xf32>
    %c0_103 = arith.constant 0 : index
    %c0_104 = arith.constant 0 : index
    %300 = vector.load %arg12[%c0_103, %c0_104] : memref<2x128xf32, #tpu.memory_space<vmem>>, vector<2x128xf32>
    tpu.vector_store %arg12[%c0_103, %c0_104], %299 {strides = array<i32>} : memref<2x128xf32, #tpu.memory_space<vmem>>, vector<2x128xf32>,
    return
  }
  func.func @transform_0(%arg0: i32) -> (i32, i32) {
    %c0_i32 = arith.constant 0 : i32
    %c0_i32_0 = arith.constant 0 : i32
    %c0_i32_1 = arith.constant 0 : i32
    return %c0_i32, %c0_i32_0 : i32, i32
  }
  func.func @transform_1(%arg0: i32) -> (i32, i32) {
    %c0_i32 = arith.constant 0 : i32
    %c0_i32_0 = arith.constant 0 : i32
    %c0_i32_1 = arith.constant 0 : i32
    return %c0_i32, %c0_i32_0 : i32, i32
  }
  func.func @transform_2(%arg0: i32) -> (i32, i32) {
    %c0_i32 = arith.constant 0 : i32
    %c0_i32_0 = arith.constant 0 : i32
    %c0_i32_1 = arith.constant 0 : i32
    return %c0_i32, %c0_i32_0 : i32, i32
  }
  func.func @transform_3(%arg0: i32) -> (i32, i32, i32) {
    %c0_i32 = arith.constant 0 : i32
    %c0_i32_0 = arith.constant 0 : i32
    %c0_i32_1 = arith.constant 0 : i32
    %c0_i32_2 = arith.constant 0 : i32
    return %c0_i32, %c0_i32_0, %c0_i32_1 : i32, i32, i32
  }
  func.func @transform_4(%arg0: i32) -> (i32, i32, i32) {
    %c0_i32 = arith.constant 0 : i32
    %c0_i32_0 = arith.constant 0 : i32
    %c0_i32_1 = arith.constant 0 : i32
    %c0_i32_2 = arith.constant 0 : i32
    return %c0_i32, %c0_i32_0, %c0_i32_1 : i32, i32, i32
  }
  func.func @transform_5(%arg0: i32) -> (i32, i32, i32) {
    %c0_i32 = arith.constant 0 : i32
    %c0_i32_0 = arith.constant 0 : i32
    %c0_i32_1 = arith.constant 0 : i32
    %c0_i32_2 = arith.constant 0 : i32
    return %c0_i32, %c0_i32_0, %c0_i32_1 : i32, i32, i32
  }
  func.func @transform_6(%arg0: i32) -> (i32, i32, i32) {
    %c0_i32 = arith.constant 0 : i32
    %c0_i32_0 = arith.constant 0 : i32
    %c0_i32_1 = arith.constant 0 : i32
    %c0_i32_2 = arith.constant 0 : i32
    return %c0_i32, %c0_i32_0, %c0_i32_1 : i32, i32, i32
  }
  func.func @transform_7(%arg0: i32) -> (i32, i32, i32) {
    %c0_i32 = arith.constant 0 : i32
    %c0_i32_0 = arith.constant 0 : i32
    %c0_i32_1 = arith.constant 0 : i32
    %c0_i32_2 = arith.constant 0 : i32
    return %c0_i32, %c0_i32_0, %c0_i32_1 : i32, i32, i32
  }
  func.func @transform_8(%arg0: i32) -> (i32, i32) {
    %c0_i32 = arith.constant 0 : i32
    %c0_i32_0 = arith.constant 0 : i32
    %c0_i32_1 = arith.constant 0 : i32
    return %c0_i32, %c0_i32_0 : i32, i32
  }
  func.func @transform_9(%arg0: i32) -> (i32, i32) {
    %c0_i32 = arith.constant 0 : i32
    %c0_i32_0 = arith.constant 0 : i32
    %c0_i32_1 = arith.constant 0 : i32
    return %c0_i32, %c0_i32_0 : i32, i32
  }
  func.func @transform_10(%arg0: i32) -> (i32, i32) {
    %c0_i32 = arith.constant 0 : i32
    %c0_i32_0 = arith.constant 0 : i32
    %c0_i32_1 = arith.constant 0 : i32
    return %c0_i32, %c0_i32_0 : i32, i32
  }
  func.func @transform_11(%arg0: i32) -> (i32, i32) {
    %c0_i32 = arith.constant 0 : i32
    %c0_i32_0 = arith.constant 0 : i32
    %c0_i32_1 = arith.constant 0 : i32
    return %c0_i32, %c0_i32_0 : i32, i32
  }
}

</mosaic_0001>

<bundles_post_ra>
// kernel: transformer_forward.1
= control target key start
LH: loop header
LB: loop body
LE: loop exit
PB: predicated region body
PF: predicated region fallthrough
CT: control target
= control target key end

     0   :  { %vm49_vm0 = vcmask 64512   ;;  %v4930_v2 = vmov 0.0   ;;  %vm4931_vm1 = vmmov 0   ;;  %s6464_s0 = inlined_call_operand.vmem [shape: f32[20,8], index: 0, kind: input, shape index: {}]   ;;  %s6465_s1 = inlined_call_operand.vmem [shape: f32[20,64], index: 1, kind: input, shape index: {}]   ;;  %s6466_s2 = inlined_call_operand.vmem [shape: f32[8,64], index: 2, kind: input, shape index: {}]   ;;  %s6467_s3 = inlined_call_operand.vmem [shape: f32[2,64,192], index: 3, kind: input, shape index: {}]   ;;  %s6468_s4 = inlined_call_operand.vmem [shape: f32[2,64,64], index: 4, kind: input, shape index: {}]   ;;  %s6469_s5 = inlined_call_operand.vmem [shape: f32[2,64,128], index: 5, kind: input, shape index: {}]   ;;  %s6470_s6 = inlined_call_operand.vmem [shape: f32[2,128,64], index: 6, kind: input, shape index: {}]   ;;  %s6471_s7 = inlined_call_operand.vmem [shape: f32[2,8,192], index: 7, kind: input, shape index: {}]   ;;  %s6472_s8 = inlined_call_operand.vmem [shape: f32[20,20], index: 8, kind: input, shape index: {}]   ;;  %s6473_s9 = inlined_call_operand.vmem [shape: f32[640,128], index: 9, kind: input, shape index: {}]   ;;  %s6474_s10 = inlined_call_operand.vmem [shape: f32[1,128], index: 10, kind: input, shape index: {}]   ;;  %s6475_s11 = inlined_call_operand.hbm [shape: f32[2,128], index: 11, kind: output, shape index: {}]  }
   0x1   :  { %v45_v0 = vld [vmem:[%s6466_s2] sm:$0xff]  ;;  %3950 = vmatprep.subr.mxu0 %v4930_v2  ;;  %3952 = vmatprep.mubr.msk.f32.mxu0 %vm4931_vm1, %v4930_v2  ;;  %v142_v3 = vld [vmem:[%s6467_s3 + $0x8] sm:$0xff]  ;;  %v144_v4 = vld [vmem:[%s6467_s3 + $0x18] sm:$0xff] }
   0x2   :  { %v42_v1 = vld [vmem:[%s6464_s0] sm:$0xff]  ;;  %3951 = vmatpush3.msra.mxu0 %v45_v0  ;;  %v4418_v5 = vpack.c.bf16 %v144_v4, %v142_v3  ;;  %v143_v7 = vld [vmem:[%s6467_s3 + $0x10] sm:$0xff]  ;;  %v146_v8 = vld [vmem:[%s6467_s3 + $0x28] sm:$0xff]  ;;  %239 = vmatprep.mubr.f32.mxu1 %v4930_v2 }
   0x3   :  { %v141_v6 = vld [vmem:[%s6467_s3] sm:$0xff]  ;;  %3953 = vmatmul.mubr.msk.f32.vlgmr.msra.gmra.mrb[0].mxu0 %vm49_vm0, %v42_v1  ;;  %v148_v10 = vld [vmem:[%s6467_s3 + $0x38] sm:$0xff]  ;;  %v147_v12 = vld [vmem:[%s6467_s3 + $0x30] sm:$0xff] }
   0x4   :  { %v4420_v9 = vpack.c.bf16 %v143_v7, %v141_v6  ;;  %v145_v11 = vld [vmem:[%s6467_s3 + $0x20] sm:$0xff]  ;;  %3955 = vmatprep.mubr.msk.f32.mxu0 %vm4931_vm1, %v4930_v2  ;;  %v43_v13 = vld [vmem:[%s6464_s0 + $0x8] sm:$0xff]  ;;  %4419 = vmatprep.subr.bf16.mxu1 %v4418_v5  ;;  %v4422_v14 = vpack.c.bf16 %v148_v10, %v146_v8  ;;  %v152_v16 = vld [vmem:[%s6467_s3 + $0x58] sm:$0xff] }
   0x5   :  { %v150_v15 = vld [vmem:[%s6467_s3 + $0x48] sm:$0xff]  ;;  %v4424_v17 = vpack.c.bf16 %v147_v12, %v145_v11  ;;  %v149_v19 = vld [vmem:[%s6467_s3 + $0x40] sm:$0xff]  ;;  %v151_v20 = vld [vmem:[%s6467_s3 + $0x50] sm:$0xff] }
   0x6   :  { %4421 = vmatpush1.bf16.msra.mxu1 %v4420_v9  ;;  %v4426_v18 = vpack.c.bf16 %v152_v16, %v150_v15 }
   0x7   :  { %4423 = vmatprep.subr.bf16.mxu1 %v4422_v14 }
   0x8   :  { %16 = vsyncpa [#allocation3], 0  ;;  %3956 = vmatmul.mubr.msk.f32.gmra.mrb[2].mxu0 %vm49_vm0, %v43_v13  ;;  %v154_v21 = vld [vmem:[%s6467_s3 + $0x68] sm:$0xff]  ;;  %v156_v22 = vld [vmem:[%s6467_s3 + $0x78] sm:$0xff]  ;;  %v4428_v24 = vpack.c.bf16 %v151_v20, %v149_v19  ;;  %vm165_vm2 = vcmask 523264   ;;  %v157_v41 = vlaneseq  ;;  %v4932_v46 = vmov 0.0|0.0  }
   0x9   :  { %3958 = vmatprep.mubr.msk.f32.mxu0 %vm4931_vm1, %v4930_v2  ;;  %v44_v23 = vld [vmem:[%s6464_s0 + $0x10] sm:$0xf]  ;;  %v4430_v25 = vpack.c.bf16 %v156_v22, %v154_v21  ;;  %v153_v26 = vld [vmem:[%s6467_s3 + $0x60] sm:$0xff]  ;;  %v47_v33 = vld [vmem:[%s6465_s1 + $0x8] sm:$0xff]  ;;  %4434 = vmatprep.subr.bf16.mxu0 %v4932_v46  ;;  %s4933_s2 = smov 48   ;;  %s4934_s25 = smov 64  }
   0xa   :  { %4425 = vmatpush1.bf16.msra.mxu1 %v4424_v17  ;;  %v155_v27 = vld [vmem:[%s6467_s3 + $0x70] sm:$0xff]  ;;  %v46_v29 = vld [vmem:[%s6465_s1] sm:$0xff]  ;;  %v5099_v42 = vshrl.u32 %v157_v41, 7  ;;  %v140_v45 = vld [vmem:[%s6471_s7 + $0x8] sm:$0xff]  ;;  %s4935_s26 = smov 112   ;;  %s4936_s27 = smov 32  }
   0xb   :  { %4427 = vmatprep.subr.bf16.mxu1 %v4426_v18  ;;  %v4432_v28 = vpack.c.bf16 %v155_v27, %v153_v26  ;;  %v48_v37 = vld [vmem:[%s6465_s1 + $0x10] sm:$0xf]  ;;  %v5107_v44 = vld [vmem:[%s6471_s7] sm:$0xff]  ;;  %s4937_s28 = smov 16   ;;  %s4938_s29 = smov 96   ;;  %vm267_vm3 = vcmask 130048  }
   0xc   :  { %3959 = vmatmul.mubr.msk.f32.gmra.mrb[4].mxu0 %vm49_vm0, %v44_v23  ;;  %v5102_v43 = vsub.s32 0, %v5099_v42  ;;  %s4939_s30 = smov 80   ;;  %vm5163_vm4 = vmpackc.low %vm267_vm3, %vm267_vm3  ;;  %vm404_vm5 = vcmask 1043456   ;;  %vm360_vm6 = vcmask 162816   ;;  %vm367_vm7 = vcmask 158720  }
   0xd   :  { %3967 = vmatprep.mubr.msk.f32.mxu0 %vm4931_vm1, %v4930_v2  ;;  %vm1237_vm8 = vcmask 261120   ;;  %vm1241_vm9 = vcmask 392192   ;;  %vm1355_vm10 = vcmask 519168  }
   0xe   :  { %4429 = vmatpush1.bf16.msra.mxu1 %v4428_v24  ;;  %v160_v48 = vrot.slane %v5107_v44, %v5102_v43  ;;  %v5117_v50 = vrot.slane %v140_v45, %v5102_v43 }
   0xf   :  { %4431 = vmatprep.subr.bf16.mxu1 %v4430_v25 }
  0x12   :  { %4433 = vmatpush1.bf16.msra.mxu1 %v4432_v28 }
  0x13   :  { %4441 = vmatprep.subr.bf16.mxu1 %v4932_v46 }
  0xd6   :  { %v125_v30 = vpop.f32.mrb[0].mxu0 }
  0xd7   :  { %v5077_v31 = vadd.f32 %v125_v30, %v46_v29  ;;  %v3954_v32 = vpop.f32.mrb[1].mxu0 }
  0xd8   :  { %v39_v32 = vld [vmem:[%s6472_s8] sm:$0xff] }
  0xd9   :  { %3532 = vmatmul.mubr.msk.f32.vlgmr.msra.gmra.mrb[0].mxu1 %vm165_vm2, %v5077_v31 }
  0xda   :  { %245 = vmatprep.mubr.f32.mxu1 %v4930_v2 }
  0xdb   :  { %v130_v34 = vpop.f32.mrb[2].mxu0 }
  0xdc   :  { %v5085_v35 = vadd.f32 %v130_v34, %v47_v33  ;;  %v3957_v36 = vpop.f32.mrb[3].mxu0 }
  0xde   :  { %3533 = vmatmul.mubr.msk.f32.gmra.mrb[2].mxu1 %vm165_vm2, %v5085_v35 }
  0xdf   :  { %v135_v38 = vpop.f32.mrb[4].mxu0  ;;  %251 = vmatprep.mubr.f32.mxu1 %v4930_v2 }
  0xe0   :  { %v5093_v39 = vadd.f32 %v135_v38, %v48_v37  ;;  %v3960_v40 = vpop.f32.mrb[5].mxu0 }
  0xe1   :  { %v40_v40 = vld [vmem:[%s6472_s8 + $0x8] sm:$0xff] }
  0xe2   :  { %3534 = vmatmul.mubr.msk.f32.gmra.mrb[4].mxu1 %vm165_vm2, %v5093_v39 }
  0xe3   :  { %3997 = vmatprep.mubr.msk.f32.mxu1 %vm4931_vm1, %v4930_v2 }
 0x1ac   :  { %v241_v47 = vpop.f32.mrb[0].mxu1 }
 0x1ad   :  { %v243_v49 = vpop.f32.mrb[1].mxu1  ;;  %v5119_v52 = vadd.f32 %v241_v47, %v160_v48 }
 0x1ae   :  { %v244_v55 = vadd.f32 %v243_v49, %v5117_v50 }
 0x1b1   :  { %v247_v51 = vpop.f32.mrb[2].mxu1 }
 0x1b2   :  { %v5121_v53 = vadd.f32 %v247_v51, %v160_v48  ;;  %v249_v54 = vpop.f32.mrb[3].mxu1 }
 0x1b3   :  { %v250_v56 = vadd.f32 %v249_v54, %v5117_v50 }
 0x1b4   :  { %v4706_v57 = vpack.i.bf16 %v5121_v53, %v5119_v52 }
 0x1b5   :  { %v253_v58 = vpop.f32.mrb[4].mxu1  ;;  %v4439_v59 = vpack.c.bf16 %v250_v56, %v244_v55  ;;  %v5127_v60 = vpack.i.bf16 %v250_v56, %v244_v55 }
 0x1b6   :  { %4707 = vrot.lane.b32.xlu1 %v4706_v57, %s4933_s2  ;;  %4702 = vrot.lane.b32.xlu0 %v4706_v57, %s4934_s25  ;;  %v5131_v61 = vadd.f32 %v253_v58, %v160_v48  ;;  %v255_v62 = vpop.f32.mrb[5].mxu1 }
 0x1b7   :  { %v5187_v18 = vadd.f32 %v255_v62, %v5117_v50 }
 0x1ba   :  { %498 = vrot.lane.b32.xlu1 %v5131_v61, %s4933_s2  ;;  %265 = vrot.lane.b32.xlu0 %v5131_v61, %s4934_s25 }
 0x1be   :  { %488 = vrot.lane.b32.xlu1 %v5119_v52, %s4935_s26  ;;  %4712 = vrot.lane.b32.xlu0 %v4706_v57, %s4936_s27 }
 0x1c2   :  { %492 = vrot.lane.b32.xlu1 %v5131_v61, %s4935_s26  ;;  %490 = vrot.lane.b32.xlu0 %v5121_v53, %s4935_s26 }
 0x1c6   :  { %4717 = vrot.lane.b32.xlu1 %v4706_v57, %s4937_s28  ;;  %736 = vrot.lane.b32.xlu0 %v5131_v61, %s4936_s27 }
 0x1ca   :  { %728 = vrot.lane.b32.xlu1 %v5121_v53, %s4938_s29  ;;  %726 = vrot.lane.b32.xlu0 %v5119_v52, %s4938_s29 }
 0x1ce   :  { %972 = vrot.lane.b32.xlu1 %v5131_v61, %s4937_s28  ;;  %730 = vrot.lane.b32.xlu0 %v5131_v61, %s4938_s29 }
 0x1d2   :  { %964 = vrot.lane.b32.xlu1 %v5121_v53, %s4939_s30  ;;  %962 = vrot.lane.b32.xlu0 %v5119_v52, %s4939_s30 }
 0x1d6   :  { %966 = vrot.lane.b32.xlu0 %v5131_v61, %s4939_s30 }
 0x228   :  { %v4708_v63 = vpop.permute.xlu1 %4707  ;;  %v4703_v0 = vpop.permute.xlu0 %4702 }
 0x229   :  { %v4710_v1 = vunpack.i.h.bf16 %v4708_v63  ;;  %v4709_v3 = vunpack.i.l.bf16 %v4708_v63  ;;  %v4705_v4 = vunpack.i.h.bf16 %v4703_v0  ;;  %v4704_v5 = vunpack.i.l.bf16 %v4703_v0 }
 0x22b   :  { %v4442_v7 = vpack.c.bf16 %v4710_v1, %v4709_v3  ;;  %v4435_v8 = vpack.c.bf16 %v4705_v4, %v4704_v5 }
 0x22c   :  { %v499_v9 = vpop.permute.xlu1 %498  ;;  %v266_v10 = vpop.permute.xlu0 %265 }
 0x22d   :  { %4437 = vmatpush3.bf16.xpose.msk.msra.mxu0 %vm5163_vm4, %v4435_v8  ;;  %4444 = vmatpush3.bf16.xpose.msk.msra.mxu1 %vm5163_vm4, %v4442_v7 }
 0x22e   :  { %3965 = vmatprep.subr.mxu0 %v4930_v2  ;;  %3995 = vmatprep.subr.mxu1 %v4930_v2 }
 0x230   :  { %v489_v11 = vpop.permute.xlu1 %488  ;;  %v4713_v12 = vpop.permute.xlu0 %4712 }
 0x231   :  { %v4715_v13 = vunpack.i.h.bf16 %v4713_v12  ;;  %v4714_v14 = vunpack.i.l.bf16 %v4713_v12 }
 0x233   :  { %v4449_v16 = vpack.c.bf16 %v4715_v13, %v4714_v14 }
 0x234   :  { %v493_v15 = vpop.permute.xlu1 %492  ;;  %v491_v17 = vpop.permute.xlu0 %490 }
 0x235   :  { %3966 = vmatpush3.xpose.msk.msra.mxu0 %vm267_vm3, %v266_v10  ;;  %3996 = vmatpush3.xpose.msk.msra.mxu1 %vm267_vm3, %v499_v9 }
 0x236   :  { %4448 = vmatprep.subr.bf16.mxu1 %v4932_v46  ;;  %4438 = vmatprep.subr.bf16.mxu0 %v4932_v46 }
 0x238   :  { %3998 = vmatmul.mubr.msk.f32.vlgmr.msra.gmra.mrb[6].mxu1 %vm267_vm3, %v489_v11  ;;  %3968 = vmatmul.mubr.msk.f32.vlgmr.msra.gmra.mrb[6].mxu0 %vm267_vm3, %v5119_v52  ;;  %v4718_v19 = vpop.permute.xlu1 %4717  ;;  %v737_v20 = vpop.permute.xlu0 %736  ;;  %v41_v52 = vld [vmem:[%s6472_s8 + $0x10] sm:$0xf] }
 0x239   :  { %4440 = vmatpush3.bf16.msra.mxu0 %v4439_v59  ;;  %4451 = vmatpush3.bf16.xpose.msk.msra.mxu1 %vm5163_vm4, %v4449_v16  ;;  %v4720_v21 = vunpack.i.h.bf16 %v4718_v19  ;;  %v4719_v22 = vunpack.i.l.bf16 %v4718_v19 }
 0x23a   :  { %3970 = vmatprep.mubr.msk.f32.mxu0 %vm4931_vm1, %v4930_v2  ;;  %4000 = vmatprep.mubr.msk.f32.mxu1 %vm4931_vm1, %v4930_v2 }
 0x23b   :  { %3980 = vmatprep.subr.mxu0 %v4930_v2  ;;  %4025 = vmatprep.subr.mxu1 %v4930_v2  ;;  %v4456_v23 = vpack.c.bf16 %v4720_v21, %v4719_v22 }
 0x23c   :  { %3971 = vmatmul.mubr.msk.f32.gmra.mrb[8].mxu0 %vm267_vm3, %v5121_v53  ;;  %4001 = vmatmul.mubr.msk.f32.gmra.mrb[8].mxu1 %vm267_vm3, %v491_v17  ;;  %v727_v24 = vpop.permute.xlu0 %726  ;;  %v729_v25 = vpop.permute.xlu1 %728 }
 0x23d   :  { %3981 = vmatpush3.msk.msra.mxu0 %vm404_vm5, %v5187_v18  ;;  %3973 = vmatprep.mubr.msk.f32.mxu0 %vm4931_vm1, %v4930_v2 }
 0x23e   :  { %4003 = vmatprep.mubr.msk.f32.mxu1 %vm4931_vm1, %v4930_v2  ;;  %4445 = vmatprep.subr.bf16.mxu0 %v4932_v46 }
 0x240   :  { %3974 = vmatmul.mubr.msk.f32.gmra.mrb[10].mxu0 %vm267_vm3, %v5131_v61  ;;  %4004 = vmatmul.mubr.msk.f32.gmra.mrb[10].mxu1 %vm267_vm3, %v493_v15  ;;  %v731_v26 = vpop.permute.xlu0 %730  ;;  %v973_v27 = vpop.permute.xlu1 %972 }
 0x241   :  { %4026 = vmatpush3.xpose.msk.msra.mxu1 %vm267_vm3, %v737_v20  ;;  %4027 = vmatprep.mubr.msk.f32.mxu1 %vm4931_vm1, %v4930_v2 }
 0x242   :  { %4455 = vmatprep.subr.bf16.mxu1 %v4932_v46  ;;  %3982 = vmatprep.mubr.msk.f32.mxu0 %vm4931_vm1, %v4930_v2 }
 0x244   :  { %4028 = vmatmul.mubr.msk.f32.vlgmr.msra.gmra.mrb[12].mxu1 %vm267_vm3, %v727_v24  ;;  %v963_v28 = vpop.permute.xlu0 %962  ;;  %v965_v29 = vpop.permute.xlu1 %964 }
 0x245   :  { %4458 = vmatpush3.bf16.xpose.msk.msra.mxu1 %vm5163_vm4, %v4456_v23  ;;  %4030 = vmatprep.mubr.msk.f32.mxu1 %vm4931_vm1, %v4930_v2 }
 0x246   :  { %4055 = vmatprep.subr.mxu1 %v4930_v2 }
 0x248   :  { %4031 = vmatmul.mubr.msk.f32.gmra.mrb[14].mxu1 %vm267_vm3, %v729_v25  ;;  %v967_v30 = vpop.permute.xlu0 %966 }
 0x249   :  { %4033 = vmatprep.mubr.msk.f32.mxu1 %vm4931_vm1, %v4930_v2 }
 0x24c   :  { %4034 = vmatmul.mubr.msk.f32.gmra.mrb[16].mxu1 %vm267_vm3, %v731_v26 }
 0x24d   :  { %4056 = vmatpush3.xpose.msk.msra.mxu1 %vm267_vm3, %v973_v27  ;;  %4057 = vmatprep.mubr.msk.f32.mxu1 %vm4931_vm1, %v4930_v2 }
 0x24e   :  { %4462 = vmatprep.subr.bf16.mxu1 %v4932_v46 }
 0x250   :  { %4058 = vmatmul.mubr.msk.f32.vlgmr.msra.gmra.mrb[18].mxu1 %vm267_vm3, %v963_v28 }
 0x251   :  { %4060 = vmatprep.mubr.msk.f32.mxu1 %vm4931_vm1, %v4930_v2 }
 0x254   :  { %4061 = vmatmul.mubr.msk.f32.gmra.mrb[20].mxu1 %vm267_vm3, %v965_v29 }
 0x255   :  { %4063 = vmatprep.mubr.msk.f32.mxu1 %vm4931_vm1, %v4930_v2 }
 0x258   :  { %4064 = vmatmul.mubr.msk.f32.gmra.mrb[22].mxu1 %vm267_vm3, %v967_v30 }
 0x259   :  { %4097 = vmatprep.mubr.msk.f32.mxu1 %vm4931_vm1, %v4930_v2 }
 0x30b   :  { %v346_v33 = vpop.f32.mrb[6].mxu0  ;;  %v578_v34 = vpop.f32.mrb[6].mxu1 }
 0x30c   :  { %v5236_v36 = vadd.f32 %v346_v33, %v39_v32  ;;  %v3969_v37 = vpop.f32.mrb[7].mxu0  ;;  %v3999_v38 = vpop.f32.mrb[7].mxu1  ;;  %v5241_v41 = vadd.f32 %v578_v34, %v39_v32 }
 0x30e   :  { %v361_v45 = vsel %vm360_vm6, %v5236_v36, -inf  ;;  %v592_v54 = vsel %vm360_vm6, %v5241_v41, -inf }
 0x30f   :  { %v351_v47 = vpop.f32.mrb[8].mxu0  ;;  %v583_v48 = vpop.f32.mrb[8].mxu1  ;;  %362 = vmax.xlane.f32.xlu1 %v361_v45 }
 0x310   :  { %v352_v49 = vadd.f32 %v351_v47, %v40_v40  ;;  %v3972_v50 = vpop.f32.mrb[9].mxu0  ;;  %v4002_v51 = vpop.f32.mrb[9].mxu1  ;;  %v584_v62 = vadd.f32 %v583_v48, %v40_v40 }
 0x312   :  { %v364_v53 = vsel %vm360_vm6, %v352_v49, -inf  ;;  %v595_v5 = vsel %vm360_vm6, %v584_v62, -inf }
 0x313   :  { %v356_v55 = vpop.f32.mrb[10].mxu0  ;;  %v588_v56 = vpop.f32.mrb[10].mxu1  ;;  %365 = vmax.xlane.f32.xlu0 %v364_v53  ;;  %593 = vmax.xlane.f32.xlu1 %v592_v54 }
 0x314   :  { %v357_v57 = vadd.f32 %v356_v55, %v41_v52  ;;  %v5251_v58 = vadd.f32 %v588_v56, %v41_v52  ;;  %v3975_v59 = vpop.f32.mrb[11].mxu0  ;;  %v4005_v61 = vpop.f32.mrb[11].mxu1 }
 0x316   :  { %v368_v63 = vsel %vm367_vm7, %v357_v57, -inf  ;;  %v598_v0 = vsel %vm367_vm7, %v5251_v58, -inf }
 0x317   :  { %v816_v1 = vpop.f32.mrb[12].mxu1  ;;  %369 = vmax.xlane.f32.xlu0 %v368_v63  ;;  %599 = vmax.xlane.f32.xlu1 %v598_v0 }
 0x318   :  { %v4029_v3 = vpop.f32.mrb[13].mxu1  ;;  %v5256_v4 = vadd.f32 %v816_v1, %v39_v32 }
 0x31a   :  { %v830_v10 = vsel %vm360_vm6, %v5256_v4, -inf }
 0x31b   :  { %v821_v7 = vpop.f32.mrb[14].mxu1  ;;  %596 = vmax.xlane.f32.xlu0 %v595_v5 }
 0x31c   :  { %v5259_v8 = vadd.f32 %v821_v7, %v40_v40  ;;  %v4032_v9 = vpop.f32.mrb[15].mxu1 }
 0x31e   :  { %v833_v11 = vsel %vm360_vm6, %v5259_v8, -inf }
 0x31f   :  { %v826_v12 = vpop.f32.mrb[16].mxu1  ;;  %831 = vmax.xlane.f32.xlu0 %v830_v10  ;;  %834 = vmax.xlane.f32.xlu1 %v833_v11 }
 0x320   :  { %v5265_v13 = vadd.f32 %v826_v12, %v41_v52  ;;  %v4035_v14 = vpop.f32.mrb[17].mxu1 }
 0x322   :  { %v836_v15 = vsel %vm367_vm7, %v5265_v13, -inf }
 0x323   :  { %v1052_v16 = vpop.f32.mrb[18].mxu1  ;;  %837 = vmax.xlane.f32.xlu0 %v836_v15 }
 0x324   :  { %v5269_v17 = vadd.f32 %v1052_v16, %v39_v32  ;;  %v4059_v19 = vpop.f32.mrb[19].mxu1 }
 0x326   :  { %v1066_v20 = vsel %vm360_vm6, %v5269_v17, -inf }
 0x327   :  { %v1057_v21 = vpop.f32.mrb[20].mxu1  ;;  %1067 = vmax.xlane.f32.xlu1 %v1066_v20 }
 0x328   :  { %v1058_v22 = vadd.f32 %v1057_v21, %v40_v40  ;;  %v4062_v23 = vpop.f32.mrb[21].mxu1 }
 0x32a   :  { %v1069_v24 = vsel %vm360_vm6, %v1058_v22, -inf }
 0x32b   :  { %v1062_v25 = vpop.f32.mrb[22].mxu1  ;;  %1070 = vmax.xlane.f32.xlu0 %v1069_v24 }
 0x32c   :  { %v5274_v26 = vadd.f32 %v1062_v25, %v41_v52  ;;  %v4065_v27 = vpop.f32.mrb[23].mxu1 }
 0x32e   :  { %v1072_v28 = vsel %vm367_vm7, %v5274_v26, -inf }
 0x32f   :  { %1073 = vmax.xlane.f32.xlu1 %v1072_v28 }
 0x39c   :  { %v363_v29 = vpop.xlane.xlu1 %362 }
 0x39d   :  { %v371_v30 = vsub.f32 %v5236_v36, %v363_v29 }
 0x39f   :  { %v374_v32 = vmul.f32 1.442695, %v371_v30 }
 0x3a0   :  { %v366_v33 = vpop.xlane.xlu0 %365  ;;  %v594_v34 = vpop.xlane.xlu1 %593 }
 0x3a1   :  { %4781 = vpow2.f32 %v374_v32  ;;  %v372_v37 = vsub.f32 %v352_v49, %v366_v33  ;;  %v601_v38 = vsub.f32 %v5241_v41, %v594_v34 }
 0x3a3   :  { %v604_v40 = vmul.f32 1.442695, %v601_v38  ;;  %v376_v45 = vmul.f32 1.442695, %v372_v37 }
 0x3a4   :  { %v370_v47 = vpop.xlane.xlu0 %369  ;;  %v600_v1 = vpop.xlane.xlu1 %599 }
 0x3a5   :  { %4783 = vpow2.f32 %v604_v40  ;;  %v373_v48 = vsub.f32 %v357_v57, %v370_v47  ;;  %v603_v5 = vsub.f32 %v5251_v58, %v600_v1 }
 0x3a6   :  { %4785 = vpow2.f32 %v376_v45 }
 0x3a7   :  { %v378_v53 = vmul.f32 1.442695, %v373_v48  ;;  %v608_v12 = vmul.f32 1.442695, %v603_v5 }
 0x3a8   :  { %v597_v50 = vpop.xlane.xlu0 %596 }
 0x3a9   :  { %v602_v51 = vsub.f32 %v584_v62, %v597_v50 }
 0x3ab   :  { %v5280_v52 = vpop.eup %4781  ;;  %v606_v54 = vmul.f32 1.442695, %v602_v51 }
 0x3ac   :  { %v380_v36 = vsel %vm360_vm6, %v5280_v52, 0.0  ;;  %v832_v63 = vpop.xlane.xlu0 %831  ;;  %v835_v9 = vpop.xlane.xlu1 %834 }
 0x3ad   :  { %4787 = vpow2.f32 %v606_v54  ;;  %381 = vadd.xlane.f32.xlu0 %v380_v36  ;;  %v839_v3 = vsub.f32 %v5256_v4, %v832_v63  ;;  %v840_v14 = vsub.f32 %v5259_v8, %v835_v9 }
 0x3ae   :  { %4789 = vpow2.f32 %v378_v53 }
 0x3af   :  { %v5284_v49 = vpop.eup %4783  ;;  %v842_v10 = vmul.f32 1.442695, %v839_v3  ;;  %v844_v16 = vmul.f32 1.442695, %v840_v14 }
 0x3b0   :  { %v610_v41 = vsel %vm360_vm6, %v5284_v49, 0.0  ;;  %v5288_v55 = vpop.eup %4785  ;;  %v838_v0 = vpop.xlane.xlu0 %837 }
 0x3b1   :  { %611 = vadd.xlane.f32.xlu1 %v610_v41  ;;  %v383_v56 = vsel %vm360_vm6, %v5288_v55, 0.0  ;;  %4791 = vpow2.f32 %v842_v10  ;;  %v841_v19 = vsub.f32 %v5265_v13, %v838_v0 }
 0x3b2   :  { %4793 = vpow2.f32 %v608_v12 }
 0x3b3   :  { %v846_v21 = vmul.f32 1.442695, %v841_v19 }
 0x3b4   :  { %v1068_v20 = vpop.xlane.xlu1 %1067 }
 0x3b5   :  { %384 = vadd.xlane.f32.xlu1 %v383_v56  ;;  %v1075_v4 = vsub.f32 %v5269_v17, %v1068_v20 }
 0x3b7   :  { %v5292_v57 = vpop.eup %4787  ;;  %v1078_v23 = vmul.f32 1.442695, %v1075_v4 }
 0x3b8   :  { %v613_v59 = vsel %vm360_vm6, %v5292_v57, 0.0  ;;  %v5296_v61 = vpop.eup %4789  ;;  %v1071_v7 = vpop.xlane.xlu0 %1070 }
 0x3b9   :  { %614 = vadd.xlane.f32.xlu0 %v613_v59  ;;  %v386_v62 = vsel %vm367_vm7, %v5296_v61, 0.0  ;;  %v1076_v11 = vsub.f32 %v1058_v22, %v1071_v7 }
 0x3bb   :  { %v1080_v15 = vmul.f32 1.442695, %v1076_v11  ;;  %v5314_v24 = vpop.eup %4791 }
 0x3bc   :  { %v1074_v58 = vpop.xlane.xlu1 %1073  ;;  %v5316_v8 = vpop.eup %4793  ;;  %v848_v13 = vsel %vm360_vm6, %v5314_v24, 0.0 }
 0x3bd   :  { %387 = vadd.xlane.f32.xlu0 %v386_v62  ;;  %4795 = vpow2.f32 %v1080_v15  ;;  %v1077_v22 = vsub.f32 %v5274_v26, %v1074_v58  ;;  %v616_v17 = vsel %vm367_vm7, %v5316_v8, 0.0 }
 0x3be   :  { %4797 = vpow2.f32 %v844_v16 }
 0x3bf   :  { %4799 = vpow2.f32 %v846_v21  ;;  %v1082_v25 = vmul.f32 1.442695, %v1077_v22 }
 0x3c0   :  { %4801 = vpow2.f32 %v1078_v23 }
 0x3c1   :  { %4803 = vpow2.f32 %v1082_v25 }
 0x3c6   :  { %631 = vrot.lane.b32.xlu1 %v5187_v18, %s4935_s26 }
 0x3c7   :  { %v5320_v27 = vpop.eup %4795 }
 0x3c8   :  { %v5324_v28 = vpop.eup %4797  ;;  %v1087_v26 = vsel %vm360_vm6, %v5320_v27, 0.0 }
 0x3c9   :  { %v851_v29 = vsel %vm360_vm6, %v5324_v28, 0.0  ;;  %v5330_v30 = vpop.eup %4799 }
 0x3ca   :  { %4727 = vrot.lane.b32.xlu1 %v5127_v60, %s4938_s29  ;;  %v854_v32 = vsel %vm367_vm7, %v5330_v30, 0.0  ;;  %v5334_v33 = vpop.eup %4801 }
 0x3cb   :  { %v1084_v34 = vsel %vm360_vm6, %v5334_v33, 0.0  ;;  %v5338_v37 = vpop.eup %4803 }
 0x3cc   :  { %v1090_v38 = vsel %vm367_vm7, %v5338_v37, 0.0 }
 0x3ce   :  { %867 = vrot.lane.b32.xlu1 %v5187_v18, %s4938_s29 }
 0x3d3   :  { %4722 = vrot.lane.b32.xlu0 %v5127_v60, %s4935_s26 }
 0x3f2   :  { %849 = vadd.xlane.f32.xlu0 %v848_v13  ;;  %617 = vadd.xlane.f32.xlu1 %v616_v17 }
 0x3f6   :  { %1088 = vadd.xlane.f32.xlu0 %v1087_v26  ;;  %852 = vadd.xlane.f32.xlu1 %v851_v29 }
 0x3fa   :  { %855 = vadd.xlane.f32.xlu1 %v854_v32 }
 0x3fe   :  { %1085 = vadd.xlane.f32.xlu1 %v1084_v34 }
 0x402   :  { %1091 = vadd.xlane.f32.xlu1 %v1090_v38 }
 0x40c   :  { %4732 = vrot.lane.b32.xlu0 %v5127_v60, %s4939_s30 }
 0x413   :  { %1103 = vrot.lane.b32.xlu1 %v5187_v18, %s4939_s30 }
 0x43a   :  { %v382_v40 = vpop.xlane.xlu0 %381 }
 0x43b   :  { %4805 = vrcp.f32 %v382_v40 }
 0x43e   :  { %v612_v45 = vpop.xlane.xlu1 %611 }
 0x442   :  { %v385_v47 = vpop.xlane.xlu1 %384 }
 0x443   :  { %4807 = vrcp.f32 %v385_v47  ;;  %v1246_v47 = vld [vmem:[%s6468_s4 + $0x8] sm:$0xff] }
 0x445   :  { %v4806_v48 = vpop.eup %4805 }
 0x446   :  { %v390_v50 = vmul.f32 %v4806_v48, %v5280_v52  ;;  %v615_v51 = vpop.xlane.xlu0 %614  ;;  %v632_v54 = vpop.permute.xlu1 %631 }
 0x448   :  { %3983 = vmatmul.mubr.msk.f32.vlgmr.msra.gmra.mrb[12].mxu0 %vm360_vm6, %v390_v50 }
 0x449   :  { %3985 = vmatprep.mubr.msk.f32.mxu0 %vm4931_vm1, %v4930_v2 }
 0x44a   :  { %v388_v53 = vpop.xlane.xlu0 %387  ;;  %v4728_v52 = vpop.permute.xlu1 %4727 }
 0x44b   :  { %4809 = vrcp.f32 %v388_v53  ;;  %v4730_v1 = vunpack.i.h.bf16 %v4728_v52  ;;  %v4729_v3 = vunpack.i.l.bf16 %v4728_v52 }
 0x44c   :  { %4811 = vrcp.f32 %v612_v45 }
 0x44d   :  { %v4808_v60 = vpop.eup %4807  ;;  %4813 = vrcp.f32 %v615_v51  ;;  %v4453_v7 = vpack.c.bf16 %v4730_v1, %v4729_v3 }
 0x44e   :  { %v4723_v18 = vpop.permute.xlu0 %4722  ;;  %v392_v56 = vmul.f32 %v4808_v60, %v5288_v55  ;;  %v868_v9 = vpop.permute.xlu1 %867 }
 0x44f   :  { %v4725_v36 = vunpack.i.h.bf16 %v4723_v18  ;;  %v4724_v41 = vunpack.i.l.bf16 %v4723_v18  ;;  %v1247_v18 = vld [vmem:[%s6468_s4 + $0x10] sm:$0xff] }
 0x450   :  { %3986 = vmatmul.mubr.msk.f32.gmra.mrb[14].mxu0 %vm360_vm6, %v392_v56  ;;  %v1249_v56 = vld [vmem:[%s6468_s4 + $0x20] sm:$0xff] }
 0x451   :  { %v4446_v59 = vpack.c.bf16 %v4725_v36, %v4724_v41  ;;  %3988 = vmatprep.mubr.msk.f32.mxu0 %vm4931_vm1, %v4930_v2  ;;  %v1248_v36 = vld [vmem:[%s6468_s4 + $0x18] sm:$0xff] }
 0x452   :  { %v4466_v41 = vpack.c.bf16 %v1248_v36, %v1247_v18 }
 0x453   :  { %4447 = vmatpush3.bf16.msra.mxu0 %v4446_v59  ;;  %v1250_v59 = vld [vmem:[%s6468_s4 + $0x28] sm:$0xff] }
 0x454   :  { %4010 = vmatprep.subr.mxu0 %v4930_v2  ;;  %v4469_v52 = vpack.c.bf16 %v1250_v59, %v1249_v56 }
 0x455   :  { %v4810_v62 = vpop.eup %4809 }
 0x456   :  { %v394_v63 = vmul.f32 %v4810_v62, %v5296_v61  ;;  %v4812_v0 = vpop.eup %4811 }
 0x457   :  { %4011 = vmatpush3.msk.msra.mxu0 %vm404_vm5, %v632_v54  ;;  %v620_v55 = vmul.f32 %v4812_v0, %v5284_v49  ;;  %v4814_v5 = vpop.eup %4813  ;;  %v1252_v0 = vld [vmem:[%s6468_s4 + $0x38] sm:$0xff] }
 0x458   :  { %3989 = vmatmul.mubr.msk.f32.gmra.mrb[16].mxu0 %vm360_vm6, %v394_v63  ;;  %4452 = vmatprep.subr.bf16.mxu0 %v4932_v46  ;;  %v622_v61 = vmul.f32 %v4814_v5, %v5292_v57  ;;  %v1251_v63 = vld [vmem:[%s6468_s4 + $0x30] sm:$0xff] }
 0x459   :  { %4012 = vmatprep.mubr.msk.f32.mxu0 %vm4931_vm1, %v4930_v2  ;;  %v4472_v3 = vpack.c.bf16 %v1252_v0, %v1251_v63 }
 0x45c   :  { %4013 = vmatmul.mubr.msk.f32.vlgmr.msra.gmra.mrb[18].mxu0 %vm360_vm6, %v620_v55 }
 0x45d   :  { %4454 = vmatpush3.bf16.msra.mxu0 %v4453_v7  ;;  %4015 = vmatprep.mubr.msk.f32.mxu0 %vm4931_vm1, %v4930_v2 }
 0x45e   :  { %4040 = vmatprep.subr.mxu0 %v4930_v2 }
 0x460   :  { %4016 = vmatmul.mubr.msk.f32.gmra.mrb[20].mxu0 %vm360_vm6, %v622_v61 }
 0x461   :  { %4041 = vmatpush3.msk.msra.mxu0 %vm404_vm5, %v868_v9  ;;  %4018 = vmatprep.mubr.msk.f32.mxu0 %vm4931_vm1, %v4930_v2 }
 0x462   :  { %4459 = vmatprep.subr.bf16.mxu0 %v4932_v46 }
 0x47f   :  { %v850_v49 = vpop.xlane.xlu0 %849  ;;  %v618_v10 = vpop.xlane.xlu1 %617 }
 0x480   :  { %4815 = vrcp.f32 %v618_v10 }
 0x481   :  { %4817 = vrcp.f32 %v850_v49 }
 0x483   :  { %v1089_v11 = vpop.xlane.xlu0 %1088  ;;  %v853_v12 = vpop.xlane.xlu1 %852 }
 0x484   :  { %4819 = vrcp.f32 %v853_v12 }
 0x487   :  { %v856_v14 = vpop.xlane.xlu1 %855  ;;  %v4733_v15 = vpop.permute.xlu0 %4732 }
 0x488   :  { %4821 = vrcp.f32 %v856_v14  ;;  %v4735_v21 = vunpack.i.h.bf16 %v4733_v15  ;;  %v4734_v4 = vunpack.i.l.bf16 %v4733_v15 }
 0x48a   :  { %v4816_v57 = vpop.eup %4815  ;;  %v4460_v25 = vpack.c.bf16 %v4735_v21, %v4734_v4 }
 0x48b   :  { %v1086_v16 = vpop.xlane.xlu1 %1085  ;;  %v624_v19 = vmul.f32 %v4816_v57, %v5316_v8  ;;  %v4818_v20 = vpop.eup %4817 }
 0x48c   :  { %4823 = vrcp.f32 %v1086_v16  ;;  %v858_v58 = vmul.f32 %v4818_v20, %v5314_v24 }
 0x48d   :  { %4019 = vmatmul.mubr.msk.f32.gmra.mrb[22].mxu0 %vm360_vm6, %v624_v19  ;;  %4825 = vrcp.f32 %v1089_v11 }
 0x48e   :  { %4042 = vmatprep.mubr.msk.f32.mxu0 %vm4931_vm1, %v4930_v2  ;;  %v4820_v22 = vpop.eup %4819 }
 0x48f   :  { %v1092_v23 = vpop.xlane.xlu1 %1091  ;;  %v860_v13 = vmul.f32 %v4820_v22, %v5324_v28 }
 0x490   :  { %4827 = vrcp.f32 %v1092_v23 }
 0x491   :  { %4043 = vmatmul.mubr.msk.f32.vlgmr.msra.gmra.mrb[24].mxu0 %vm360_vm6, %v858_v58 }
 0x492   :  { %4461 = vmatpush3.bf16.msra.mxu0 %v4460_v25  ;;  %4045 = vmatprep.mubr.msk.f32.mxu0 %vm4931_vm1, %v4930_v2  ;;  %v4822_v17 = vpop.eup %4821 }
 0x493   :  { %v1104_v8 = vpop.permute.xlu1 %1103  ;;  %4070 = vmatprep.subr.mxu0 %v4930_v2  ;;  %v862_v24 = vmul.f32 %v4822_v17, %v5330_v30 }
 0x495   :  { %4046 = vmatmul.mubr.msk.f32.gmra.mrb[26].mxu0 %vm360_vm6, %v860_v13 }
 0x496   :  { %4071 = vmatpush3.msk.msra.mxu0 %vm404_vm5, %v1104_v8  ;;  %4048 = vmatprep.mubr.msk.f32.mxu0 %vm4931_vm1, %v4930_v2  ;;  %v4824_v26 = vpop.eup %4823 }
 0x497   :  { %4474 = vmatprep.subr.bf16.mxu0 %v4932_v46  ;;  %v1094_v28 = vmul.f32 %v4824_v26, %v5334_v33  ;;  %v4826_v29 = vpop.eup %4825 }
 0x498   :  { %v1096_v32 = vmul.f32 %v4826_v29, %v5320_v27  ;;  %v1245_v27 = vld [vmem:[%s6468_s4] sm:$0xff] }
 0x499   :  { %4049 = vmatmul.mubr.msk.f32.gmra.mrb[28].mxu0 %vm360_vm6, %v862_v24  ;;  %v4463_v48 = vpack.c.bf16 %v1246_v47, %v1245_v27 }
 0x49a   :  { %4072 = vmatprep.mubr.msk.f32.mxu0 %vm4931_vm1, %v4930_v2  ;;  %v4828_v34 = vpop.eup %4827 }
 0x49b   :  { %v1098_v30 = vmul.f32 %v4828_v34, %v5338_v37  ;;  %4464 = vmatpush3.bf16.msra.mxu1 %v4463_v48 }
 0x49c   :  { %4465 = vmatprep.subr.bf16.mxu1 %v4932_v46 }
 0x49d   :  { %4073 = vmatmul.mubr.msk.f32.vlgmr.msra.gmra.mrb[30].mxu0 %vm360_vm6, %v1094_v28 }
 0x49e   :  { %4075 = vmatprep.mubr.msk.f32.mxu0 %vm4931_vm1, %v4930_v2 }
 0x49f   :  { %4467 = vmatpush3.bf16.msra.mxu1 %v4466_v41 }
 0x4a0   :  { %4468 = vmatprep.subr.bf16.mxu1 %v4932_v46 }
 0x4a1   :  { %4076 = vmatmul.mubr.msk.f32.gmra.mrb[32].mxu0 %vm360_vm6, %v1096_v32 }
 0x4a2   :  { %4078 = vmatprep.mubr.msk.f32.mxu0 %vm4931_vm1, %v4930_v2 }
 0x4a3   :  { %4470 = vmatpush3.bf16.msra.mxu1 %v4469_v52 }
 0x4a4   :  { %4471 = vmatprep.subr.bf16.mxu1 %v4932_v46 }
 0x4a5   :  { %4079 = vmatmul.mubr.msk.f32.gmra.mrb[34].mxu0 %vm360_vm6, %v1098_v30  ;;  %v1255_v30 = vsub.s32 1, %v5099_v42 }
 0x4a6   :  { %4122 = vmatprep.mubr.msk.f32.mxu0 %vm4931_vm1, %v4930_v2 }
 0x4a7   :  { %4473 = vmatpush3.bf16.msra.mxu1 %v4472_v3 }
 0x4a8   :  { %4486 = vmatprep.subr.bf16.mxu1 %v4932_v46 }
 0x51b   :  { %v474_v33 = vpop.f32.mrb[12].mxu0 }
 0x51c   :  { %v3984_v38 = vpop.f32.mrb[13].mxu0 }
 0x523   :  { %v5403_v40 = vpop.f32.mrb[14].mxu0 }
 0x524   :  { %v3987_v45 = vpop.f32.mrb[15].mxu0 }
 0x52b   :  { %v5411_v37 = vpop.f32.mrb[16].mxu0 }
 0x52c   :  { %v3990_v50 = vpop.f32.mrb[17].mxu0 }
 0x52f   :  { %v712_v51 = vpop.f32.mrb[18].mxu0 }
 0x530   :  { %1201 = vrot.lane.b32.xlu0 %v712_v51, %s4937_s28  ;;  %v4014_v53 = vpop.f32.mrb[19].mxu0 }
 0x533   :  { %v717_v60 = vpop.f32.mrb[20].mxu0 }
 0x534   :  { %1203 = vrot.lane.b32.xlu0 %v717_v60, %s4937_s28  ;;  %v4017_v54 = vpop.f32.mrb[21].mxu0 }
 0x560   :  { %v722_v62 = vpop.f32.mrb[22].mxu0 }
 0x561   :  { %v4020_v1 = vpop.f32.mrb[23].mxu0 }
 0x564   :  { %v948_v55 = vpop.f32.mrb[24].mxu0 }
 0x565   :  { %1213 = vrot.lane.b32.xlu0 %v948_v55, %s4936_s27  ;;  %v4044_v5 = vpop.f32.mrb[25].mxu0 }
 0x568   :  { %v953_v7 = vpop.f32.mrb[26].mxu0 }
 0x569   :  { %1215 = vrot.lane.b32.xlu1 %v953_v7, %s4936_s27  ;;  %v4047_v61 = vpop.f32.mrb[27].mxu0 }
 0x56a   :  { %v1404_v61 = vld [vmem:[%s6469_s5] sm:$0xff] }
 0x56c   :  { %v958_v9 = vpop.f32.mrb[28].mxu0 }
 0x56d   :  { %1205 = vrot.lane.b32.xlu1 %v722_v62, %s4937_s28  ;;  %v4050_v49 = vpop.f32.mrb[29].mxu0 }
 0x570   :  { %v1184_v10 = vpop.f32.mrb[30].mxu0 }
 0x571   :  { %1225 = vrot.lane.b32.xlu0 %v1184_v10, %s4933_s2  ;;  %v4074_v11 = vpop.f32.mrb[31].mxu0  ;;  %v1406_v10 = vld [vmem:[%s6469_s5 + $0x10] sm:$0xff] }
 0x572   :  { %v1407_v11 = vld [vmem:[%s6469_s5 + $0x18] sm:$0xff] }
 0x574   :  { %v1189_v12 = vpop.f32.mrb[32].mxu0 }
 0x575   :  { %1227 = vrot.lane.b32.xlu0 %v1189_v12, %s4933_s2  ;;  %v4077_v14 = vpop.f32.mrb[33].mxu0  ;;  %v4478_v12 = vpack.c.bf16 %v1407_v11, %v1406_v10  ;;  %v1523_v10 = vld [vmem:[%s6470_s6 + $0x78] sm:$0xff]  ;;  %v1414_v11 = vsub.s32 2, %v5099_v42 }
 0x576   :  { %v1408_v14 = vld [vmem:[%s6469_s5 + $0x20] sm:$0xff] }
 0x578   :  { %v1194_v15 = vpop.f32.mrb[34].mxu0 }
 0x579   :  { %1217 = vrot.lane.b32.xlu0 %v958_v9, %s4936_s27  ;;  %1229 = vrot.lane.b32.xlu1 %v1194_v15, %s4933_s2  ;;  %v4080_v57 = vpop.f32.mrb[35].mxu0  ;;  %v1405_v9 = vld [vmem:[%s6469_s5 + $0x8] sm:$0xff] }
 0x57a   :  { %v4475_v49 = vpack.c.bf16 %v1405_v9, %v1404_v61  ;;  %v1409_v15 = vld [vmem:[%s6469_s5 + $0x28] sm:$0xff] }
 0x57b   :  { %v4481_v57 = vpack.c.bf16 %v1409_v15, %v1408_v14 }
 0x57c   :  { %4476 = vmatpush3.bf16.msra.mxu0 %v4475_v49 }
 0x57d   :  { %4477 = vmatprep.subr.bf16.mxu0 %v4932_v46 }
 0x580   :  { %4479 = vmatpush3.bf16.msra.mxu0 %v4478_v12 }
 0x581   :  { %4480 = vmatprep.subr.bf16.mxu0 %v4932_v46 }
 0x584   :  { %4482 = vmatpush3.bf16.msra.mxu0 %v4481_v57 }
 0x585   :  { %4483 = vmatprep.subr.bf16.mxu0 %v4932_v46 }
 0x5a2   :  { %v1202_v16 = vpop.permute.xlu0 %1201 }
 0x5a3   :  { %v1234_v4 = vsel %vm267_vm3, %v474_v33, %v1202_v16  ;;  %v1256_v33 = vrot.slane %v5107_v44, %v1255_v30  ;;  %v1410_v16 = vld [vmem:[%s6469_s5 + $0x30] sm:$0xff] }
 0x5a6   :  { %v1204_v19 = vpop.permute.xlu0 %1203 }
 0x5a7   :  { %v1235_v25 = vsel %vm267_vm3, %v5403_v40, %v1204_v19  ;;  %v1411_v19 = vld [vmem:[%s6469_s5 + $0x38] sm:$0xff] }
 0x5d7   :  { %v1214_v20 = vpop.permute.xlu0 %1213 }
 0x5d8   :  { %v1238_v58 = vsel %vm1237_vm8, %v1234_v4, %v1214_v20  ;;  %v4484_v20 = vpack.c.bf16 %v1411_v19, %v1410_v16  ;;  %v1509_v4 = vld [vmem:[%s6470_s6 + $0x8] sm:$0xff] }
 0x5da   :  { %4485 = vmatpush3.bf16.msra.mxu0 %v4484_v20 }
 0x5db   :  { %v1216_v21 = vpop.permute.xlu1 %1215 }
 0x5dc   :  { %v1239_v8 = vsel %vm1237_vm8, %v1235_v25, %v1216_v21  ;;  %v1508_v21 = vld [vmem:[%s6470_s6] sm:$0xff] }
 0x5df   :  { %v1206_v13 = vpop.permute.xlu1 %1205 }
 0x5e0   :  { %v1236_v26 = vsel %vm267_vm3, %v5411_v37, %v1206_v13  ;;  %v1513_v13 = vld [vmem:[%s6470_s6 + $0x28] sm:$0xff] }
 0x5e3   :  { %v1226_v23 = vpop.permute.xlu0 %1225 }
 0x5e4   :  { %v1242_v22 = vsel %vm1241_vm9, %v1238_v58, %v1226_v23  ;;  %v1510_v58 = vld [vmem:[%s6470_s6 + $0x10] sm:$0xff]  ;;  %v4487_v23 = vpack.c.bf16 %v1509_v4, %v1508_v21 }
 0x5e5   :  { %4098 = vmatmul.mubr.msk.f32.vlgmr.msra.gmra.mrb[24].mxu1 %vm165_vm2, %v1242_v22  ;;  %v1511_v22 = vld [vmem:[%s6470_s6 + $0x18] sm:$0xff] }
 0x5e6   :  { %4100 = vmatprep.mubr.msk.f32.mxu1 %vm4931_vm1, %v4930_v2  ;;  %4488 = vmatpush3.bf16.msra.mxu1 %v4487_v23  ;;  %v4490_v25 = vpack.c.bf16 %v1511_v22, %v1510_v58 }
 0x5e7   :  { %v1228_v17 = vpop.permute.xlu0 %1227  ;;  %4489 = vmatprep.subr.bf16.mxu1 %v4932_v46 }
 0x5e8   :  { %v1243_v24 = vsel %vm1241_vm9, %v1239_v8, %v1228_v17  ;;  %v1512_v8 = vld [vmem:[%s6470_s6 + $0x20] sm:$0xff] }
 0x5e9   :  { %4101 = vmatmul.mubr.msk.f32.gmra.mrb[26].mxu1 %vm165_vm2, %v1243_v24  ;;  %v4493_v17 = vpack.c.bf16 %v1513_v13, %v1512_v8  ;;  %v1514_v24 = vld [vmem:[%s6470_s6 + $0x30] sm:$0xff]  ;;  %v1526_v8 = vsub.s32 3, %v5099_v42 }
 0x5ea   :  { %4103 = vmatprep.mubr.msk.f32.mxu1 %vm4931_vm1, %v4930_v2  ;;  %4491 = vmatpush3.bf16.msra.mxu1 %v4490_v25 }
 0x5eb   :  { %v1218_v28 = vpop.permute.xlu0 %1217  ;;  %v1230_v29 = vpop.permute.xlu1 %1229  ;;  %4492 = vmatprep.subr.bf16.mxu1 %v4932_v46 }
 0x5ec   :  { %v1240_v32 = vsel %vm1237_vm8, %v1236_v26, %v1218_v28  ;;  %v1515_v26 = vld [vmem:[%s6470_s6 + $0x38] sm:$0xff] }
 0x5ed   :  { %v1244_v34 = vsel %vm1241_vm9, %v1240_v32, %v1230_v29  ;;  %v4496_v28 = vpack.c.bf16 %v1515_v26, %v1514_v24  ;;  %v1516_v29 = vld [vmem:[%s6470_s6 + $0x40] sm:$0xff]  ;;  %v1517_v32 = vld [vmem:[%s6470_s6 + $0x48] sm:$0xff] }
 0x5ee   :  { %4104 = vmatmul.mubr.msk.f32.gmra.mrb[28].mxu1 %vm165_vm2, %v1244_v34  ;;  %v4499_v34 = vpack.c.bf16 %v1517_v32, %v1516_v29 }
 0x5ef   :  { %4163 = vmatprep.mubr.msk.f32.mxu1 %vm4931_vm1, %v4930_v2  ;;  %4494 = vmatpush3.bf16.msra.mxu1 %v4493_v17 }
 0x5f0   :  { %4495 = vmatprep.subr.bf16.mxu1 %v4932_v46 }
 0x5f3   :  { %4497 = vmatpush3.bf16.msra.mxu1 %v4496_v28 }
 0x5f4   :  { %4498 = vmatprep.subr.bf16.mxu1 %v4932_v46 }
 0x5f7   :  { %4500 = vmatpush3.bf16.msra.mxu1 %v4499_v34 }
 0x5f8   :  { %4501 = vmatprep.subr.bf16.mxu1 %v4932_v46 }
 0x6b8   :  { %v1332_v38 = vpop.f32.mrb[24].mxu1 }
 0x6b9   :  { %v1333_v40 = vadd.f32 %v1332_v38, %v1256_v33  ;;  %v4099_v45 = vpop.f32.mrb[25].mxu1  ;;  %v1519_v38 = vld [vmem:[%s6470_s6 + $0x58] sm:$0xff] }
 0x6ba   :  { %v1520_v45 = vld [vmem:[%s6470_s6 + $0x60] sm:$0xff] }
 0x6bb   :  { %v1346_v27 = vadd.f32 %v1333_v40, %v5077_v31 }
 0x6bc   :  { %v1337_v47 = vpop.f32.mrb[26].mxu1 }
 0x6bd   :  { %v1338_v48 = vadd.f32 %v1337_v47, %v1256_v33  ;;  %v4102_v37 = vpop.f32.mrb[27].mxu1  ;;  %v1349_v50 = vsel %vm165_vm2, %v1346_v27, 0.0 }
 0x6be   :  { %1350 = vadd.xlane.f32.xlu0 %v1349_v50 }
 0x6bf   :  { %v1347_v51 = vadd.f32 %v1338_v48, %v5085_v35 }
 0x6c1   :  { %v1342_v53 = vpop.f32.mrb[28].mxu1  ;;  %v1352_v60 = vsel %vm165_vm2, %v1347_v51, 0.0 }
 0x6c2   :  { %v1343_v54 = vadd.f32 %v1342_v53, %v1256_v33  ;;  %1353 = vadd.xlane.f32.xlu1 %v1352_v60  ;;  %v4105_v18 = vpop.f32.mrb[29].mxu1  ;;  %v1518_v33 = vld [vmem:[%s6470_s6 + $0x50] sm:$0xff] }
 0x6c3   :  { %v4502_v40 = vpack.c.bf16 %v1519_v38, %v1518_v33  ;;  %v1392_v18 = vsub.s32 4, %v5099_v42 }
 0x6c4   :  { %v1348_v44 = vadd.f32 %v1343_v54, %v5093_v39 }
 0x6c5   :  { %4503 = vmatpush3.bf16.msra.mxu1 %v4502_v40 }
 0x6c6   :  { %v1356_v36 = vsel %vm1355_vm10, %v1348_v44, 0.0  ;;  %4504 = vmatprep.subr.bf16.mxu1 %v4932_v46 }
 0x6c7   :  { %1357 = vadd.xlane.f32.xlu0 %v1356_v36  ;;  %v1399_v36 = vsub.s32 5, %v5099_v42 }
 0x74b   :  { %v1351_v31 = vpop.xlane.xlu0 %1350 }
 0x74c   :  { %v1360_v41 = vmul.f32 0.015625, %v1351_v31 }
 0x74e   :  { %v5474_v56 = vsub.f32 %v1346_v27, %v1360_v41  ;;  %v1521_v27 = vld [vmem:[%s6470_s6 + $0x68] sm:$0xff]  ;;  %v5570_v41 = vld [vmem:[%s6471_s7] sm:$0xff] }
 0x74f   :  { %v1354_v59 = vpop.xlane.xlu1 %1353  ;;  %v4505_v47 = vpack.c.bf16 %v1521_v27, %v1520_v45  ;;  %v1415_v12 = vrot.slane %v5570_v41, %v1414_v11  ;;  %v1527_v13 = vrot.slane %v5570_v41, %v1526_v8 }
 0x750   :  { %v1361_v52 = vmul.f32 0.015625, %v1354_v59  ;;  %v1366_v35 = vmul.f32 %v5474_v56, %v5474_v56  ;;  %v1393_v59 = vrot.slane %v5570_v41, %v1392_v18 }
 0x751   :  { %4506 = vmatpush3.bf16.msra.mxu1 %v4505_v47 }
 0x752   :  { %v5478_v62 = vsub.f32 %v1347_v51, %v1361_v52  ;;  %v1369_v63 = vsel %vm165_vm2, %v1366_v35, 0.0  ;;  %4507 = vmatprep.subr.bf16.mxu1 %v4932_v46  ;;  %v1400_v35 = vrot.slane %v5570_v41, %v1399_v36 }
 0x753   :  { %1370 = vadd.xlane.f32.xlu0 %v1369_v63 }
 0x754   :  { %v1358_v0 = vpop.xlane.xlu0 %1357  ;;  %v1367_v39 = vmul.f32 %v5478_v62, %v5478_v62 }
 0x755   :  { %v1362_v1 = vmul.f32 0.015625, %v1358_v0 }
 0x756   :  { %v1372_v3 = vsel %vm165_vm2, %v1367_v39, 0.0 }
 0x757   :  { %v5484_v55 = vsub.f32 %v1348_v44, %v1362_v1  ;;  %1373 = vadd.xlane.f32.xlu1 %v1372_v3 }
 0x759   :  { %v1368_v5 = vmul.f32 %v5484_v55, %v5484_v55 }
 0x75b   :  { %v1375_v7 = vsel %vm1355_vm10, %v1368_v5, 0.0 }
 0x75c   :  { %1376 = vadd.xlane.f32.xlu0 %v1375_v7 }
 0x7e0   :  { %v1371_v48 = vpop.xlane.xlu0 %1370 }
 0x7e1   :  { %v1378_v37 = vmul.f32 0.015625, %v1371_v48 }
 0x7e3   :  { %v1381_v50 = vadd.f32 1e-05, %v1378_v37 }
 0x7e4   :  { %v1374_v51 = vpop.xlane.xlu1 %1373 }
 0x7e5   :  { %4829 = vrsqrt.f32 %v1381_v50  ;;  %v1379_v53 = vmul.f32 0.015625, %v1374_v51 }
 0x7e7   :  { %v1382_v60 = vadd.f32 1e-05, %v1379_v53 }
 0x7e9   :  { %4831 = vrsqrt.f32 %v1382_v60  ;;  %v1377_v54 = vpop.xlane.xlu0 %1376 }
 0x7ea   :  { %v1380_v44 = vmul.f32 0.015625, %v1377_v54 }
 0x7ec   :  { %v1383_v31 = vadd.f32 1e-05, %v1380_v44 }
 0x7ee   :  { %4833 = vrsqrt.f32 %v1383_v31 }
 0x7ef   :  { %v4830_v52 = vpop.eup %4829 }
 0x7f0   :  { %v1387_v63 = vmul.f32 %v4830_v52, %v5474_v56 }
 0x7f2   :  { %v1394_v0 = vmul.f32 %v1393_v59, %v1387_v63 }
 0x7f3   :  { %v4832_v39 = vpop.eup %4831 }
 0x7f4   :  { %v1401_v1 = vadd.f32 %v1400_v35, %v1394_v0  ;;  %v1388_v3 = vmul.f32 %v4832_v39, %v5478_v62  ;;  %v1522_v62 = vld [vmem:[%s6470_s6 + $0x70] sm:$0xff] }
 0x7f6   :  { %4123 = vmatmul.mubr.msk.f32.vlgmr.msra.gmra.mrb[36].mxu0 %vm165_vm2, %v1401_v1  ;;  %v1395_v5 = vmul.f32 %v1393_v59, %v1388_v3 }
 0x7f7   :  { %4125 = vmatprep.mubr.msk.f32.mxu0 %vm4931_vm1, %v4930_v2 }
 0x7f8   :  { %v4834_v7 = vpop.eup %4833  ;;  %v1402_v61 = vadd.f32 %v1400_v35, %v1395_v5  ;;  %v3584_v5 = vld [vmem:[%s6467_s3 + $0x88] sm:$0xff] }
 0x7f9   :  { %v1389_v9 = vmul.f32 %v4834_v7, %v5484_v55  ;;  %v4508_v55 = vpack.c.bf16 %v1523_v10, %v1522_v62  ;;  %v3586_v7 = vld [vmem:[%s6467_s3 + $0x98] sm:$0xff]  ;;  %v3588_v62 = vld [vmem:[%s6467_s3 + $0xa8] sm:$0xff] }
 0x7fa   :  { %4126 = vmatmul.mubr.msk.f32.gmra.mrb[38].mxu0 %vm165_vm2, %v1402_v61  ;;  %v3590_v10 = vld [vmem:[%s6467_s3 + $0xb8] sm:$0xff] }
 0x7fb   :  { %4128 = vmatprep.mubr.msk.f32.mxu0 %vm4931_vm1, %v4930_v2  ;;  %v1396_v56 = vmul.f32 %v1393_v59, %v1389_v9  ;;  %4509 = vmatpush3.bf16.msra.mxu1 %v4508_v55  ;;  %v3583_v9 = vld [vmem:[%s6467_s3 + $0x80] sm:$0xff]  ;;  %v4514_v55 = vpack.c.bf16 %v3590_v10, %v3588_v62 }
 0x7fc   :  { %4530 = vmatprep.subr.bf16.mxu1 %v4932_v46 }
 0x7fd   :  { %v1403_v49 = vadd.f32 %v1400_v35, %v1396_v56  ;;  %v3585_v56 = vld [vmem:[%s6467_s3 + $0x90] sm:$0xff] }
 0x7ff   :  { %4129 = vmatmul.mubr.msk.f32.gmra.mrb[40].mxu0 %vm165_vm2, %v1403_v49 }
 0x800   :  { %1765 = vmatprep.mubr.f32.mxu0 %v4930_v2 }
 0x8c9   :  { %v1491_v14 = vpop.f32.mrb[36].mxu0 }
 0x8ca   :  { %v1492_v15 = vadd.f32 %v1491_v14, %v1415_v12  ;;  %v4124_v57 = vpop.f32.mrb[37].mxu0  ;;  %v3589_v14 = vld [vmem:[%s6467_s3 + $0xb0] sm:$0xff] }
 0x8cb   :  { %v3592_v57 = vld [vmem:[%s6467_s3 + $0xc8] sm:$0xff] }
 0x8cc   :  { %v1505_v16 = vmax.f32 %v1492_v15, 0.0 }
 0x8cd   :  { %v1496_v19 = vpop.f32.mrb[38].mxu0 }
 0x8ce   :  { %v1497_v20 = vadd.f32 %v1496_v19, %v1415_v12  ;;  %v4127_v21 = vpop.f32.mrb[39].mxu0  ;;  %4164 = vmatmul.mubr.f32.vlgmr.msra.gmra.mrb[30].mxu1 %v1505_v16  ;;  %v3594_v16 = vld [vmem:[%s6467_s3 + $0xd8] sm:$0xff] }
 0x8cf   :  { %4166 = vmatprep.mubr.msk.f32.mxu1 %vm4931_vm1, %v4930_v2  ;;  %v4518_v19 = vpack.c.bf16 %v3594_v16, %v3592_v57  ;;  %v3593_v21 = vld [vmem:[%s6467_s3 + $0xd0] sm:$0xff] }
 0x8d0   :  { %v1506_v4 = vmax.f32 %v1497_v20, 0.0  ;;  %v3591_v20 = vld [vmem:[%s6467_s3 + $0xc0] sm:$0xff] }
 0x8d2   :  { %v1501_v58 = vpop.f32.mrb[40].mxu0  ;;  %4167 = vmatmul.mubr.f32.gmra.mrb[32].mxu1 %v1506_v4  ;;  %v4520_v4 = vpack.c.bf16 %v3593_v21, %v3591_v20 }
 0x8d3   :  { %v1502_v23 = vadd.f32 %v1501_v58, %v1415_v12  ;;  %v4130_v22 = vpop.f32.mrb[41].mxu0  ;;  %4169 = vmatprep.mubr.msk.f32.mxu1 %vm4931_vm1, %v4930_v2  ;;  %v3587_v12 = vld [vmem:[%s6467_s3 + $0xa0] sm:$0xff]  ;;  %v3596_v58 = vld [vmem:[%s6467_s3 + $0xe8] sm:$0xff] }
 0x8d4   :  { %v4516_v15 = vpack.c.bf16 %v3589_v14, %v3587_v12 }
 0x8d5   :  { %v1507_v25 = vmax.f32 %v1502_v23, 0.0  ;;  %v3598_v23 = vld [vmem:[%s6467_s3 + $0xf8] sm:$0xff] }
 0x8d6   :  { %v4522_v22 = vpack.c.bf16 %v3598_v23, %v3596_v58 }
 0x8d7   :  { %4170 = vmatmul.mubr.f32.gmra.mrb[34].mxu1 %v1507_v25  ;;  %v3595_v25 = vld [vmem:[%s6467_s3 + $0xe0] sm:$0xff] }
 0x8d8   :  { %4193 = vmatprep.mubr.msk.f32.mxu1 %vm4931_vm1, %v4930_v2 }
 0x9a1   :  { %v1594_v17 = vpop.f32.mrb[30].mxu1 }
 0x9a2   :  { %v1595_v24 = vadd.f32 %v1594_v17, %v1527_v13  ;;  %v4165_v26 = vpop.f32.mrb[31].mxu1 }
 0x9a4   :  { %v1608_v28 = vadd.f32 %v1595_v24, %v1401_v1 }
 0x9a5   :  { %v1599_v29 = vpop.f32.mrb[32].mxu1 }
 0x9a6   :  { %v1600_v32 = vadd.f32 %v1599_v29, %v1527_v13  ;;  %v4168_v34 = vpop.f32.mrb[33].mxu1  ;;  %v1611_v33 = vsel %vm165_vm2, %v1608_v28, 0.0 }
 0x9a7   :  { %1612 = vadd.xlane.f32.xlu1 %v1611_v33 }
 0x9a8   :  { %v1609_v38 = vadd.f32 %v1600_v32, %v1402_v61  ;;  %v4510_v61 = vpack.c.bf16 %v3586_v7, %v3584_v5 }
 0x9aa   :  { %v1604_v40 = vpop.f32.mrb[34].mxu1  ;;  %v1614_v45 = vsel %vm165_vm2, %v1609_v38, 0.0  ;;  %4511 = vmatprep.subr.bf16.mxu0 %v4510_v61 }
 0x9ab   :  { %v1605_v27 = vadd.f32 %v1604_v40, %v1527_v13  ;;  %1615 = vadd.xlane.f32.xlu0 %v1614_v45  ;;  %v4171_v47 = vpop.f32.mrb[35].mxu1  ;;  %v3597_v13 = vld [vmem:[%s6467_s3 + $0xf0] sm:$0xff]  ;;  %v1659_v45 = vsub.s32 7, %v5099_v42 }
 0x9ac   :  { %v4524_v17 = vpack.c.bf16 %v3597_v13, %v3595_v25 }
 0x9ad   :  { %v1610_v48 = vadd.f32 %v1605_v27, %v1403_v49  ;;  %v4512_v49 = vpack.c.bf16 %v3585_v56, %v3583_v9 }
 0x9af   :  { %v1617_v37 = vsel %vm1355_vm10, %v1610_v48, 0.0  ;;  %4513 = vmatpush1.bf16.msra.mxu0 %v4512_v49 }
 0x9b0   :  { %1618 = vadd.xlane.f32.xlu1 %v1617_v37  ;;  %4515 = vmatprep.subr.bf16.mxu0 %v4514_v55  ;;  %v1660_v37 = vrot.slane %v5570_v41, %v1659_v45 }
 0x9b3   :  { %4517 = vmatpush1.bf16.msra.mxu0 %v4516_v15 }
 0x9b4   :  { %4519 = vmatprep.subr.bf16.mxu0 %v4518_v19 }
 0x9b7   :  { %4521 = vmatpush1.bf16.msra.mxu0 %v4520_v4 }
 0x9b8   :  { %4523 = vmatprep.subr.bf16.mxu0 %v4522_v22 }
 0x9bb   :  { %4525 = vmatpush1.bf16.msra.mxu0 %v4524_v17 }
 0x9bc   :  { %4526 = vmatprep.subr.bf16.mxu0 %v4932_v46 }
 0xa34   :  { %v1613_v50 = vpop.xlane.xlu1 %1612 }
 0xa35   :  { %v1620_v51 = vmul.f32 0.015625, %v1613_v50 }
 0xa37   :  { %v5613_v53 = vsub.f32 %v1608_v28, %v1620_v51 }
 0xa38   :  { %v1616_v60 = vpop.xlane.xlu0 %1615 }
 0xa39   :  { %v1621_v54 = vmul.f32 0.015625, %v1616_v60  ;;  %v1626_v44 = vmul.f32 %v5613_v53, %v5613_v53 }
 0xa3b   :  { %v5617_v31 = vsub.f32 %v1609_v38, %v1621_v54  ;;  %v1629_v59 = vsel %vm165_vm2, %v1626_v44, 0.0  ;;  %v1652_v38 = vsub.s32 6, %v5099_v42  ;;  %v3263_v42 = vld [vmem:[%s6473_s9 + $0x170] sm:$0xff] }
 0xa3c   :  { %1630 = vadd.xlane.f32.xlu0 %v1629_v59 }
 0xa3d   :  { %v1619_v52 = vpop.xlane.xlu1 %1618  ;;  %v1627_v35 = vmul.f32 %v5617_v31, %v5617_v31  ;;  %v1653_v47 = vrot.slane %v5570_v41, %v1652_v38 }
 0xa3e   :  { %v1622_v63 = vmul.f32 0.015625, %v1619_v52 }
 0xa3f   :  { %v1632_v0 = vsel %vm165_vm2, %v1627_v35, 0.0 }
 0xa40   :  { %v5623_v39 = vsub.f32 %v1610_v48, %v1622_v63  ;;  %1633 = vadd.xlane.f32.xlu1 %v1632_v0  ;;  %v3582_v0 = vld [vmem:[%s6471_s7 + $0x18] sm:$0xff] }
 0xa41   :  { %v1691_v5 = vrot.slane %v3582_v0, %v5102_v43 }
 0xa42   :  { %v1628_v1 = vmul.f32 %v5623_v39, %v5623_v39 }
 0xa44   :  { %v1635_v3 = vsel %vm1355_vm10, %v1628_v1, 0.0 }
 0xa45   :  { %1636 = vadd.xlane.f32.xlu0 %v1635_v3 }
 0xac9   :  { %v1631_v24 = vpop.xlane.xlu0 %1630 }
 0xaca   :  { %v1638_v26 = vmul.f32 0.015625, %v1631_v24 }
 0xacc   :  { %v1641_v28 = vadd.f32 1e-05, %v1638_v26 }
 0xacd   :  { %v1634_v29 = vpop.xlane.xlu1 %1633 }
 0xace   :  { %4835 = vrsqrt.f32 %v1641_v28  ;;  %v1639_v32 = vmul.f32 0.015625, %v1634_v29 }
 0xad0   :  { %v1642_v34 = vadd.f32 1e-05, %v1639_v32 }
 0xad2   :  { %4837 = vrsqrt.f32 %v1642_v34  ;;  %v1637_v33 = vpop.xlane.xlu0 %1636 }
 0xad3   :  { %v1640_v40 = vmul.f32 0.015625, %v1637_v33 }
 0xad5   :  { %v1643_v27 = vadd.f32 1e-05, %v1640_v40 }
 0xad7   :  { %4839 = vrsqrt.f32 %v1643_v27 }
 0xad8   :  { %v4836_v48 = vpop.eup %4835 }
 0xad9   :  { %v1647_v50 = vmul.f32 %v4836_v48, %v5613_v53 }
 0xadb   :  { %v1654_v51 = vmul.f32 %v1653_v47, %v1647_v50 }
 0xadc   :  { %v4838_v60 = vpop.eup %4837 }
 0xadd   :  { %v5686_v54 = vadd.f32 %v1660_v37, %v1654_v51  ;;  %v1648_v44 = vmul.f32 %v4838_v60, %v5617_v31  ;;  %v5707_v31 = vld [vmem:[%s6471_s7 + $0x10] sm:$0xff] }
 0xade   :  { %v1687_v1 = vrot.slane %v5707_v31, %v5102_v43 }
 0xadf   :  { %3599 = vmatmul.mubr.msk.f32.vlgmr.msra.gmra.mrb[42].mxu0 %vm165_vm2, %v5686_v54  ;;  %v1655_v59 = vmul.f32 %v1653_v47, %v1648_v44 }
 0xae0   :  { %1771 = vmatprep.mubr.f32.mxu0 %v4930_v2 }
 0xae1   :  { %v4840_v52 = vpop.eup %4839  ;;  %v5692_v35 = vadd.f32 %v1660_v37, %v1655_v59 }
 0xae2   :  { %v1649_v63 = vmul.f32 %v4840_v52, %v5623_v39 }
 0xae3   :  { %3600 = vmatmul.mubr.msk.f32.gmra.mrb[44].mxu0 %vm165_vm2, %v5692_v35 }
 0xae4   :  { %1777 = vmatprep.mubr.f32.mxu0 %v4930_v2  ;;  %v1656_v41 = vmul.f32 %v1653_v47, %v1649_v63  ;;  %v4902_v63 = vld [vmem:[%s6472_s8] sm:$0xff] }
 0xae6   :  { %v5698_v53 = vadd.f32 %v1660_v37, %v1656_v41 }
 0xae8   :  { %3601 = vmatmul.mubr.msk.f32.gmra.mrb[46].mxu0 %vm165_vm2, %v5698_v53 }
 0xae9   :  { %4178 = vmatprep.mubr.msk.f32.mxu0 %vm4931_vm1, %v4930_v2 }
 0xbb2   :  { %v1767_v39 = vpop.f32.mrb[42].mxu0 }
 0xbb3   :  { %v1769_v3 = vpop.f32.mrb[43].mxu0  ;;  %v1768_v61 = vadd.f32 %v1767_v39, %v1687_v1 }
 0xbb4   :  { %v1770_v49 = vadd.f32 %v1769_v3, %v1691_v5  ;;  %v4903_v3 = vld [vmem:[%s6472_s8 + $0x8] sm:$0xff] }
 0xbb6   :  { %v1773_v7 = vpop.f32.mrb[44].mxu0 }
 0xbb7   :  { %v1774_v9 = vadd.f32 %v1773_v7, %v1687_v1  ;;  %v1775_v56 = vpop.f32.mrb[45].mxu0 }
 0xbb8   :  { %v1776_v62 = vadd.f32 %v1775_v56, %v1691_v5  ;;  %v4904_v56 = vld [vmem:[%s6472_s8 + $0x10] sm:$0xf] }
 0xbb9   :  { %v4736_v10 = vpack.i.bf16 %v1774_v9, %v1768_v61 }
 0xbba   :  { %v4531_v55 = vpack.c.bf16 %v1776_v62, %v1770_v49  ;;  %v5715_v12 = vpack.i.bf16 %v1776_v62, %v1770_v49 }
 0xbbb   :  { %v1779_v14 = vpop.f32.mrb[46].mxu0  ;;  %4737 = vrot.lane.b32.xlu1 %v4736_v10, %s4934_s25 }
 0xbbc   :  { %v1780_v15 = vadd.f32 %v1779_v14, %v1687_v1  ;;  %v1781_v57 = vpop.f32.mrb[47].mxu0  ;;  %4532 = vmatpush3.bf16.msra.mxu1 %v4531_v55 }
 0xbbd   :  { %v5718_v16 = vadd.f32 %v1781_v57, %v1691_v5  ;;  %4191 = vmatprep.subr.mxu1 %v4930_v2 }
 0xbbe   :  { %1791 = vrot.lane.b32.xlu0 %v1780_v15, %s4934_s25 }
 0xbbf   :  { %4742 = vrot.lane.b32.xlu1 %v4736_v10, %s4933_s2 }
 0xbc0   :  { %4192 = vmatpush3.msk.msra.mxu1 %vm404_vm5, %v5718_v16 }
 0xbc1   :  { %4537 = vmatprep.subr.bf16.mxu1 %v4932_v46 }
 0xbc2   :  { %4747 = vrot.lane.b32.xlu0 %v4736_v10, %s4936_s27 }
 0xbc3   :  { %2020 = vrot.lane.b32.xlu1 %v1780_v15, %s4933_s2 }
 0xbc6   :  { %2012 = vrot.lane.b32.xlu0 %v1774_v9, %s4935_s26 }
 0xbc7   :  { %2010 = vrot.lane.b32.xlu1 %v1768_v61, %s4935_s26 }
 0xbca   :  { %2258 = vrot.lane.b32.xlu0 %v1780_v15, %s4936_s27 }
 0xbcb   :  { %2014 = vrot.lane.b32.xlu1 %v1780_v15, %s4935_s26 }
 0xbce   :  { %2248 = vrot.lane.b32.xlu0 %v1768_v61, %s4938_s29 }
 0xbcf   :  { %4752 = vrot.lane.b32.xlu1 %v4736_v10, %s4937_s28 }
 0xbd2   :  { %2252 = vrot.lane.b32.xlu0 %v1780_v15, %s4938_s29 }
 0xbd3   :  { %2250 = vrot.lane.b32.xlu1 %v1774_v9, %s4938_s29 }
 0xbd6   :  { %2484 = vrot.lane.b32.xlu0 %v1768_v61, %s4939_s30 }
 0xbd7   :  { %2494 = vrot.lane.b32.xlu1 %v1780_v15, %s4937_s28 }
 0xbda   :  { %2488 = vrot.lane.b32.xlu0 %v1780_v15, %s4939_s30 }
 0xbdb   :  { %2486 = vrot.lane.b32.xlu1 %v1774_v9, %s4939_s30 }
 0xc2d   :  { %v4738_v43 = vpop.permute.xlu1 %4737 }
 0xc2e   :  { %v4740_v19 = vunpack.i.h.bf16 %v4738_v43  ;;  %v4739_v20 = vunpack.i.l.bf16 %v4738_v43 }
 0xc30   :  { %v4527_v21 = vpack.c.bf16 %v4740_v19, %v4739_v20  ;;  %v1792_v22 = vpop.permute.xlu0 %1791 }
 0xc31   :  { %v4743_v4 = vpop.permute.xlu1 %4742 }
 0xc32   :  { %4529 = vmatpush3.bf16.xpose.msk.msra.mxu0 %vm5163_vm4, %v4527_v21  ;;  %v4745_v58 = vunpack.i.h.bf16 %v4743_v4  ;;  %v4744_v23 = vunpack.i.l.bf16 %v4743_v4 }
 0xc33   :  { %4176 = vmatprep.subr.mxu0 %v4930_v2 }
 0xc34   :  { %v4534_v13 = vpack.c.bf16 %v4745_v58, %v4744_v23  ;;  %v4748_v17 = vpop.permute.xlu0 %4747 }
 0xc35   :  { %v2021_v25 = vpop.permute.xlu1 %2020  ;;  %v4750_v26 = vunpack.i.h.bf16 %v4748_v17  ;;  %v4749_v28 = vunpack.i.l.bf16 %v4748_v17 }
 0xc37   :  { %v4541_v32 = vpack.c.bf16 %v4750_v26, %v4749_v28 }
 0xc38   :  { %v2013_v34 = vpop.permute.xlu0 %2012 }
 0xc39   :  { %v2011_v24 = vpop.permute.xlu1 %2010 }
 0xc3a   :  { %4177 = vmatpush3.xpose.msk.msra.mxu0 %vm267_vm3, %v1792_v22 }
 0xc3b   :  { %4533 = vmatprep.subr.bf16.mxu0 %v4932_v46 }
 0xc3c   :  { %v2259_v40 = vpop.permute.xlu0 %2258 }
 0xc3d   :  { %4179 = vmatmul.mubr.msk.f32.vlgmr.msra.gmra.mrb[48].mxu0 %vm267_vm3, %v1768_v61  ;;  %v2015_v29 = vpop.permute.xlu1 %2014 }
 0xc3e   :  { %4536 = vmatpush3.bf16.xpose.msk.msra.mxu0 %vm5163_vm4, %v4534_v13  ;;  %4181 = vmatprep.mubr.msk.f32.mxu0 %vm4931_vm1, %v4930_v2 }
 0xc3f   :  { %4206 = vmatprep.subr.mxu0 %v4930_v2 }
 0xc40   :  { %v2249_v48 = vpop.permute.xlu0 %2248 }
 0xc41   :  { %4182 = vmatmul.mubr.msk.f32.gmra.mrb[50].mxu0 %vm267_vm3, %v1774_v9  ;;  %v4753_v33 = vpop.permute.xlu1 %4752 }
 0xc42   :  { %4184 = vmatprep.mubr.msk.f32.mxu0 %vm4931_vm1, %v4930_v2  ;;  %v4755_v27 = vunpack.i.h.bf16 %v4753_v33  ;;  %v4754_v47 = vunpack.i.l.bf16 %v4753_v33 }
 0xc44   :  { %v4548_v37 = vpack.c.bf16 %v4755_v27, %v4754_v47  ;;  %v2253_v51 = vpop.permute.xlu0 %2252 }
 0xc45   :  { %4185 = vmatmul.mubr.msk.f32.gmra.mrb[52].mxu0 %vm267_vm3, %v1780_v15  ;;  %v2251_v50 = vpop.permute.xlu1 %2250 }
 0xc46   :  { %4207 = vmatpush3.xpose.msk.msra.mxu0 %vm267_vm3, %v2021_v25  ;;  %4208 = vmatprep.mubr.msk.f32.mxu0 %vm4931_vm1, %v4930_v2 }
 0xc47   :  { %4540 = vmatprep.subr.bf16.mxu0 %v4932_v46 }
 0xc48   :  { %v2485_v6 = vpop.permute.xlu0 %2484 }
 0xc49   :  { %4209 = vmatmul.mubr.msk.f32.vlgmr.msra.gmra.mrb[54].mxu0 %vm267_vm3, %v2011_v24  ;;  %v2495_v60 = vpop.permute.xlu1 %2494 }
 0xc4a   :  { %4543 = vmatpush3.bf16.xpose.msk.msra.mxu0 %vm5163_vm4, %v4541_v32  ;;  %4211 = vmatprep.mubr.msk.f32.mxu0 %vm4931_vm1, %v4930_v2 }
 0xc4b   :  { %4236 = vmatprep.subr.mxu0 %v4930_v2 }
 0xc4c   :  { %v2489_v59 = vpop.permute.xlu0 %2488 }
 0xc4d   :  { %4212 = vmatmul.mubr.msk.f32.gmra.mrb[56].mxu0 %vm267_vm3, %v2013_v34  ;;  %v2487_v44 = vpop.permute.xlu1 %2486 }
 0xc4e   :  { %4214 = vmatprep.mubr.msk.f32.mxu0 %vm4931_vm1, %v4930_v2 }
 0xc51   :  { %4215 = vmatmul.mubr.msk.f32.gmra.mrb[58].mxu0 %vm267_vm3, %v2015_v29 }
 0xc52   :  { %4237 = vmatpush3.xpose.msk.msra.mxu0 %vm267_vm3, %v2259_v40  ;;  %4238 = vmatprep.mubr.msk.f32.mxu0 %vm4931_vm1, %v4930_v2 }
 0xc53   :  { %4547 = vmatprep.subr.bf16.mxu0 %v4932_v46 }
 0xc55   :  { %4239 = vmatmul.mubr.msk.f32.vlgmr.msra.gmra.mrb[60].mxu0 %vm267_vm3, %v2249_v48 }
 0xc56   :  { %4550 = vmatpush3.bf16.xpose.msk.msra.mxu0 %vm5163_vm4, %v4548_v37  ;;  %4241 = vmatprep.mubr.msk.f32.mxu0 %vm4931_vm1, %v4930_v2 }
 0xc57   :  { %4266 = vmatprep.subr.mxu0 %v4930_v2 }
 0xc59   :  { %4242 = vmatmul.mubr.msk.f32.gmra.mrb[62].mxu0 %vm267_vm3, %v2251_v50 }
 0xc5a   :  { %4244 = vmatprep.mubr.msk.f32.mxu0 %vm4931_vm1, %v4930_v2 }
 0xc5d   :  { %4245 = vmatmul.mubr.msk.f32.gmra.mrb[64].mxu0 %vm267_vm3, %v2253_v51 }
 0xc5e   :  { %4267 = vmatpush3.xpose.msk.msra.mxu0 %vm267_vm3, %v2495_v60  ;;  %4268 = vmatprep.mubr.msk.f32.mxu0 %vm4931_vm1, %v4930_v2 }
 0xc5f   :  { %4554 = vmatprep.subr.bf16.mxu0 %v4932_v46 }
 0xc61   :  { %4269 = vmatmul.mubr.msk.f32.vlgmr.msra.gmra.mrb[66].mxu0 %vm267_vm3, %v2485_v6 }
 0xc62   :  { %4271 = vmatprep.mubr.msk.f32.mxu0 %vm4931_vm1, %v4930_v2 }
 0xc65   :  { %4272 = vmatmul.mubr.msk.f32.gmra.mrb[68].mxu0 %vm267_vm3, %v2487_v44 }
 0xc66   :  { %4274 = vmatprep.mubr.msk.f32.mxu0 %vm4931_vm1, %v4930_v2 }
 0xc69   :  { %4275 = vmatmul.mubr.msk.f32.gmra.mrb[70].mxu0 %vm267_vm3, %v2489_v59 }
 0xc6a   :  { %4308 = vmatprep.mubr.msk.f32.mxu0 %vm4931_vm1, %v4930_v2 }
 0xd10   :  { %v1871_v52 = vpop.f32.mrb[48].mxu0 }
 0xd11   :  { %v5799_v41 = vadd.f32 %v4902_v63, %v1871_v52  ;;  %v4180_v0 = vpop.f32.mrb[49].mxu0 }
 0xd13   :  { %v1885_v39 = vsel %vm360_vm6, %v5799_v41, -inf }
 0xd14   :  { %1886 = vmax.xlane.f32.xlu1 %v1885_v39  ;;  %v1876_v1 = vpop.f32.mrb[50].mxu0 }
 0xd15   :  { %v5806_v5 = vadd.f32 %v4903_v3, %v1876_v1  ;;  %v4183_v7 = vpop.f32.mrb[51].mxu0 }
 0xd17   :  { %v1888_v61 = vsel %vm360_vm6, %v5806_v5, -inf }
 0xd18   :  { %1889 = vmax.xlane.f32.xlu0 %v1888_v61  ;;  %v1881_v9 = vpop.f32.mrb[52].mxu0 }
 0xd19   :  { %v1882_v49 = vadd.f32 %v4904_v56, %v1881_v9  ;;  %v4186_v62 = vpop.f32.mrb[53].mxu0 }
 0xd1b   :  { %v1891_v10 = vsel %vm367_vm7, %v1882_v49, -inf }
 0xd1c   :  { %1892 = vmax.xlane.f32.xlu0 %v1891_v10  ;;  %v2100_v55 = vpop.f32.mrb[54].mxu0 }
 0xd1d   :  { %v2101_v14 = vadd.f32 %v4902_v63, %v2100_v55  ;;  %v4210_v15 = vpop.f32.mrb[55].mxu0 }
 0xd1f   :  { %v2114_v57 = vsel %vm360_vm6, %v2101_v14, -inf }
 0xd20   :  { %2115 = vmax.xlane.f32.xlu1 %v2114_v57  ;;  %v2105_v43 = vpop.f32.mrb[56].mxu0 }
 0xd21   :  { %v5815_v19 = vadd.f32 %v4903_v3, %v2105_v43  ;;  %v4213_v20 = vpop.f32.mrb[57].mxu0 }
 0xd23   :  { %v2117_v21 = vsel %vm360_vm6, %v5815_v19, -inf }
 0xd24   :  { %2118 = vmax.xlane.f32.xlu0 %v2117_v21  ;;  %v2110_v4 = vpop.f32.mrb[58].mxu0 }
 0xd25   :  { %v4216_v58 = vpop.f32.mrb[59].mxu0  ;;  %v2111_v40 = vadd.f32 %v4904_v56, %v2110_v4 }
 0xd27   :  { %v2120_v48 = vsel %vm367_vm7, %v2111_v40, -inf }
 0xd28   :  { %v2338_v23 = vpop.f32.mrb[60].mxu0 }
 0xd29   :  { %v4240_v22 = vpop.f32.mrb[61].mxu0  ;;  %v5823_v27 = vadd.f32 %v4902_v63, %v2338_v23 }
 0xd2b   :  { %v2352_v51 = vsel %vm360_vm6, %v5823_v27, -inf }
 0xd2c   :  { %v2343_v25 = vpop.f32.mrb[62].mxu0 }
 0xd2d   :  { %v4243_v13 = vpop.f32.mrb[63].mxu0  ;;  %v5825_v47 = vadd.f32 %v4903_v3, %v2343_v25 }
 0xd2f   :  { %v2355_v60 = vsel %vm360_vm6, %v5825_v47, -inf }
 0xd30   :  { %v2348_v17 = vpop.f32.mrb[64].mxu0 }
 0xd31   :  { %2153 = vrot.lane.b32.xlu1 %v5718_v16, %s4935_s26  ;;  %v4246_v24 = vpop.f32.mrb[65].mxu0  ;;  %v5828_v37 = vadd.f32 %v4904_v56, %v2348_v17 }
 0xd33   :  { %v2358_v59 = vsel %vm367_vm7, %v5828_v37, -inf }
 0xd34   :  { %v2574_v26 = vpop.f32.mrb[66].mxu0 }
 0xd35   :  { %v4270_v28 = vpop.f32.mrb[67].mxu0  ;;  %v5830_v50 = vadd.f32 %v4902_v63, %v2574_v26 }
 0xd37   :  { %v2588_v52 = vsel %vm360_vm6, %v5830_v50, -inf }
 0xd38   :  { %v2579_v29 = vpop.f32.mrb[68].mxu0 }
 0xd39   :  { %v4273_v32 = vpop.f32.mrb[69].mxu0  ;;  %v5836_v6 = vadd.f32 %v4903_v3, %v2579_v29 }
 0xd3a   :  { %4757 = vrot.lane.b32.xlu0 %v5715_v12, %s4935_s26 }
 0xd3b   :  { %v2591_v63 = vsel %vm360_vm6, %v5836_v6, -inf }
 0xd3c   :  { %v2584_v34 = vpop.f32.mrb[70].mxu0 }
 0xd3d   :  { %v4276_v33 = vpop.f32.mrb[71].mxu0  ;;  %v5838_v44 = vadd.f32 %v4904_v56, %v2584_v34 }
 0xd3f   :  { %v2594_v0 = vsel %vm367_vm7, %v5838_v44, -inf }
 0xd55   :  { %2121 = vmax.xlane.f32.xlu1 %v2120_v48 }
 0xd59   :  { %2353 = vmax.xlane.f32.xlu0 %v2352_v51  ;;  %2356 = vmax.xlane.f32.xlu1 %v2355_v60 }
 0xd5d   :  { %2359 = vmax.xlane.f32.xlu0 %v2358_v59  ;;  %2589 = vmax.xlane.f32.xlu1 %v2588_v52 }
 0xd61   :  { %2592 = vmax.xlane.f32.xlu0 %v2591_v63  ;;  %2595 = vmax.xlane.f32.xlu1 %v2594_v0 }
 0xd77   :  { %4762 = vrot.lane.b32.xlu0 %v5715_v12, %s4938_s29 }
 0xda1   :  { %v1887_v39 = vpop.xlane.xlu1 %1886 }
 0xda2   :  { %v1894_v1 = vsub.f32 %v5799_v41, %v1887_v39 }
 0xda4   :  { %v1897_v3 = vmul.f32 1.442695, %v1894_v1 }
 0xda5   :  { %v1890_v7 = vpop.xlane.xlu0 %1889 }
 0xda6   :  { %4841 = vpow2.f32 %v1897_v3  ;;  %v1895_v61 = vsub.f32 %v5806_v5, %v1890_v7 }
 0xda8   :  { %v1899_v9 = vmul.f32 1.442695, %v1895_v61 }
 0xda9   :  { %v1893_v56 = vpop.xlane.xlu0 %1892 }
 0xdaa   :  { %4843 = vpow2.f32 %v1899_v9  ;;  %v1896_v62 = vsub.f32 %v1882_v49, %v1893_v56 }
 0xdac   :  { %v1901_v10 = vmul.f32 1.442695, %v1896_v62 }
 0xdad   :  { %v2116_v55 = vpop.xlane.xlu1 %2115 }
 0xdae   :  { %4845 = vpow2.f32 %v1901_v10  ;;  %v2123_v15 = vsub.f32 %v2101_v14, %v2116_v55 }
 0xdb0   :  { %v5852_v57 = vpop.eup %4841  ;;  %v2126_v43 = vmul.f32 1.442695, %v2123_v15 }
 0xdb1   :  { %v2119_v20 = vpop.xlane.xlu0 %2118  ;;  %v1903_v41 = vsel %vm360_vm6, %v5852_v57, 0.0  ;;  %v5873_v13 = vpop.permute.xlu1 %2153 }
 0xdb2   :  { %4847 = vpow2.f32 %v2126_v43  ;;  %v2124_v21 = vsub.f32 %v5815_v19, %v2119_v20  ;;  %1904 = vadd.xlane.f32.xlu0 %v1903_v41 }
 0xdb4   :  { %v5857_v5 = vpop.eup %4843  ;;  %v2128_v4 = vmul.f32 1.442695, %v2124_v21 }
 0xdb5   :  { %v1906_v49 = vsel %vm360_vm6, %v5857_v5, 0.0  ;;  %v4758_v17 = vpop.permute.xlu0 %4757 }
 0xdb6   :  { %4849 = vpow2.f32 %v2128_v4  ;;  %1907 = vadd.xlane.f32.xlu1 %v1906_v49  ;;  %v4760_v21 = vunpack.i.h.bf16 %v4758_v17  ;;  %v4759_v4 = vunpack.i.l.bf16 %v4758_v17 }
 0xdb8   :  { %v5861_v14 = vpop.eup %4845 }
 0xdb9   :  { %v1909_v58 = vsel %vm367_vm7, %v5861_v14, 0.0 }
 0xdba   :  { %1910 = vadd.xlane.f32.xlu0 %v1909_v58 }
 0xdbc   :  { %v5865_v23 = vpop.eup %4847 }
 0xdbd   :  { %v2132_v19 = vsel %vm360_vm6, %v5865_v23, 0.0 }
 0xdbe   :  { %2133 = vadd.xlane.f32.xlu1 %v2132_v19 }
 0xdc0   :  { %v5869_v22 = vpop.eup %4849 }
 0xdc1   :  { %v2135_v25 = vsel %vm360_vm6, %v5869_v22, 0.0 }
 0xdc2   :  { %2136 = vadd.xlane.f32.xlu0 %v2135_v25  ;;  %v4538_v25 = vpack.c.bf16 %v4760_v21, %v4759_v4 }
 0xde2   :  { %v2122_v24 = vpop.xlane.xlu1 %2121 }
 0xde3   :  { %v2125_v26 = vsub.f32 %v2111_v40, %v2122_v24 }
 0xde5   :  { %v2130_v28 = vmul.f32 1.442695, %v2125_v26 }
 0xde6   :  { %v2354_v29 = vpop.xlane.xlu0 %2353 }
 0xde7   :  { %4851 = vpow2.f32 %v2130_v28  ;;  %v2361_v32 = vsub.f32 %v5823_v27, %v2354_v29  ;;  %v2357_v27 = vpop.xlane.xlu1 %2356 }
 0xde8   :  { %v2362_v59 = vsub.f32 %v5825_v47, %v2357_v27 }
 0xde9   :  { %v2364_v34 = vmul.f32 1.442695, %v2361_v32 }
 0xdea   :  { %v2360_v40 = vpop.xlane.xlu0 %2359  ;;  %v2366_v0 = vmul.f32 1.442695, %v2362_v59 }
 0xdeb   :  { %4853 = vpow2.f32 %v2364_v34  ;;  %v2363_v63 = vsub.f32 %v5828_v37, %v2360_v40  ;;  %v2590_v1 = vpop.xlane.xlu1 %2589 }
 0xdec   :  { %4855 = vpow2.f32 %v2366_v0  ;;  %v2597_v7 = vsub.f32 %v5830_v50, %v2590_v1 }
 0xded   :  { %v2368_v3 = vmul.f32 1.442695, %v2363_v63 }
 0xdee   :  { %v2593_v52 = vpop.xlane.xlu0 %2592 }
 0xdef   :  { %v2598_v39 = vsub.f32 %v5836_v6, %v2593_v52  ;;  %4857 = vpow2.f32 %v2368_v3  ;;  %v2596_v15 = vpop.xlane.xlu1 %2595 }
 0xdf1   :  { %v5876_v33 = vpop.eup %4851  ;;  %v2602_v61 = vmul.f32 1.442695, %v2598_v39 }
 0xdf2   :  { %v2138_v48 = vsel %vm367_vm7, %v5876_v33, 0.0  ;;  %v4763_v55 = vpop.permute.xlu0 %4762 }
 0xdf3   :  { %2139 = vadd.xlane.f32.xlu1 %v2138_v48  ;;  %4859 = vpow2.f32 %v2602_v61  ;;  %v4764_v32 = vunpack.i.l.bf16 %v4763_v55 }
 0xdf5   :  { %v5880_v51 = vpop.eup %4853 }
 0xdf6   :  { %v2370_v60 = vsel %vm360_vm6, %v5880_v51, 0.0  ;;  %v5892_v9 = vpop.eup %4855 }
 0xdf7   :  { %2371 = vadd.xlane.f32.xlu0 %v2370_v60  ;;  %v2373_v47 = vsel %vm360_vm6, %v5892_v9, 0.0 }
 0xdf9   :  { %v5894_v56 = vpop.eup %4857 }
 0xdfa   :  { %v2376_v50 = vsel %vm367_vm7, %v5894_v56, 0.0 }
 0xdfd   :  { %v5898_v37 = vpop.eup %4859 }
 0xdfe   :  { %v2609_v6 = vsel %vm360_vm6, %v5898_v37, 0.0 }
 0xe04   :  { %4767 = vrot.lane.b32.xlu1 %v5715_v12, %s4939_s30  ;;  %v2600_v12 = vmul.f32 1.442695, %v2597_v7 }
 0xe06   :  { %4861 = vpow2.f32 %v2600_v12 }
 0xe0d   :  { %2389 = vrot.lane.b32.xlu0 %v5718_v16, %s4938_s29 }
 0xe10   :  { %v5904_v62 = vpop.eup %4861 }
 0xe11   :  { %v2606_v10 = vsel %vm360_vm6, %v5904_v62, 0.0 }
 0xe28   :  { %2374 = vadd.xlane.f32.xlu1 %v2373_v47 }
 0xe2c   :  { %2610 = vadd.xlane.f32.xlu0 %v2609_v6  ;;  %2377 = vadd.xlane.f32.xlu1 %v2376_v50 }
 0xe30   :  { %2607 = vadd.xlane.f32.xlu1 %v2606_v10 }
 0xe3f   :  { %v1905_v43 = vpop.xlane.xlu0 %1904 }
 0xe40   :  { %4863 = vrcp.f32 %v1905_v43 }
 0xe41   :  { %2625 = vrot.lane.b32.xlu1 %v5718_v16, %s4939_s30  ;;  %v2599_v16 = vsub.f32 %v5838_v44, %v2596_v15  ;;  %v4765_v44 = vunpack.i.h.bf16 %v4763_v55 }
 0xe43   :  { %v1908_v20 = vpop.xlane.xlu1 %1907  ;;  %v2604_v28 = vmul.f32 1.442695, %v2599_v16 }
 0xe44   :  { %4865 = vrcp.f32 %v1908_v20 }
 0xe47   :  { %v1911_v41 = vpop.xlane.xlu0 %1910 }
 0xe48   :  { %4867 = vrcp.f32 %v1911_v41 }
 0xe4a   :  { %v4864_v49 = vpop.eup %4863 }
 0xe4b   :  { %v1913_v58 = vmul.f32 %v4864_v49, %v5852_v57  ;;  %v2134_v19 = vpop.xlane.xlu1 %2133 }
 0xe4c   :  { %4869 = vrcp.f32 %v2134_v19 }
 0xe4d   :  { %4194 = vmatmul.mubr.msk.f32.vlgmr.msra.gmra.mrb[36].mxu1 %vm360_vm6, %v1913_v58 }
 0xe4e   :  { %v4866_v24 = vpop.eup %4865  ;;  %4539 = vmatpush3.bf16.msra.mxu1 %v4538_v25  ;;  %4196 = vmatprep.mubr.msk.f32.mxu1 %vm4931_vm1, %v4930_v2 }
 0xe4f   :  { %v2137_v26 = vpop.xlane.xlu0 %2136  ;;  %4221 = vmatprep.subr.mxu1 %v4930_v2  ;;  %v1915_v17 = vmul.f32 %v4866_v24, %v5857_v5 }
 0xe50   :  { %4871 = vrcp.f32 %v2137_v26 }
 0xe51   :  { %4197 = vmatmul.mubr.msk.f32.gmra.mrb[38].mxu1 %vm360_vm6, %v1915_v17  ;;  %4873 = vpow2.f32 %v2604_v28  ;;  %v3642_v17 = vld [vmem:[%s6468_s4 + $0x40] sm:$0xff]  ;;  %v3644_v28 = vld [vmem:[%s6468_s4 + $0x50] sm:$0xff] }
 0xe52   :  { %v4868_v57 = vpop.eup %4867  ;;  %4222 = vmatpush3.msk.msra.mxu1 %vm404_vm5, %v5873_v13  ;;  %4199 = vmatprep.mubr.msk.f32.mxu1 %vm4931_vm1, %v4930_v2  ;;  %v4545_v13 = vpack.c.bf16 %v4765_v44, %v4764_v32  ;;  %v3645_v44 = vld [vmem:[%s6468_s4 + $0x58] sm:$0xff] }
 0xe53   :  { %v1917_v29 = vmul.f32 %v4868_v57, %v5861_v14  ;;  %4544 = vmatprep.subr.bf16.mxu1 %v4932_v46  ;;  %v3643_v57 = vld [vmem:[%s6468_s4 + $0x48] sm:$0xff]  ;;  %v4558_v32 = vpack.c.bf16 %v3645_v44, %v3644_v28 }
 0xe55   :  { %4200 = vmatmul.mubr.msk.f32.gmra.mrb[40].mxu1 %vm360_vm6, %v1917_v29  ;;  %v4555_v29 = vpack.c.bf16 %v3643_v57, %v3642_v17 }
 0xe56   :  { %v4870_v5 = vpop.eup %4869  ;;  %4223 = vmatprep.mubr.msk.f32.mxu1 %vm4931_vm1, %v4930_v2 }
 0xe57   :  { %v2142_v34 = vmul.f32 %v4870_v5, %v5865_v23  ;;  %4556 = vmatpush3.bf16.msra.mxu0 %v4555_v29 }
 0xe58   :  { %4557 = vmatprep.subr.bf16.mxu0 %v4932_v46 }
 0xe59   :  { %4224 = vmatmul.mubr.msk.f32.vlgmr.msra.gmra.mrb[42].mxu1 %vm360_vm6, %v2142_v34 }
 0xe5a   :  { %v4872_v48 = vpop.eup %4871  ;;  %4546 = vmatpush3.bf16.msra.mxu1 %v4545_v13  ;;  %4226 = vmatprep.mubr.msk.f32.mxu1 %vm4931_vm1, %v4930_v2 }
 0xe5b   :  { %v2144_v14 = vmul.f32 %v4872_v48, %v5869_v22  ;;  %4251 = vmatprep.subr.mxu1 %v4930_v2  ;;  %v4874_v60 = vpop.eup %4873  ;;  %4559 = vmatpush3.bf16.msra.mxu0 %v4558_v32 }
 0xe5c   :  { %v2612_v23 = vsel %vm367_vm7, %v4874_v60, 0.0  ;;  %4560 = vmatprep.subr.bf16.mxu0 %v4932_v46 }
 0xe5d   :  { %4227 = vmatmul.mubr.msk.f32.gmra.mrb[44].mxu1 %vm360_vm6, %v2144_v14  ;;  %v3646_v14 = vld [vmem:[%s6468_s4 + $0x60] sm:$0xff] }
 0xe5e   :  { %4229 = vmatprep.mubr.msk.f32.mxu1 %vm4931_vm1, %v4930_v2 }
 0xe65   :  { %2613 = vadd.xlane.f32.xlu1 %v2612_v23 }
 0xe80   :  { %v2140_v40 = vpop.xlane.xlu1 %2139 }
 0xe81   :  { %4875 = vrcp.f32 %v2140_v40  ;;  %v3648_v40 = vld [vmem:[%s6468_s4 + $0x70] sm:$0xff] }
 0xe84   :  { %v2372_v27 = vpop.xlane.xlu0 %2371  ;;  %v4768_v52 = vpop.permute.xlu1 %4767 }
 0xe85   :  { %4877 = vrcp.f32 %v2372_v27  ;;  %v4770_v0 = vunpack.i.h.bf16 %v4768_v52  ;;  %v4769_v39 = vunpack.i.l.bf16 %v4768_v52  ;;  %v3649_v27 = vld [vmem:[%s6468_s4 + $0x78] sm:$0xff] }
 0xe87   :  { %v4552_v7 = vpack.c.bf16 %v4770_v0, %v4769_v39 }
 0xe88   :  { %v2390_v59 = vpop.permute.xlu0 %2389 }
 0xe89   :  { %4252 = vmatpush3.msk.msra.mxu1 %vm404_vm5, %v2390_v59  ;;  %v4564_v59 = vpack.c.bf16 %v3649_v27, %v3648_v40 }
 0xe8a   :  { %4551 = vmatprep.subr.bf16.mxu1 %v4932_v46 }
 0xe8b   :  { %v4876_v22 = vpop.eup %4875 }
 0xe8c   :  { %v2146_v63 = vmul.f32 %v4876_v22, %v5876_v33 }
 0xe8e   :  { %4230 = vmatmul.mubr.msk.f32.gmra.mrb[46].mxu1 %vm360_vm6, %v2146_v63 }
 0xe8f   :  { %v4878_v1 = vpop.eup %4877  ;;  %4253 = vmatprep.mubr.msk.f32.mxu1 %vm4931_vm1, %v4930_v2 }
 0xe90   :  { %v2380_v3 = vmul.f32 %v4878_v1, %v5880_v51 }
 0xe92   :  { %4254 = vmatmul.mubr.msk.f32.vlgmr.msra.gmra.mrb[48].mxu1 %vm360_vm6, %v2380_v3 }
 0xe93   :  { %4553 = vmatpush3.bf16.msra.mxu1 %v4552_v7  ;;  %4256 = vmatprep.mubr.msk.f32.mxu1 %vm4931_vm1, %v4930_v2 }
 0xe94   :  { %4281 = vmatprep.subr.mxu1 %v4930_v2 }
 0xeb5   :  { %v2375_v33 = vpop.xlane.xlu1 %2374 }
 0xeb6   :  { %4879 = vrcp.f32 %v2375_v33 }
 0xeb9   :  { %v2378_v61 = vpop.xlane.xlu1 %2377  ;;  %v2611_v47 = vpop.xlane.xlu0 %2610 }
 0xeba   :  { %4881 = vrcp.f32 %v2378_v61 }
 0xebd   :  { %v2608_v12 = vpop.xlane.xlu1 %2607 }
 0xebe   :  { %4883 = vrcp.f32 %v2608_v12 }
 0xebf   :  { %4885 = vrcp.f32 %v2611_v47 }
 0xec0   :  { %v4880_v6 = vpop.eup %4879 }
 0xec1   :  { %v2626_v50 = vpop.permute.xlu1 %2625  ;;  %v2382_v51 = vmul.f32 %v4880_v6, %v5892_v9 }
 0xec2   :  { %4282 = vmatpush3.msk.msra.mxu1 %vm404_vm5, %v2626_v50 }
 0xec3   :  { %4257 = vmatmul.mubr.msk.f32.gmra.mrb[50].mxu1 %vm360_vm6, %v2382_v51  ;;  %4566 = vmatprep.subr.bf16.mxu1 %v4932_v46 }
 0xec4   :  { %4259 = vmatprep.mubr.msk.f32.mxu1 %vm4931_vm1, %v4930_v2  ;;  %v4882_v10 = vpop.eup %4881 }
 0xec5   :  { %v2384_v55 = vmul.f32 %v4882_v10, %v5894_v56 }
 0xec7   :  { %4260 = vmatmul.mubr.msk.f32.gmra.mrb[52].mxu1 %vm360_vm6, %v2384_v55 }
 0xec8   :  { %v4884_v15 = vpop.eup %4883  ;;  %4283 = vmatprep.mubr.msk.f32.mxu1 %vm4931_vm1, %v4930_v2 }
 0xec9   :  { %v2616_v43 = vmul.f32 %v4884_v15, %v5904_v62  ;;  %v4886_v9 = vpop.eup %4885 }
 0xeca   :  { %v2618_v20 = vmul.f32 %v4886_v9, %v5898_v37 }
 0xecb   :  { %4284 = vmatmul.mubr.msk.f32.vlgmr.msra.gmra.mrb[54].mxu1 %vm360_vm6, %v2616_v43 }
 0xecc   :  { %4286 = vmatprep.mubr.msk.f32.mxu1 %vm4931_vm1, %v4930_v2 }
 0xecf   :  { %4287 = vmatmul.mubr.msk.f32.gmra.mrb[56].mxu1 %vm360_vm6, %v2618_v20 }
 0xed0   :  { %4289 = vmatprep.mubr.msk.f32.mxu1 %vm4931_vm1, %v4930_v2 }
 0xef2   :  { %v2614_v56 = vpop.xlane.xlu1 %2613 }
 0xef3   :  { %4887 = vrcp.f32 %v2614_v56 }
 0xefd   :  { %v4888_v41 = vpop.eup %4887 }
 0xefe   :  { %v2620_v62 = vmul.f32 %v4888_v41, %v4874_v60  ;;  %v3647_v60 = vld [vmem:[%s6468_s4 + $0x68] sm:$0xff] }
 0xeff   :  { %v4561_v23 = vpack.c.bf16 %v3647_v60, %v3646_v14 }
 0xf00   :  { %4290 = vmatmul.mubr.msk.f32.gmra.mrb[58].mxu1 %vm360_vm6, %v2620_v62 }
 0xf01   :  { %4333 = vmatprep.mubr.msk.f32.mxu1 %vm4931_vm1, %v4930_v2  ;;  %4562 = vmatpush3.bf16.msra.mxu0 %v4561_v23 }
 0xf02   :  { %4563 = vmatprep.subr.bf16.mxu0 %v4932_v46 }
 0xf05   :  { %4565 = vmatpush3.bf16.msra.mxu0 %v4564_v59  ;;  %v3653_v59 = vld [vmem:[%s6469_s5 + $0x40] sm:$0xff] }
 0xf06   :  { %4578 = vmatprep.subr.bf16.mxu0 %v4932_v46 }
 0xf20   :  { %v1996_v21 = vpop.f32.mrb[36].mxu1 }
 0xf21   :  { %v4195_v4 = vpop.f32.mrb[37].mxu1 }
 0xf24   :  { %v2001_v49 = vpop.f32.mrb[38].mxu1 }
 0xf25   :  { %v4198_v58 = vpop.f32.mrb[39].mxu1 }
 0xf28   :  { %v5969_v19 = vpop.f32.mrb[40].mxu1 }
 0xf29   :  { %v4201_v37 = vpop.f32.mrb[41].mxu1 }
 0xf2a   :  { %v2777_v37 = vrot.slane %v5707_v31, %v1255_v30 }
 0xf2c   :  { %v2234_v25 = vpop.f32.mrb[42].mxu1 }
 0xf2d   :  { %2723 = vrot.lane.b32.xlu0 %v2234_v25, %s4937_s28  ;;  %v4225_v24 = vpop.f32.mrb[43].mxu1 }
 0xf30   :  { %v2239_v16 = vpop.f32.mrb[44].mxu1 }
 0xf31   :  { %v4228_v26 = vpop.f32.mrb[45].mxu1 }
 0xf61   :  { %v2244_v5 = vpop.f32.mrb[46].mxu1 }
 0xf62   :  { %v4231_v34 = vpop.f32.mrb[47].mxu1 }
 0xf65   :  { %v2470_v13 = vpop.f32.mrb[48].mxu1 }
 0xf66   :  { %2735 = vrot.lane.b32.xlu1 %v2470_v13, %s4936_s27  ;;  %v4255_v48 = vpop.f32.mrb[49].mxu1 }
 0xf96   :  { %v2475_v52 = vpop.f32.mrb[50].mxu1 }
 0xf97   :  { %2737 = vrot.lane.b32.xlu1 %v2475_v52, %s4936_s27  ;;  %v4258_v22 = vpop.f32.mrb[51].mxu1  ;;  %v3654_v52 = vld [vmem:[%s6469_s5 + $0x48] sm:$0xff] }
 0xf98   :  { %v4567_v22 = vpack.c.bf16 %v3654_v52, %v3653_v59 }
 0xf9a   :  { %v2480_v63 = vpop.f32.mrb[52].mxu1  ;;  %4568 = vmatpush3.bf16.msra.mxu1 %v4567_v22 }
 0xf9b   :  { %2727 = vrot.lane.b32.xlu1 %v2244_v5, %s4937_s28  ;;  %v4261_v0 = vpop.f32.mrb[53].mxu1  ;;  %4569 = vmatprep.subr.bf16.mxu1 %v4932_v46 }
 0xf9c   :  { %v3656_v0 = vld [vmem:[%s6469_s5 + $0x58] sm:$0xff] }
 0xf9e   :  { %v2706_v39 = vpop.f32.mrb[54].mxu1 }
 0xf9f   :  { %2747 = vrot.lane.b32.xlu0 %v2706_v39, %s4933_s2  ;;  %v4285_v1 = vpop.f32.mrb[55].mxu1  ;;  %v2724_v12 = vpop.permute.xlu0 %2723 }
 0xfa0   :  { %v2756_v6 = vsel %vm267_vm3, %v1996_v21, %v2724_v12  ;;  %v3657_v1 = vld [vmem:[%s6469_s5 + $0x60] sm:$0xff] }
 0xfa2   :  { %v2711_v3 = vpop.f32.mrb[56].mxu1 }
 0xfa3   :  { %2725 = vrot.lane.b32.xlu0 %v2239_v16, %s4937_s28  ;;  %v4288_v7 = vpop.f32.mrb[57].mxu1 }
 0xfa7   :  { %2749 = vrot.lane.b32.xlu0 %v2711_v3, %s4933_s2  ;;  %v3658_v3 = vld [vmem:[%s6469_s5 + $0x68] sm:$0xff] }
 0xfa8   :  { %v4573_v7 = vpack.c.bf16 %v3658_v3, %v3657_v1  ;;  %v3679_v1 = vld [vmem:[%s6470_s6 + $0xf8] sm:$0xff] }
 0xfab   :  { %2739 = vrot.lane.b32.xlu0 %v2480_v63, %s4936_s27  ;;  %v3655_v63 = vld [vmem:[%s6469_s5 + $0x50] sm:$0xff] }
 0xfac   :  { %v4570_v39 = vpack.c.bf16 %v3656_v0, %v3655_v63 }
 0xfae   :  { %4571 = vmatpush3.bf16.msra.mxu1 %v4570_v39 }
 0xfaf   :  { %4572 = vmatprep.subr.bf16.mxu1 %v4932_v46 }
 0xfb2   :  { %4574 = vmatpush3.bf16.msra.mxu1 %v4573_v7 }
 0xfb3   :  { %4575 = vmatprep.subr.bf16.mxu1 %v4932_v46 }
 0xfd3   :  { %v2716_v33 = vpop.f32.mrb[58].mxu1 }
 0xfd4   :  { %2751 = vrot.lane.b32.xlu1 %v2716_v33, %s4933_s2  ;;  %v4291_v61 = vpop.f32.mrb[59].mxu1  ;;  %v3659_v33 = vld [vmem:[%s6469_s5 + $0x70] sm:$0xff] }
 0xfd5   :  { %v3660_v61 = vld [vmem:[%s6469_s5 + $0x78] sm:$0xff] }
 0xfd6   :  { %v4576_v12 = vpack.c.bf16 %v3660_v61, %v3659_v33 }
 0xfd8   :  { %v2736_v47 = vpop.permute.xlu1 %2735  ;;  %4577 = vmatpush3.bf16.msra.mxu1 %v4576_v12 }
 0xfd9   :  { %v2759_v50 = vsel %vm1237_vm8, %v2756_v6, %v2736_v47 }
0x1009   :  { %v2738_v43 = vpop.permute.xlu1 %2737 }
0x100d   :  { %v2728_v41 = vpop.permute.xlu1 %2727 }
0x100e   :  { %v2758_v21 = vsel %vm267_vm3, %v5969_v19, %v2728_v41  ;;  %v3668_v41 = vld [vmem:[%s6470_s6 + $0xa0] sm:$0xff] }
0x1011   :  { %v2748_v51 = vpop.permute.xlu0 %2747 }
0x1012   :  { %v2762_v10 = vsel %vm1241_vm9, %v2759_v50, %v2748_v51 }
0x1013   :  { %4309 = vmatmul.mubr.msk.f32.vlgmr.msra.gmra.mrb[72].mxu0 %vm165_vm2, %v2762_v10 }
0x1014   :  { %4311 = vmatprep.mubr.msk.f32.mxu0 %vm4931_vm1, %v4930_v2 }
0x1015   :  { %v2726_v55 = vpop.permute.xlu0 %2725 }
0x1016   :  { %v2757_v15 = vsel %vm267_vm3, %v2001_v49, %v2726_v55  ;;  %v3664_v55 = vld [vmem:[%s6470_s6 + $0x80] sm:$0xff] }
0x1017   :  { %v2760_v9 = vsel %vm1237_vm8, %v2757_v15, %v2738_v43  ;;  %v3665_v15 = vld [vmem:[%s6470_s6 + $0x88] sm:$0xff]  ;;  %v3666_v43 = vld [vmem:[%s6470_s6 + $0x90] sm:$0xff] }
0x1019   :  { %v2750_v20 = vpop.permute.xlu0 %2749 }
0x101a   :  { %v2763_v56 = vsel %vm1241_vm9, %v2760_v9, %v2750_v20  ;;  %v4579_v9 = vpack.c.bf16 %v3665_v15, %v3664_v55  ;;  %v3667_v20 = vld [vmem:[%s6470_s6 + $0x98] sm:$0xff] }
0x101b   :  { %4312 = vmatmul.mubr.msk.f32.gmra.mrb[74].mxu0 %vm165_vm2, %v2763_v56  ;;  %v4582_v56 = vpack.c.bf16 %v3667_v20, %v3666_v43 }
0x101c   :  { %4314 = vmatprep.mubr.msk.f32.mxu0 %vm4931_vm1, %v4930_v2  ;;  %4580 = vmatpush3.bf16.msra.mxu0 %v4579_v9 }
0x101d   :  { %v2740_v62 = vpop.permute.xlu0 %2739  ;;  %4581 = vmatprep.subr.bf16.mxu0 %v4932_v46 }
0x101e   :  { %v2761_v4 = vsel %vm1237_vm8, %v2758_v21, %v2740_v62  ;;  %v3669_v62 = vld [vmem:[%s6470_s6 + $0xa8] sm:$0xff] }
0x101f   :  { %v4585_v21 = vpack.c.bf16 %v3669_v62, %v3668_v41 }
0x1020   :  { %4583 = vmatpush3.bf16.msra.mxu0 %v4582_v56 }
0x1021   :  { %4584 = vmatprep.subr.bf16.mxu0 %v4932_v46 }
0x1024   :  { %4586 = vmatpush3.bf16.msra.mxu0 %v4585_v21 }
0x1025   :  { %4587 = vmatprep.subr.bf16.mxu0 %v4932_v46 }
0x1046   :  { %v2752_v58 = vpop.permute.xlu1 %2751 }
0x1047   :  { %v2764_v49 = vsel %vm1241_vm9, %v2761_v4, %v2752_v58  ;;  %v3670_v4 = vld [vmem:[%s6470_s6 + $0xb0] sm:$0xff]  ;;  %v3671_v58 = vld [vmem:[%s6470_s6 + $0xb8] sm:$0xff] }
0x1048   :  { %4315 = vmatmul.mubr.msk.f32.gmra.mrb[76].mxu0 %vm165_vm2, %v2764_v49  ;;  %v4588_v49 = vpack.c.bf16 %v3671_v58, %v3670_v4 }
0x1049   :  { %4374 = vmatprep.mubr.msk.f32.mxu0 %vm4931_vm1, %v4930_v2 }
0x104a   :  { %4589 = vmatpush3.bf16.msra.mxu0 %v4588_v49 }
0x104b   :  { %4590 = vmatprep.subr.bf16.mxu0 %v4932_v46 }
0x10e6   :  { %v2853_v25 = vpop.f32.mrb[72].mxu0 }
0x10e7   :  { %v2854_v24 = vadd.f32 %v2853_v25, %v2777_v37  ;;  %v4310_v16 = vpop.f32.mrb[73].mxu0  ;;  %v3673_v25 = vld [vmem:[%s6470_s6 + $0xc8] sm:$0xff] }
0x10e8   :  { %v3674_v16 = vld [vmem:[%s6470_s6 + $0xd0] sm:$0xff] }
0x10e9   :  { %v2867_v26 = vadd.f32 %v2854_v24, %v5686_v54 }
0x10eb   :  { %v2870_v19 = vsel %vm165_vm2, %v2867_v26, 0.0 }
0x10ec   :  { %2871 = vadd.xlane.f32.xlu0 %v2870_v19 }
0x10ee   :  { %v2858_v17 = vpop.f32.mrb[74].mxu0 }
0x10ef   :  { %v2859_v57 = vadd.f32 %v2858_v17, %v2777_v37  ;;  %v4313_v28 = vpop.f32.mrb[75].mxu0  ;;  %v3676_v17 = vld [vmem:[%s6470_s6 + $0xe0] sm:$0xff] }
0x10f1   :  { %v2868_v29 = vadd.f32 %v2859_v57, %v5692_v35  ;;  %v3677_v57 = vld [vmem:[%s6470_s6 + $0xe8] sm:$0xff] }
0x10f2   :  { %v4597_v28 = vpack.c.bf16 %v3677_v57, %v3676_v17 }
0x10f3   :  { %v2873_v44 = vsel %vm165_vm2, %v2868_v29, 0.0 }
0x10f4   :  { %2874 = vadd.xlane.f32.xlu1 %v2873_v44 }
0x111b   :  { %v2863_v32 = vpop.f32.mrb[76].mxu0 }
0x111c   :  { %v2864_v5 = vadd.f32 %v2863_v32, %v2777_v37  ;;  %v4316_v34 = vpop.f32.mrb[77].mxu0  ;;  %v3672_v37 = vld [vmem:[%s6470_s6 + $0xc0] sm:$0xff] }
0x111d   :  { %v4591_v24 = vpack.c.bf16 %v3673_v25, %v3672_v37 }
0x111e   :  { %v2869_v30 = vadd.f32 %v2864_v5, %v5698_v53 }
0x111f   :  { %4592 = vmatpush3.bf16.msra.mxu0 %v4591_v24 }
0x1120   :  { %v2876_v31 = vsel %vm1355_vm10, %v2869_v30, 0.0  ;;  %4593 = vmatprep.subr.bf16.mxu0 %v4932_v46 }
0x1121   :  { %2877 = vadd.xlane.f32.xlu0 %v2876_v31  ;;  %v6130_v31 = vld [vmem:[%s6471_s7 + $0x10] sm:$0xff] }
0x1122   :  { %v2935_v7 = vrot.slane %v6130_v31, %v1414_v11  ;;  %v3048_v9 = vrot.slane %v6130_v31, %v1526_v8 }
0x1179   :  { %v2872_v54 = vpop.xlane.xlu0 %2871 }
0x117a   :  { %v2879_v13 = vmul.f32 0.015625, %v2872_v54  ;;  %v2912_v54 = vrot.slane %v6130_v31, %v1392_v18 }
0x117c   :  { %v6036_v48 = vsub.f32 %v2867_v26, %v2879_v13  ;;  %v3675_v26 = vld [vmem:[%s6470_s6 + $0xd8] sm:$0xff] }
0x117d   :  { %v4594_v19 = vpack.c.bf16 %v3675_v26, %v3674_v16 }
0x117e   :  { %v2885_v14 = vmul.f32 %v6036_v48, %v6036_v48 }
0x117f   :  { %4595 = vmatpush3.bf16.msra.mxu0 %v4594_v19 }
0x1180   :  { %v2888_v35 = vsel %vm165_vm2, %v2885_v14, 0.0  ;;  %4596 = vmatprep.subr.bf16.mxu0 %v4932_v46  ;;  %v2919_v14 = vrot.slane %v6130_v31, %v1399_v36 }
0x1181   :  { %v2875_v60 = vpop.xlane.xlu1 %2874  ;;  %2889 = vadd.xlane.f32.xlu0 %v2888_v35 }
0x1182   :  { %v2880_v23 = vmul.f32 0.015625, %v2875_v60 }
0x1183   :  { %4598 = vmatpush3.bf16.msra.mxu0 %v4597_v28 }
0x1184   :  { %v6041_v40 = vsub.f32 %v2868_v29, %v2880_v23  ;;  %4599 = vmatprep.subr.bf16.mxu0 %v4932_v46 }
0x1186   :  { %v2886_v53 = vmul.f32 %v6041_v40, %v6041_v40 }
0x1188   :  { %v2891_v27 = vsel %vm165_vm2, %v2886_v53, 0.0 }
0x1189   :  { %2892 = vadd.xlane.f32.xlu1 %v2891_v27 }
0x11ae   :  { %v2878_v47 = vpop.xlane.xlu0 %2877 }
0x11af   :  { %v2881_v6 = vmul.f32 0.015625, %v2878_v47 }
0x11b1   :  { %v6073_v50 = vsub.f32 %v2869_v30, %v2881_v6 }
0x11b3   :  { %v2887_v51 = vmul.f32 %v6073_v50, %v6073_v50 }
0x11b5   :  { %v2894_v10 = vsel %vm1355_vm10, %v2887_v51, 0.0 }
0x11b6   :  { %2895 = vadd.xlane.f32.xlu0 %v2894_v10 }
0x120e   :  { %v2890_v29 = vpop.xlane.xlu0 %2889 }
0x120f   :  { %v2897_v44 = vmul.f32 0.015625, %v2890_v29 }
0x1211   :  { %v2900_v32 = vadd.f32 1e-05, %v2897_v44 }
0x1213   :  { %4889 = vrsqrt.f32 %v2900_v32 }
0x1216   :  { %v2893_v5 = vpop.xlane.xlu1 %2892 }
0x1217   :  { %v2898_v34 = vmul.f32 0.015625, %v2893_v5 }
0x1219   :  { %v2901_v30 = vadd.f32 1e-05, %v2898_v34 }
0x121b   :  { %4891 = vrsqrt.f32 %v2901_v30 }
0x121d   :  { %v4890_v13 = vpop.eup %4889 }
0x121e   :  { %v2906_v35 = vmul.f32 %v4890_v13, %v6036_v48 }
0x1220   :  { %v2913_v60 = vmul.f32 %v2912_v54, %v2906_v35 }
0x1222   :  { %v2920_v23 = vadd.f32 %v2919_v14, %v2913_v60 }
0x1224   :  { %4334 = vmatmul.mubr.msk.f32.vlgmr.msra.gmra.mrb[60].mxu1 %vm165_vm2, %v2920_v23 }
0x1225   :  { %v4892_v53 = vpop.eup %4891  ;;  %4336 = vmatprep.mubr.msk.f32.mxu1 %vm4931_vm1, %v4930_v2 }
0x1226   :  { %v2907_v27 = vmul.f32 %v4892_v53, %v6041_v40  ;;  %v3678_v40 = vld [vmem:[%s6470_s6 + $0xf0] sm:$0xff]  ;;  %v3233_v53 = vld [vmem:[%s6473_s9 + $0x80] sm:$0xff] }
0x1227   :  { %v4600_v3 = vpack.c.bf16 %v3679_v1, %v3678_v40  ;;  %v3237_v40 = vld [vmem:[%s6473_s9 + $0xa0] sm:$0xff]  ;;  %v3238_v1 = vld [vmem:[%s6473_s9 + $0xa8] sm:$0xff] }
0x1228   :  { %v2914_v59 = vmul.f32 %v2912_v54, %v2907_v27  ;;  %v3234_v27 = vld [vmem:[%s6473_s9 + $0x88] sm:$0xff] }
0x1229   :  { %4601 = vmatpush3.bf16.msra.mxu0 %v4600_v3  ;;  %v3265_v3 = vld [vmem:[%s6473_s9 + $0x180] sm:$0xff] }
0x122a   :  { %v2921_v52 = vadd.f32 %v2919_v14, %v2914_v59  ;;  %v3217_v59 = vld [vmem:[%s6473_s9] sm:$0xff] }
0x122c   :  { %4337 = vmatmul.mubr.msk.f32.gmra.mrb[62].mxu1 %vm165_vm2, %v2921_v52 }
0x122d   :  { %4339 = vmatprep.mubr.msk.f32.mxu1 %vm4931_vm1, %v4930_v2 }
0x1243   :  { %v2896_v18 = vpop.xlane.xlu0 %2895 }
0x1244   :  { %v2899_v36 = vmul.f32 0.015625, %v2896_v18  ;;  %v3218_v18 = vld [vmem:[%s6473_s9 + $0x8] sm:$0xff] }
0x1246   :  { %v2902_v48 = vadd.f32 1e-05, %v2899_v36  ;;  %v3235_v36 = vld [vmem:[%s6473_s9 + $0x90] sm:$0xff] }
0x1248   :  { %4893 = vrsqrt.f32 %v2902_v48  ;;  %v3236_v48 = vld [vmem:[%s6473_s9 + $0x98] sm:$0xff] }
0x1252   :  { %v4894_v22 = vpop.eup %4893 }
0x1253   :  { %v2908_v63 = vmul.f32 %v4894_v22, %v6073_v50  ;;  %v4604_v22 = vpack.c.bf16 %v3218_v18, %v3217_v59  ;;  %v3227_v59 = vld [vmem:[%s6473_s9 + $0x50] sm:$0xff] }
0x1255   :  { %v2915_v0 = vmul.f32 %v2912_v54, %v2908_v63  ;;  %v4606_v63 = vpack.c.bf16 %v3236_v48, %v3235_v36  ;;  %v3228_v36 = vld [vmem:[%s6473_s9 + $0x58] sm:$0xff] }
0x1257   :  { %v2922_v39 = vadd.f32 %v2919_v14, %v2915_v0  ;;  %v3219_v0 = vld [vmem:[%s6473_s9 + $0x10] sm:$0xff] }
0x1259   :  { %4340 = vmatmul.mubr.msk.f32.gmra.mrb[64].mxu1 %vm165_vm2, %v2922_v39 }
0x12f7   :  { %v3011_v33 = vpop.f32.mrb[60].mxu1 }
0x12f8   :  { %v3012_v61 = vadd.f32 %v3011_v33, %v2935_v7  ;;  %v4335_v12 = vpop.f32.mrb[61].mxu1 }
0x12f9   :  { %v3221_v12 = vld [vmem:[%s6473_s9 + $0x20] sm:$0xff] }
0x12fa   :  { %v3025_v47 = vmax.f32 %v3012_v61, 0.0 }
0x12fc   :  { %4375 = vmatmul.mubr.f32.vlgmr.msra.gmra.mrb[78].mxu0 %v3025_v47  ;;  %v3249_v47 = vld [vmem:[%s6473_s9 + $0x100] sm:$0xff] }
0x12fd   :  { %4377 = vmatprep.mubr.msk.f32.mxu0 %vm4931_vm1, %v4930_v2 }
0x12ff   :  { %v3016_v6 = vpop.f32.mrb[62].mxu1 }
0x1300   :  { %v3017_v50 = vadd.f32 %v3016_v6, %v2935_v7  ;;  %v4338_v51 = vpop.f32.mrb[63].mxu1  ;;  %v4610_v6 = vpack.c.bf16 %v3238_v1, %v3237_v40  ;;  %v4624_v40 = vpack.c.bf16 %v3228_v36, %v3227_v59 }
0x1301   :  { %v3250_v51 = vld [vmem:[%s6473_s9 + $0x108] sm:$0xff] }
0x1302   :  { %v3026_v10 = vmax.f32 %v3017_v50, 0.0  ;;  %v3222_v50 = vld [vmem:[%s6473_s9 + $0x28] sm:$0xff] }
0x1304   :  { %4378 = vmatmul.mubr.f32.gmra.mrb[80].mxu0 %v3026_v10  ;;  %v3239_v10 = vld [vmem:[%s6473_s9 + $0xb0] sm:$0xff] }
0x1305   :  { %4380 = vmatprep.mubr.msk.f32.mxu0 %vm4931_vm1, %v4930_v2 }
0x132c   :  { %v3021_v55 = vpop.f32.mrb[64].mxu1 }
0x132d   :  { %v3022_v15 = vadd.f32 %v3021_v55, %v2935_v7  ;;  %v4341_v43 = vpop.f32.mrb[65].mxu1  ;;  %v3266_v7 = vld [vmem:[%s6473_s9 + $0x188] sm:$0xff]  ;;  %v4636_v55 = vpack.c.bf16 %v3250_v51, %v3249_v47 }
0x132e   :  { %v4634_v61 = vpack.c.bf16 %v3266_v7, %v3265_v3  ;;  %v3267_v43 = vld [vmem:[%s6473_s9 + $0x190] sm:$0xff]  ;;  %v3229_v7 = vld [vmem:[%s6473_s9 + $0x60] sm:$0xff] }
0x132f   :  { %v3027_v11 = vmax.f32 %v3022_v15, 0.0  ;;  %v3240_v15 = vld [vmem:[%s6473_s9 + $0xb8] sm:$0xff] }
0x1330   :  { %4635 = vmatprep.subr.bf16.mxu0 %v4634_v61 }
0x1331   :  { %4381 = vmatmul.mubr.f32.gmra.mrb[82].mxu0 %v3027_v11  ;;  %v3268_v11 = vld [vmem:[%s6473_s9 + $0x198] sm:$0xff] }
0x1332   :  { %4637 = vmatpush3.bf16.msra.mxu0 %v4636_v55  ;;  %v3248_v55 = vld [vmem:[%s6473_s9 + $0xf8] sm:$0xff] }
0x13cf   :  { %v3115_v20 = vpop.f32.mrb[78].mxu0 }
0x13d0   :  { %v3116_v56 = vadd.f32 %v3115_v20, %v3048_v9  ;;  %v4376_v41 = vpop.f32.mrb[79].mxu0  ;;  %v3251_v20 = vld [vmem:[%s6473_s9 + $0x110] sm:$0xff] }
0x13d1   :  { %v4612_v41 = vpack.c.bf16 %v3222_v50, %v3221_v12 }
0x13d2   :  { %v3129_v62 = vadd.f32 %v3116_v56, %v2920_v23  ;;  %v3252_v56 = vld [vmem:[%s6473_s9 + $0x118] sm:$0xff] }
0x13d4   :  { %v3132_v21 = vsel %vm165_vm2, %v3129_v62, 0.0 }
0x13d5   :  { %3133 = vadd.xlane.f32.xlu1 %v3132_v21  ;;  %v4640_v21 = vpack.c.bf16 %v3252_v56, %v3251_v20  ;;  %v3231_v20 = vld [vmem:[%s6473_s9 + $0x70] sm:$0xff]  ;;  %v3232_v56 = vld [vmem:[%s6473_s9 + $0x78] sm:$0xff] }
0x13d7   :  { %v3120_v4 = vpop.f32.mrb[80].mxu0 }
0x13d8   :  { %v3121_v58 = vadd.f32 %v3120_v4, %v3048_v9  ;;  %v4379_v49 = vpop.f32.mrb[81].mxu0  ;;  %v3269_v4 = vld [vmem:[%s6473_s9 + $0x1a0] sm:$0xff] }
0x13d9   :  { %v3224_v49 = vld [vmem:[%s6473_s9 + $0x38] sm:$0xff] }
0x13da   :  { %v3130_v37 = vadd.f32 %v3121_v58, %v2921_v52  ;;  %v4602_v52 = vpack.c.bf16 %v3234_v27, %v3233_v53  ;;  %v4614_v58 = vpack.c.bf16 %v3240_v15, %v3239_v10  ;;  %v3274_v53 = vld [vmem:[%s6473_s9 + $0x1c8] sm:$0xff]  ;;  %v3247_v10 = vld [vmem:[%s6473_s9 + $0xf0] sm:$0xff] }
0x13db   :  { %v3275_v15 = vld [vmem:[%s6473_s9 + $0x1d0] sm:$0xff] }
0x13dc   :  { %v3135_v25 = vsel %vm165_vm2, %v3130_v37, 0.0  ;;  %4603 = vmatprep.subr.bf16.mxu1 %v4602_v52 }
0x13dd   :  { %3136 = vadd.xlane.f32.xlu0 %v3135_v25  ;;  %4605 = vmatpush3.bf16.msra.mxu1 %v4604_v22  ;;  %v3270_v25 = vld [vmem:[%s6473_s9 + $0x1a8] sm:$0xff]  ;;  %v3257_v22 = vld [vmem:[%s6473_s9 + $0x140] sm:$0xff] }
0x13de   :  { %4607 = vmatprep.subr.bf16.mxu1 %v4606_v63  ;;  %v3258_v63 = vld [vmem:[%s6473_s9 + $0x148] sm:$0xff] }
0x13df   :  { %v4652_v1 = vpack.c.bf16 %v3258_v63, %v3257_v22 }
0x1404   :  { %v3125_v24 = vpop.f32.mrb[82].mxu0 }
0x1405   :  { %v3126_v16 = vadd.f32 %v3125_v24, %v3048_v9  ;;  %v4382_v26 = vpop.f32.mrb[83].mxu0  ;;  %v4638_v9 = vpack.c.bf16 %v3268_v11, %v3267_v43  ;;  %v3242_v24 = vld [vmem:[%s6473_s9 + $0xc8] sm:$0xff]  ;;  %v4630_v11 = vpack.c.bf16 %v3248_v55, %v3247_v10 }
0x1406   :  { %v3253_v26 = vld [vmem:[%s6473_s9 + $0x120] sm:$0xff]  ;;  %v3286_v10 = vld [vmem:[%s6473_s9 + $0x228] sm:$0xff] }
0x1407   :  { %v3131_v19 = vadd.f32 %v3126_v16, %v2922_v39  ;;  %v3220_v39 = vld [vmem:[%s6473_s9 + $0x18] sm:$0xff]  ;;  %4639 = vmatprep.subr.bf16.mxu0 %v4638_v9  ;;  %v4642_v16 = vpack.c.bf16 %v3270_v25, %v3269_v4  ;;  %v3278_v25 = vld [vmem:[%s6473_s9 + $0x1e8] sm:$0xff] }
0x1408   :  { %v4608_v33 = vpack.c.bf16 %v3220_v39, %v3219_v0  ;;  %4641 = vmatpush3.bf16.msra.mxu0 %v4640_v21  ;;  %v3245_v0 = vld [vmem:[%s6473_s9 + $0xe0] sm:$0xff]  ;;  %v3246_v39 = vld [vmem:[%s6473_s9 + $0xe8] sm:$0xff]  ;;  %v3276_v9 = vld [vmem:[%s6473_s9 + $0x1d8] sm:$0xff] }
0x1409   :  { %v3138_v8 = vsel %vm1355_vm10, %v3131_v19, 0.0  ;;  %4643 = vmatprep.subr.bf16.mxu0 %v4642_v16  ;;  %v4626_v3 = vpack.c.bf16 %v3246_v39, %v3245_v0  ;;  %v3259_v21 = vld [vmem:[%s6473_s9 + $0x150] sm:$0xff]  ;;  %v3260_v4 = vld [vmem:[%s6473_s9 + $0x158] sm:$0xff]  ;;  %v3281_v39 = vld [vmem:[%s6473_s9 + $0x200] sm:$0xff] }
0x140a   :  { %3139 = vadd.xlane.f32.xlu1 %v3138_v8  ;;  %4609 = vmatpush3.bf16.msra.mxu1 %v4608_v33  ;;  %v3271_v8 = vld [vmem:[%s6473_s9 + $0x1b0] sm:$0xff]  ;;  %v3230_v33 = vld [vmem:[%s6473_s9 + $0x68] sm:$0xff] }
0x140b   :  { %4611 = vmatprep.subr.bf16.mxu1 %v4610_v6  ;;  %v4628_v61 = vpack.c.bf16 %v3230_v33, %v3229_v7 }
0x140e   :  { %4613 = vmatpush3.bf16.msra.mxu1 %v4612_v41  ;;  %v4654_v41 = vpack.c.bf16 %v3276_v9, %v3275_v15 }
0x140f   :  { %4615 = vmatprep.subr.bf16.mxu1 %v4614_v58  ;;  %v4656_v58 = vpack.c.bf16 %v3260_v4, %v3259_v21  ;;  %v3289_v21 = vld [vmem:[%s6473_s9 + $0x240] sm:$0xff]  ;;  %v3290_v4 = vld [vmem:[%s6473_s9 + $0x248] sm:$0xff] }
0x1462   :  { %v3134_v17 = vpop.xlane.xlu1 %3133 }
0x1463   :  { %v3141_v57 = vmul.f32 0.015625, %v3134_v17  ;;  %v3272_v17 = vld [vmem:[%s6473_s9 + $0x1b8] sm:$0xff] }
0x1465   :  { %v6167_v28 = vsub.f32 %v3129_v62, %v3141_v57  ;;  %v3223_v62 = vld [vmem:[%s6473_s9 + $0x30] sm:$0xff] }
0x1466   :  { %v4616_v57 = vpack.c.bf16 %v3224_v49, %v3223_v62  ;;  %v4632_v62 = vpack.c.bf16 %v3232_v56, %v3231_v20  ;;  %v3174_v49 = vrot.slane %v6130_v31, %v1652_v38  ;;  %v3262_v38 = vld [vmem:[%s6473_s9 + $0x168] sm:$0xff]  ;;  %v3287_v56 = vld [vmem:[%s6473_s9 + $0x230] sm:$0xff] }
0x1467   :  { %v3147_v29 = vmul.f32 %v6167_v28, %v6167_v28 }
0x1468   :  { %4617 = vmatpush3.bf16.msra.mxu1 %v4616_v57 }
0x1469   :  { %v3150_v44 = vsel %vm165_vm2, %v3147_v29, 0.0  ;;  %v3225_v29 = vld [vmem:[%s6473_s9 + $0x40] sm:$0xff] }
0x146a   :  { %3151 = vadd.xlane.f32.xlu0 %v3150_v44  ;;  %v3137_v32 = vpop.xlane.xlu0 %3136  ;;  %v3226_v44 = vld [vmem:[%s6473_s9 + $0x48] sm:$0xff] }
0x146b   :  { %v3142_v5 = vmul.f32 0.015625, %v3137_v32  ;;  %v4620_v27 = vpack.c.bf16 %v3226_v44, %v3225_v29  ;;  %v3279_v29 = vld [vmem:[%s6473_s9 + $0x1f0] sm:$0xff]  ;;  %v3280_v44 = vld [vmem:[%s6473_s9 + $0x1f8] sm:$0xff] }
0x146d   :  { %v6172_v34 = vsub.f32 %v3130_v37, %v3142_v5  ;;  %v3241_v37 = vld [vmem:[%s6473_s9 + $0xc0] sm:$0xff] }
0x146e   :  { %v4618_v5 = vpack.c.bf16 %v3242_v24, %v3241_v37  ;;  %v3277_v37 = vld [vmem:[%s6473_s9 + $0x1e0] sm:$0xff] }
0x146f   :  { %v3148_v30 = vmul.f32 %v6172_v34, %v6172_v34  ;;  %v4658_v16 = vpack.c.bf16 %v3278_v25, %v3277_v37  ;;  %v3292_v37 = vld [vmem:[%s6473_s9 + $0x258] sm:$0xff] }
0x1470   :  { %4619 = vmatprep.subr.bf16.mxu1 %v4618_v5 }
0x1471   :  { %v3153_v54 = vsel %vm165_vm2, %v3148_v30, 0.0  ;;  %v3243_v30 = vld [vmem:[%s6473_s9 + $0xd0] sm:$0xff]  ;;  %4621 = vmatpush3.bf16.msra.mxu1 %v4620_v27 }
0x1472   :  { %3154 = vadd.xlane.f32.xlu1 %v3153_v54  ;;  %v4646_v54 = vpack.c.bf16 %v3272_v17, %v3271_v8 }
0x1497   :  { %v3140_v13 = vpop.xlane.xlu1 %3139 }
0x1498   :  { %v3143_v14 = vmul.f32 0.015625, %v3140_v13  ;;  %v3255_v13 = vld [vmem:[%s6473_s9 + $0x130] sm:$0xff] }
0x149a   :  { %v6177_v35 = vsub.f32 %v3131_v19, %v3143_v14  ;;  %v3254_v19 = vld [vmem:[%s6473_s9 + $0x128] sm:$0xff]  ;;  %v3256_v14 = vld [vmem:[%s6473_s9 + $0x138] sm:$0xff] }
0x149b   :  { %v4644_v32 = vpack.c.bf16 %v3254_v19, %v3253_v26  ;;  %v4648_v52 = vpack.c.bf16 %v3256_v14, %v3255_v13  ;;  %v3261_v26 = vld [vmem:[%s6473_s9 + $0x160] sm:$0xff]  ;;  %v3181_v19 = vrot.slane %v6130_v31, %v1659_v45  ;;  %v3264_v45 = vld [vmem:[%s6473_s9 + $0x178] sm:$0xff] }
0x149c   :  { %v3149_v60 = vmul.f32 %v6177_v35, %v6177_v35  ;;  %v4660_v17 = vpack.c.bf16 %v3262_v38, %v3261_v26  ;;  %v3295_v38 = vld [vmem:[%s6473_s9 + $0x270] sm:$0xff] }
0x149d   :  { %4645 = vmatpush3.bf16.msra.mxu0 %v4644_v32  ;;  %v4662_v32 = vpack.c.bf16 %v3280_v44, %v3279_v29 }
0x149e   :  { %v3156_v23 = vsel %vm1355_vm10, %v3149_v60, 0.0  ;;  %v3244_v60 = vld [vmem:[%s6473_s9 + $0xd8] sm:$0xff]  ;;  %4647 = vmatprep.subr.bf16.mxu0 %v4646_v54 }
0x149f   :  { %3157 = vadd.xlane.f32.xlu0 %v3156_v23  ;;  %v3273_v23 = vld [vmem:[%s6473_s9 + $0x1c0] sm:$0xff]  ;;  %v4622_v18 = vpack.c.bf16 %v3244_v60, %v3243_v30 }
0x14a0   :  { %v4650_v48 = vpack.c.bf16 %v3274_v53, %v3273_v23 }
0x14a1   :  { %4649 = vmatpush3.bf16.msra.mxu0 %v4648_v52  ;;  %4623 = vmatprep.subr.bf16.mxu1 %v4622_v18 }
0x14a2   :  { %4651 = vmatprep.subr.bf16.mxu0 %v4650_v48  ;;  %4625 = vmatpush3.bf16.msra.mxu1 %v4624_v40  ;;  %v3282_v40 = vld [vmem:[%s6473_s9 + $0x208] sm:$0xff] }
0x14a3   :  { %4627 = vmatprep.subr.bf16.mxu1 %v4626_v3 }
0x14a5   :  { %4653 = vmatpush3.bf16.msra.mxu0 %v4652_v1 }
0x14a6   :  { %4629 = vmatpush3.bf16.msra.mxu1 %v4628_v61  ;;  %4655 = vmatprep.subr.bf16.mxu0 %v4654_v41  ;;  %v4667_v61 = vpack.c.bf16 %v3282_v40, %v3281_v39  ;;  %v3288_v41 = vld [vmem:[%s6473_s9 + $0x238] sm:$0xff] }
0x14a7   :  { %4631 = vmatprep.subr.bf16.mxu1 %v4630_v11 }
0x14a9   :  { %4657 = vmatpush3.bf16.msra.mxu0 %v4656_v58  ;;  %v4679_v58 = vpack.c.bf16 %v3290_v4, %v3289_v21 }
0x14aa   :  { %4633 = vmatpush3.bf16.msra.mxu1 %v4632_v62  ;;  %4659 = vmatprep.subr.bf16.mxu0 %v4658_v16  ;;  %v4676_v62 = vpack.c.bf16 %v3288_v41, %v3287_v56  ;;  %v3294_v16 = vld [vmem:[%s6473_s9 + $0x268] sm:$0xff] }
0x14ab   :  { %4666 = vmatprep.subr.bf16.mxu1 %v4932_v46 }
0x14ad   :  { %4661 = vmatpush3.bf16.msra.mxu0 %v4660_v17 }
0x14ae   :  { %4663 = vmatprep.subr.bf16.mxu0 %v4662_v32 }
0x14f7   :  { %v3152_v12 = vpop.xlane.xlu0 %3151 }
0x14f8   :  { %v3159_v47 = vmul.f32 0.015625, %v3152_v12 }
0x14fa   :  { %v3162_v6 = vadd.f32 1e-05, %v3159_v47  ;;  %v3283_v47 = vld [vmem:[%s6473_s9 + $0x210] sm:$0xff] }
0x14fc   :  { %4895 = vrsqrt.f32 %v3162_v6  ;;  %v3284_v6 = vld [vmem:[%s6473_s9 + $0x218] sm:$0xff] }
0x14ff   :  { %v3155_v50 = vpop.xlane.xlu1 %3154 }
0x1500   :  { %v3160_v51 = vmul.f32 0.015625, %v3155_v50  ;;  %v4670_v50 = vpack.c.bf16 %v3284_v6, %v3283_v47 }
0x1502   :  { %v3163_v43 = vadd.f32 1e-05, %v3160_v51  ;;  %v3285_v51 = vld [vmem:[%s6473_s9 + $0x220] sm:$0xff] }
0x1503   :  { %v4673_v9 = vpack.c.bf16 %v3286_v10, %v3285_v51 }
0x1504   :  { %4897 = vrsqrt.f32 %v3163_v43 }
0x1506   :  { %v4896_v24 = vpop.eup %4895 }
0x1507   :  { %v3168_v8 = vmul.f32 %v4896_v24, %v6167_v28  ;;  %v4664_v28 = vpack.c.bf16 %v3264_v45, %v3263_v42  ;;  %v3293_v24 = vld [vmem:[%s6473_s9 + $0x260] sm:$0xff] }
0x1508   :  { %v4685_v26 = vpack.c.bf16 %v3294_v16, %v3293_v24  ;;  %v3680_v42 = vld [vmem:[%s6474_s10] ss:$0 sm:$0xff] }
0x1509   :  { %v3175_v57 = vmul.f32 %v3174_v49, %v3168_v8  ;;  %4665 = vmatpush3.bf16.msra.mxu0 %v4664_v28 }
0x150b   :  { %v3182_v31 = vadd.f32 %v3181_v19, %v3175_v57 }
0x150d   :  { %v3186_v5 = vrot.slane %v3182_v31, 2  ;;  %v3192_v30 = vrot.slane %v3182_v31, 6  ;;  %v3190_v33 = vrot.slane %v3182_v31, 4 }
0x150e   :  { %v4898_v54 = vpop.eup %4897 }
0x150f   :  { %v3169_v13 = vmul.f32 %v4898_v54, %v6172_v34  ;;  %v4771_v14 = vpack.i.bf16 %v3186_v5, %v3192_v30 }
0x1511   :  { %v3176_v60 = vmul.f32 %v3174_v49, %v3169_v13  ;;  %4772 = vrot.lane.b32.xlu1 %v4771_v14, %s4934_s25 }
0x1513   :  { %v3183_v23 = vadd.f32 %v3181_v19, %v3176_v60 }
0x1515   :  { %v3197_v53 = vrot.slane %v3183_v23, 2  ;;  %v3203_v27 = vrot.slane %v3183_v23, 6  ;;  %v3201_v11 = vrot.slane %v3183_v23, 4 }
0x1517   :  { %v4776_v59 = vpack.i.bf16 %v3197_v53, %v3203_v27 }
0x1519   :  { %4777 = vrot.lane.b32.xlu0 %v4776_v59, %s4934_s25 }
0x152c   :  { %v3158_v52 = vpop.xlane.xlu0 %3157 }
0x152d   :  { %v3161_v18 = vmul.f32 0.015625, %v3158_v52 }
0x152f   :  { %v3164_v36 = vadd.f32 1e-05, %v3161_v18 }
0x1531   :  { %4899 = vrsqrt.f32 %v3164_v36 }
0x153b   :  { %v4900_v48 = vpop.eup %4899 }
0x153c   :  { %v3170_v22 = vmul.f32 %v4900_v48, %v6177_v35 }
0x153e   :  { %v3177_v63 = vmul.f32 %v3174_v49, %v3170_v22  ;;  %v3291_v49 = vld [vmem:[%s6473_s9 + $0x250] sm:$0xff] }
0x153f   :  { %v4682_v25 = vpack.c.bf16 %v3292_v37, %v3291_v49 }
0x1540   :  { %v3184_v0 = vadd.f32 %v3181_v19, %v3177_v63  ;;  %v3296_v19 = vld [vmem:[%s6473_s9 + $0x278] sm:$0xff]  ;;  %s4940_s9 = smov [#allocation2]  }
0x1541   :  { %v4688_v8 = vpack.c.bf16 %v3296_v19, %v3295_v38 }
0x1542   :  { %v3208_v34 = vrot.slane %v3184_v0, 2 }
0x1544   :  { %3209 = vrot.lane.b32.xlu1 %v3208_v34, %s4934_s25  ;;  %s3521_s25 = sshll.u32 %s4940_s9, 4  ;;  %s3522_s25 = int_to_ptr.vmem [resolvable:$true] %s3521_s25 }
0x1545   :  { %s4906_s14 = scalar_lea.vmem %s3522_s25, 32  ;;  %p4911_p1 = scmp.lt.s32.totalorder %s3522_s25, %s3522_s25 }
0x1546   :  { %p4907_p0 = scmp.ne.s32.totalorder %s3522_s25, %s4906_s14  ;;  %p4912_p2 = scmp.lt.s32.totalorder %s4906_s14, %s4906_s14 }
0x1548   :  { %p4913_p3 = por %p4912_p2, %p4911_p1 }
0x154a   :  { %p4914_p4 = pnand %p4913_p3, %p4907_p0 }
0x1583   :  { %v4773_v1 = vpop.permute.xlu1 %4772 }
0x1584   :  { %v4775_v3 = vunpack.i.h.bf16 %v4773_v1  ;;  %v4774_v7 = vunpack.i.l.bf16 %v4773_v1 }
0x1586   :  { %v3213_v35 = vsel %vm165_vm2, %v3190_v33, %v4774_v7  ;;  %v3212_v12 = vsel %vm165_vm2, %v3182_v31, %v4775_v3 }
0x1587   :  { %3368 = vmatprep.mubr.f32.mxu1 %v3213_v35 }
0x1588   :  { %3369 = vmatmul.mubr.f32.vlgmr.msra.gmra.mrb[66].mxu1 %v3212_v12 }
0x1589   :  { %4668 = vmatpush3.bf16.msra.mxu1 %v4667_v61  ;;  %4415 = vmatprep.mubr.msk.f32.mxu1 %vm4931_vm1, %v4930_v2 }
0x158a   :  { %4669 = vmatprep.subr.bf16.mxu1 %v4932_v46 }
0x158b   :  { %v4778_v55 = vpop.permute.xlu0 %4777 }
0x158c   :  { %v4780_v15 = vunpack.i.h.bf16 %v4778_v55  ;;  %v4779_v43 = vunpack.i.l.bf16 %v4778_v55 }
0x158d   :  { %4671 = vmatpush3.bf16.msra.mxu1 %v4670_v50 }
0x158e   :  { %v3214_v20 = vsel %vm165_vm2, %v3183_v23, %v4780_v15  ;;  %v3215_v2 = vsel %vm165_vm2, %v3201_v11, %v4779_v43  ;;  %4672 = vmatprep.subr.bf16.mxu1 %v4932_v46 }
0x158f   :  { %3438 = vmatprep.mubr.f32.mxu0 %v3215_v2 }
0x1590   :  { %3439 = vmatmul.mubr.f32.vlgmr.msra.gmra.mrb[84].mxu0 %v3214_v20 }
0x1591   :  { %4674 = vmatpush3.bf16.msra.mxu1 %v4673_v9 }
0x1592   :  { %4675 = vmatprep.subr.bf16.mxu1 %v4932_v46 }
0x1595   :  { %4677 = vmatpush3.bf16.msra.mxu1 %v4676_v62 }
0x1596   :  { %4678 = vmatprep.subr.bf16.mxu1 %v4932_v46 }
0x1599   :  { %4680 = vmatpush3.bf16.msra.mxu1 %v4679_v58 }
0x159a   :  { %4681 = vmatprep.subr.bf16.mxu1 %v4932_v46 }
0x159d   :  { %4683 = vmatpush3.bf16.msra.mxu1 %v4682_v25 }
0x159e   :  { %4684 = vmatprep.subr.bf16.mxu1 %v4932_v46 }
0x15a1   :  { %4686 = vmatpush3.bf16.msra.mxu1 %v4685_v26 }
0x15a2   :  { %4687 = vmatprep.subr.bf16.mxu1 %v4932_v46 }
0x15a5   :  { %4689 = vmatpush3.bf16.msra.mxu1 %v4688_v8 }
0x15b6   :  { %v3210_v17 = vpop.permute.xlu1 %3209 }
0x15b7   :  { %v3216_v57 = vsel %vm165_vm2, %v3184_v0, %v3210_v17 }
0x15b8   :  { %4416 = vmatmul.mubr.f32.vlgmr.msra.gmra.mrb[68].mxu1 %v3216_v57 }
0x165b   :  { %v3895_v29 = vpop.f32.mrb[66].mxu1 }
0x165c   :  { %v3896_v44 = vpop.f32.mrb[67].mxu1 }
0x165d   :  { %v3897_v32 = vadd.f32 %v3896_v44, %v3895_v29 }
0x165f   :  { %v3371_v28 = vadd.f32 %v3897_v32, %v3680_v42 }
0x1663   :  { %v3930_v45 = vpop.f32.mrb[84].mxu0 }
0x1664   :  { %v3931_v31 = vpop.f32.mrb[85].mxu0 }
0x1665   :  { %v3932_v5 = vadd.f32 %v3931_v31, %v3930_v45 }
0x1667   :  { %v3441_v30 = vadd.f32 %v3932_v5, %v3371_v28 }
0x168b   :  { %v3510_v46 = vpop.f32.mrb[68].mxu1 }
0x168c   :  { %v3511_v54 = vadd.f32 %v3510_v46, %v3441_v30  ;;  %v4417_v13 = vpop.f32.mrb[69].mxu1 }
0x168e   :  { %3514 = vst [vmem:[#allocation2] sm:$0x3] %v3511_v54 }
0x168f   :  { %4917 = shalt.err (!%p4914_p4)
}
0x1690   :  { %s4918_s15 = scalar_lea.hbm %s6475_s11, 32 }
0x1691   :  { %p4919_p5 = scmp.ne.s32.totalorder %s6475_s11, %s4918_s15  ;;  %p4922_p6 = scmp.lt.u32.totalorder %s4918_s15, %s6475_s11 }
0x1693   :  { %p4924_p7 = pnand %p4922_p6, %p4919_p5 }
0x1695   :  { %4927 = shalt.err (!%p4924_p7)
}
0x1696   :  { %3524 = dma.vmem_to_hbm [thread:$0]  %s3522_s25, 32, %s6475_s11, [#allocation3]  }
0x1697   :  { %4928 = dma.done.wait [#allocation3], 32  }
0x1698   :  { %4929 = vsyncadd [#allocation3], 4294967264 }
0x1699   :  { %3528 = vsyncpa [#allocation3], 1 }

</bundles_post_ra>
